<compile_context>
chip_gen: v5e
topology: v5e:2x2
jax: 0.10.0
libtpu: 0.0.40
codegen_flags: <defaults>
</compile_context>

<pallas_src>
import functools

import jax
import jax.numpy as jnp
from jax import lax
from jax.experimental import pallas as pl
from jax.experimental.pallas import tpu as pltpu


# ----------------------------------------------------------------------------
# In-kernel batched masked-CE helper.
# ----------------------------------------------------------------------------
def _masked_ce_stats(logits, y, lens, tmask):
    """logits (TB, N, L); y, lens (TB, N, 1) int32; tmask (TB, 1, 1) f32.

    Returns (loss summed over valid tasks+samples, argmax-correct count,
    d(loss)/d(logits))."""
    TB, N, L = logits.shape
    iota = lax.broadcasted_iota(jnp.int32, (TB, N, L), 2)
    valid = iota < lens
    ml = jnp.where(valid, logits, jnp.float32(-1e30))
    mx = jnp.max(ml, axis=-1, keepdims=True)
    ex = jnp.exp(ml - mx)
    se = jnp.sum(ex, axis=-1, keepdims=True)
    lse = mx + jnp.log(se)
    onehot = (iota == y).astype(jnp.float32)
    logit_y = jnp.sum(onehot * logits, axis=-1, keepdims=True)
    loss = jnp.sum((lse - logit_y) * tmask)          # summed over samples+tasks
    p = ex / se
    dlogit = jnp.where(valid, p - onehot, 0.0)
    # first-index argmax (same tie-break as torch.argmax)
    cand = jnp.where(ml == mx, iota, L)
    pred = jnp.min(cand, axis=-1, keepdims=True)
    correct = jnp.sum((pred == y).astype(jnp.float32) * tmask)
    return loss, correct, dlogit


# ----------------------------------------------------------------------------
# Pallas kernel: one grid step == one block of TB meta-learning tasks.
# ----------------------------------------------------------------------------
def meta_kernel(K,
                feat_s_ref, y_s_ref, len_s_ref,
                feat_q_ref, dist_q_ref, y_q_ref, len_q_ref,
                w1t_ref, w2_ref, alpha_ref, tmask_ref,
                losses_ref, corr_ref, mind_ref):
    feat_s = feat_s_ref[...]                  # (TB, F, Ns*L)  lane-dense
    y_s = y_s_ref[...]                        # (TB, Ns, 1) int32
    len_s = len_s_ref[...]                    # (TB, Ns, 1) int32
    feat_q = feat_q_ref[...]                  # (TB, F, Nq*L)  lane-dense
    dist_q = dist_q_ref[...]                  # (TB, Nq, L)
    y_q = y_q_ref[...]                        # (TB, Nq, 1)
    len_q = len_q_ref[...]                    # (TB, Nq, 1)
    w1t = w1t_ref[...]                        # (H, F)  (transposed W1)
    w2 = w2_ref[...]                          # (1, H)
    alpha = alpha_ref[0]                      # (TB, 1, 1) per-task inner LR
    tmask = tmask_ref[0]                      # (TB, 1, 1) task-validity mask

    TB, Nq, L = dist_q.shape
    Ns = y_s.shape[1]
    H, F = w1t.shape
    Kp1 = K + 1

    def fwd(featT, fw1t, fw2b):
        # z1[t,h,m] = sum_f fw1t[t,h,f] * featT[t,f,m]  -> (TB, H, M), M on lanes
        z1 = jnp.einsum('thf,tfm->thm', fw1t, featT,
                        preferred_element_type=jnp.float32)
        h = jnp.maximum(z1, 0.0)
        # output layer is degenerate (out dim 1): VPU multiply + sublane reduce
        logits_flat = jnp.sum(h * fw2b[:, :, None], axis=1)       # (TB, M)
        return z1, h, logits_flat

    # min-distance baseline prediction: argmin(dist[:length]) == label
    # (recomputed identically at every k in the torch code)
    iota_l = lax.broadcasted_iota(jnp.int32, (TB, Nq, L), 2)
    md = jnp.where(iota_l < len_q, dist_q, jnp.float32(1e30))
    mn = jnp.min(md, axis=-1, keepdims=True)
    min_pred = jnp.min(jnp.where(md == mn, iota_l, L), axis=-1, keepdims=True)
    mind_c = jnp.sum((min_pred == y_q).astype(jnp.float32) * tmask)

    # per-task fast weights, stored transposed: fw1t (TB, H, F), fw2 (TB, H)
    fw1t = jnp.broadcast_to(w1t, (TB, H, F))
    fw2 = jnp.broadcast_to(w2, (TB, H))

    iota_k = lax.broadcasted_iota(jnp.int32, (1, Kp1), 1)
    loss_row = jnp.zeros((1, Kp1), jnp.float32)
    corr_row = jnp.zeros((1, Kp1), jnp.float32)

    # k = 0: query evaluation with the meta-parameters (params=None branch)
    _, _, lg0 = fwd(feat_q, fw1t, fw2)
    loss_k, corr_k, _ = _masked_ce_stats(lg0.reshape(TB, Nq, L), y_q, len_q, tmask)
    sel = (iota_k == 0).astype(jnp.float32)
    loss_row = loss_row + loss_k * sel
    corr_row = corr_row + corr_k * sel

    # inner loop: fast_weights = param - alpha * weight * grad  (nonzero_spt=True,
    # weight = int(param_name in info_param_map) == 1 for both params here).
    # K is tiny -> static unroll; switch to lax.fori_loop for large K.
    for k in range(1, K + 1):
        z1_s, h_s, lg_s = fwd(feat_s, fw1t, fw2)
        _, _, dlog = _masked_ce_stats(lg_s.reshape(TB, Ns, L), y_s, len_s, tmask)
        dl = dlog.reshape(TB, Ns * L)                               # (TB, Ms)
        dw2 = jnp.sum(h_s * dl[:, None, :], axis=2)                 # (TB, H)
        dh = fw2[:, :, None] * dl[:, None, :]                       # (TB, H, Ms)
        dz1 = jnp.where(z1_s > 0.0, dh, 0.0)
        dw1t = jnp.einsum('thm,tfm->thf', dz1, feat_s,
                          preferred_element_type=jnp.float32)       # (TB, H, F)
        fw1t = fw1t - alpha * dw1t
        fw2 = fw2 - alpha[:, :, 0] * dw2

        # query evaluation with fast weights
        _, _, lg_q = fwd(feat_q, fw1t, fw2)
        loss_k, corr_k, _ = _masked_ce_stats(lg_q.reshape(TB, Nq, L),
                                             y_q, len_q, tmask)
        sel = (iota_k == k).astype(jnp.float32)
        loss_row = loss_row + loss_k * sel
        corr_row = corr_row + corr_k * sel

    # write-once per-block outputs (no resident accumulator -> grid is parallel)
    losses_ref[0] = loss_row
    corr_ref[0] = corr_row
    mind_ref[0] = mind_c * jnp.ones((1, Kp1), jnp.float32)


# ----------------------------------------------------------------------------
# Wrapper
# ----------------------------------------------------------------------------
def meta_forward(feat_spt, y_spt, len_spt, feat_qry, y_qry, len_qry,
                 w1, w2, alphas, K, tasks_per_block=8):
    T, Ns, L, F = feat_spt.shape
    Nq = feat_qry.shape[1]
    H = w1.shape[1]
    Kp1 = K + 1

    TB = min(tasks_per_block, T)
    NB = pl.cdiv(T, TB)
    T_pad = NB * TB
    pad = T_pad - T

    def pad_tasks(x):
        if pad == 0:
            return x
        widths = [(0, pad)] + [(0, 0)] * (x.ndim - 1)
        return jnp.pad(x, widths)

    # Free HBM/XLA-side relayouts so the kernel never reshapes the big tensors:
    # features -> (T, F, N*L): F on sublanes, (samples x candidates) on lanes.
    featT_spt = pad_tasks(jnp.transpose(feat_spt, (0, 3, 1, 2)).reshape(T, F, Ns * L))
    featT_qry = pad_tasks(jnp.transpose(feat_qry, (0, 3, 1, 2)).reshape(T, F, Nq * L))
    dist_qry = pad_tasks(feat_qry[..., 0])                      # (T_pad, Nq, L)
    y_spt_p, len_spt_p = pad_tasks(y_spt), pad_tasks(len_spt)
    y_qry_p, len_qry_p = pad_tasks(y_qry), pad_tasks(len_qry)
    w1t = jnp.transpose(w1)                                     # (H, F)

    alphas_p = pad_tasks(alphas.reshape(T)).reshape(NB, TB, 1, 1).astype(jnp.float32)
    tmask = (jnp.arange(T_pad) < T).astype(jnp.float32).reshape(NB, TB, 1, 1)

    kern = functools.partial(meta_kernel, K)
    out_shape = tuple(jax.ShapeDtypeStruct((NB, 1, Kp1), jnp.float32)
                      for _ in range(3))
    grid_spec = pltpu.PrefetchScalarGridSpec(
        num_scalar_prefetch=0,
        grid=(NB,),
        in_specs=[
            pl.BlockSpec((TB, F, Ns * L), lambda i: (i, 0, 0)),
            pl.BlockSpec((TB, Ns, 1), lambda i: (i, 0, 0)),
            pl.BlockSpec((TB, Ns, 1), lambda i: (i, 0, 0)),
            pl.BlockSpec((TB, F, Nq * L), lambda i: (i, 0, 0)),
            pl.BlockSpec((TB, Nq, L), lambda i: (i, 0, 0)),
            pl.BlockSpec((TB, Nq, 1), lambda i: (i, 0, 0)),
            pl.BlockSpec((TB, Nq, 1), lambda i: (i, 0, 0)),
            pl.BlockSpec((H, F), lambda i: (0, 0)),
            pl.BlockSpec((1, H), lambda i: (0, 0)),
            pl.BlockSpec((1, TB, 1, 1), lambda i: (i, 0, 0, 0)),   # per-task alpha
            pl.BlockSpec((1, TB, 1, 1), lambda i: (i, 0, 0, 0)),   # task-valid mask
        ],
        out_specs=[
            pl.BlockSpec((1, 1, Kp1), lambda i: (i, 0, 0)),
            pl.BlockSpec((1, 1, Kp1), lambda i: (i, 0, 0)),
            pl.BlockSpec((1, 1, Kp1), lambda i: (i, 0, 0)),
        ],
    )
    losses, corrects, mind = pl.pallas_call(
        kern,
        out_shape=out_shape,
        grid_spec=grid_spec,
        compiler_params=pltpu.CompilerParams(
            # per-block outputs are independent -> shard task blocks across
            # TensorCores on v7x; harmless (sequential) on v5e/v6e.
            dimension_semantics=("parallel",),
            # explicit VMEM budget: tiny usage here; fits v7x's 64 MiB easily.
            vmem_limit_bytes=32 * 1024 * 1024),
    )(featT_spt, y_spt_p, len_spt_p, featT_qry, dist_qry, y_qry_p, len_qry_p,
      w1t, w2, alphas_p, tmask)

    losses_vec = jnp.sum(losses[:, 0, :], axis=0)     # (Kp1,)
    corr_vec = jnp.sum(corrects[:, 0, :], axis=0)
    mind_vec = jnp.sum(mind[:, 0, :], axis=0)
    batch_loss = losses_vec[-1] / T
    qry_sz = T * Nq
    gamma_dict = None  # TODO(synk): spatial-hierarchy / semantic-lr (gamma) branch not exercised
    return mind_vec, corr_vec, batch_loss, qry_sz, gamma_dict


# ----------------------------------------------------------------------------
# Pure-JAX reference (independent plain-layout math) for a correctness check.
# ----------------------------------------------------------------------------
def _ref_forward(feat, w1, w2):
    N, L, F = feat.shape
    feat2 = feat.reshape(N * L, F)
    z1 = feat2 @ w1
    h = jnp.maximum(z1, 0.0)
    logits = (h @ w2.T).reshape(N, L)
    return feat2, z1, h, logits


def _ref_ce(logits, y, lens):
    N, L = logits.shape
    iota = lax.broadcasted_iota(jnp.int32, (N, L), 1)
    valid = iota < lens
    ml = jnp.where(valid, logits, -1e30)
    mx = jnp.max(ml, axis=-1, keepdims=True)
    ex = jnp.exp(ml - mx)
    se = jnp.sum(ex, axis=-1, keepdims=True)
    lse = mx + jnp.log(se)
    onehot = (iota == y).astype(jnp.float32)
    logit_y = jnp.sum(onehot * logits, axis=-1, keepdims=True)
    loss = jnp.sum(lse - logit_y)
    dl = jnp.where(valid, ex / se - onehot, 0.0)
    pred = jnp.min(jnp.where(ml == mx, iota, L), axis=-1, keepdims=True)
    corr = jnp.sum((pred == y).astype(jnp.float32))
    return loss, corr, dl


def meta_reference(feat_spt, y_spt, len_spt, feat_qry, y_qry, len_qry,
                   w1, w2, alphas, K):
    T = feat_spt.shape[0]
    Kp1 = K + 1
    losses = jnp.zeros((Kp1,), jnp.float32)
    corrects = jnp.zeros((Kp1,), jnp.float32)
    mind = jnp.zeros((Kp1,), jnp.float32)
    for i in range(T):
        fs, ys, ls = feat_spt[i], y_spt[i], len_spt[i]
        fq, yq, lq = feat_qry[i], y_qry[i], len_qry[i]
        alpha = alphas[i, 0]
        Nq, L, _ = fq.shape
        dist = fq[:, :, 0]
        iota = lax.broadcasted_iota(jnp.int32, (Nq, L), 1)
        md = jnp.where(iota < lq, dist, 1e30)
        mn = jnp.min(md, axis=-1, keepdims=True)
        mp = jnp.min(jnp.where(md == mn, iota, L), axis=-1, keepdims=True)
        mind = mind + jnp.sum((mp == yq).astype(jnp.float32))

        _, _, _, lg = _ref_forward(fq, w1, w2)
        lo, co, _ = _ref_ce(lg, yq, lq)
        losses = losses.at[0].add(lo)
        corrects = corrects.at[0].add(co)

        fw1, fw2 = w1, w2
        for k in range(1, K + 1):
            f2, z1, h, lgs = _ref_forward(fs, fw1, fw2)
            _, _, dl = _ref_ce(lgs, ys, ls)
            Ns = fs.shape[0]
            dl2 = dl.reshape(Ns * L, 1)
            dw2 = h.T @ dl2
            dz1 = (dl2 * fw2) * (z1 > 0.0)
            dw1 = f2.T @ dz1
            fw1 = fw1 - alpha * dw1
            fw2 = fw2 - alpha * dw2.reshape(1, -1)
            _, _, _, lgq = _ref_forward(fq, fw1, fw2)
            lo, co, _ = _ref_ce(lgq, yq, lq)
            losses = losses.at[k].add(lo)
            corrects = corrects.at[k].add(co)
    return mind, corrects, losses[-1] / T


# ----------------------------------------------------------------------------
if __name__ == "__main__":
    # small shapes: T tasks, Ns/Nq support/query samples, L candidates,
    # F per-candidate features, H hidden, K inner steps
    T, Ns, Nq, L, F, H, K = 4, 8, 8, 16, 8, 16, 2
    alpha0, eta, lambda_, epoch = 0.05, 0.1, 1.0, 1

    key = jax.random.PRNGKey(0)
    ks = jax.random.split(key, 12)

    def make_set(k0, k1, k2, k3, n):
        feat = 0.5 * jax.random.normal(k0, (T, n, L, F), jnp.float32)
        dist = jax.random.uniform(k1, (T, n, L), jnp.float32, 0.0, 10.0)
        feat = feat.at[:, :, :, 0].set(dist)          # feature 0 = x_dist
        feat = feat.at[:, :, :, F - 1].set(1.0)       # bias feature
        lens = jax.random.randint(k2, (T, n, 1), L // 2, L + 1, jnp.int32)
        y = jnp.floor(jax.random.uniform(k3, (T, n, 1)) *
                      lens.astype(jnp.float32)).astype(jnp.int32)
        return feat, y, lens

    feat_spt, y_spt, len_spt = make_set(ks[0], ks[1], ks[2], ks[3], Ns)
    feat_qry, y_qry, len_qry = make_set(ks[4], ks[5], ks[6], ks[7], Nq)

    # deterministic "net" parameters
    w1 = 0.1 * jax.random.normal(ks[8], (F, H), jnp.float32)
    w2 = 0.1 * jax.random.normal(ks[9], (1, H), jnp.float32)

    # training-mode soft-dropout scaling of the inner LR:
    #   alpha *= (1 - eta) ** (Exponential(lambda_).sample() * epoch)
    exp_samples = jax.random.exponential(ks[10], (T,)) / lambda_
    alphas = (alpha0 * (1.0 - eta) ** (exp_samples * epoch)).reshape(T, 1)
    alphas = alphas.astype(jnp.float32)

    mind, corrects, batch_loss, qry_sz, gamma_dict = meta_forward(
        feat_spt, y_spt, len_spt, feat_qry, y_qry, len_qry, w1, w2, alphas, K)
    jax.block_until_ready((mind, corrects, batch_loss))

    # reference check
    r_mind, r_corr, r_loss = meta_reference(
        feat_spt, y_spt, len_spt, feat_qry, y_qry, len_qry, w1, w2, alphas, K)
    assert jnp.allclose(mind, r_mind, atol=1e-3), (mind, r_mind)
    assert jnp.allclose(corrects, r_corr, atol=1e-3), (corrects, r_corr)
    assert jnp.allclose(batch_loss, r_loss, rtol=1e-3, atol=1e-3), (batch_loss, r_loss)

    print("KERNEL_OK")
</pallas_src>

<mosaic_0001>
module attributes {stable_mosaic.version = 11 : i64} {
  func.func @meta_kernel(%arg0: i32, %arg1: memref<4x8x128xf32, #tpu.memory_space<vmem>>, %arg2: memref<4x8x1xi32, #tpu.memory_space<vmem>>, %arg3: memref<4x8x1xi32, #tpu.memory_space<vmem>>, %arg4: memref<4x8x128xf32, #tpu.memory_space<vmem>>, %arg5: memref<4x8x16xf32, #tpu.memory_space<vmem>>, %arg6: memref<4x8x1xi32, #tpu.memory_space<vmem>>, %arg7: memref<4x8x1xi32, #tpu.memory_space<vmem>>, %arg8: memref<16x8xf32, #tpu.memory_space<vmem>>, %arg9: memref<1x16xf32, #tpu.memory_space<vmem>>, %arg10: memref<1x4x1x1xf32, #tpu.memory_space<vmem>>, %arg11: memref<1x4x1x1xf32, #tpu.memory_space<vmem>>, %arg12: memref<1x1x3xf32, #tpu.memory_space<vmem>>, %arg13: memref<1x1x3xf32, #tpu.memory_space<vmem>>, %arg14: memref<1x1x3xf32, #tpu.memory_space<vmem>>) attributes {dimension_semantics = [#tpu.dimension_semantics<parallel>], iteration_bounds = array<i64: 1>, scalar_prefetch = 0 : i64, scratch_operands = 0 : i64, tpu.core_type = #tpu.core_type<tc>, window_params = [{transform_indices = @transform_0, window_bounds = array<i64: 4, 8, 128>}, {transform_indices = @transform_1, window_bounds = array<i64: 4, 8, 1>}, {transform_indices = @transform_2, window_bounds = array<i64: 4, 8, 1>}, {transform_indices = @transform_3, window_bounds = array<i64: 4, 8, 128>}, {transform_indices = @transform_4, window_bounds = array<i64: 4, 8, 16>}, {transform_indices = @transform_5, window_bounds = array<i64: 4, 8, 1>}, {transform_indices = @transform_6, window_bounds = array<i64: 4, 8, 1>}, {pipeline_mode = #tpu.pipeline_mode<synchronous>, transform_indices = @transform_7, window_bounds = array<i64: 16, 8>}, {pipeline_mode = #tpu.pipeline_mode<synchronous>, transform_indices = @transform_8, window_bounds = array<i64: 1, 16>}, {transform_indices = @transform_9, window_bounds = array<i64: 1, 4, 1, 1>}, {transform_indices = @transform_10, window_bounds = array<i64: 1, 4, 1, 1>}, {transform_indices = @transform_11, window_bounds = array<i64: 1, 1, 3>}, {transform_indices = @transform_12, window_bounds = array<i64: 1, 1, 3>}, {transform_indices = @transform_13, window_bounds = array<i64: 1, 1, 3>}]} {
    %c0 = arith.constant 0 : index
    %c0_0 = arith.constant 0 : index
    %c0_1 = arith.constant 0 : index
    %0 = vector.load %arg1[%c0, %c0_0, %c0_1] : memref<4x8x128xf32, #tpu.memory_space<vmem>>, vector<4x8x128xf32>
    %c0_2 = arith.constant 0 : index
    %c0_3 = arith.constant 0 : index
    %c0_4 = arith.constant 0 : index
    %1 = vector.load %arg2[%c0_2, %c0_3, %c0_4] : memref<4x8x1xi32, #tpu.memory_space<vmem>>, vector<4x8x1xi32>
    %c0_5 = arith.constant 0 : index
    %c0_6 = arith.constant 0 : index
    %c0_7 = arith.constant 0 : index
    %2 = vector.load %arg3[%c0_5, %c0_6, %c0_7] : memref<4x8x1xi32, #tpu.memory_space<vmem>>, vector<4x8x1xi32>
    %c0_8 = arith.constant 0 : index
    %c0_9 = arith.constant 0 : index
    %c0_10 = arith.constant 0 : index
    %3 = vector.load %arg4[%c0_8, %c0_9, %c0_10] : memref<4x8x128xf32, #tpu.memory_space<vmem>>, vector<4x8x128xf32>
    %c0_11 = arith.constant 0 : index
    %c0_12 = arith.constant 0 : index
    %c0_13 = arith.constant 0 : index
    %4 = vector.load %arg5[%c0_11, %c0_12, %c0_13] : memref<4x8x16xf32, #tpu.memory_space<vmem>>, vector<4x8x16xf32>
    %c0_14 = arith.constant 0 : index
    %c0_15 = arith.constant 0 : index
    %c0_16 = arith.constant 0 : index
    %5 = vector.load %arg6[%c0_14, %c0_15, %c0_16] : memref<4x8x1xi32, #tpu.memory_space<vmem>>, vector<4x8x1xi32>
    %c0_17 = arith.constant 0 : index
    %c0_18 = arith.constant 0 : index
    %c0_19 = arith.constant 0 : index
    %6 = vector.load %arg7[%c0_17, %c0_18, %c0_19] : memref<4x8x1xi32, #tpu.memory_space<vmem>>, vector<4x8x1xi32>
    %c0_20 = arith.constant 0 : index
    %c0_21 = arith.constant 0 : index
    %7 = vector.load %arg8[%c0_20, %c0_21] : memref<16x8xf32, #tpu.memory_space<vmem>>, vector<16x8xf32>
    %c0_22 = arith.constant 0 : index
    %c0_23 = arith.constant 0 : index
    %8 = vector.load %arg9[%c0_22, %c0_23] : memref<1x16xf32, #tpu.memory_space<vmem>>, vector<1x16xf32>
    %c0_24 = arith.constant 0 : index
    %c0_25 = arith.constant 0 : index
    %c0_26 = arith.constant 0 : index
    %c0_27 = arith.constant 0 : index
    %9 = vector.load %arg10[%c0_24, %c0_25, %c0_26, %c0_27] : memref<1x4x1x1xf32, #tpu.memory_space<vmem>>, vector<1x4x1x1xf32>
    %10 = vector.shape_cast %9 : vector<1x4x1x1xf32> to vector<4x1x1xf32>
    %c0_28 = arith.constant 0 : index
    %c0_29 = arith.constant 0 : index
    %c0_30 = arith.constant 0 : index
    %c0_31 = arith.constant 0 : index
    %11 = vector.load %arg11[%c0_28, %c0_29, %c0_30, %c0_31] : memref<1x4x1x1xf32, #tpu.memory_space<vmem>>, vector<1x4x1x1xf32>
    %12 = vector.shape_cast %11 : vector<1x4x1x1xf32> to vector<4x1x1xf32>
    %13 = tpu.iota {dimensions = array<i32: 2>} : vector<4x8x16xi32>
    %14 = vector.broadcast %6 : vector<4x8x1xi32> to vector<4x8x16xi32>
    %15 = arith.cmpi slt, %13, %14 : vector<4x8x16xi32>
    %cst = arith.constant 1.000000e+30 : f32
    %16 = vector.broadcast %cst : f32 to vector<4x8x16xf32>
    %17 = arith.select %15, %4, %16 : vector<4x8x16xi1>, vector<4x8x16xf32>
    %cst_32 = arith.constant dense<0x7F800000> : vector<4x8xf32>
    %18 = vector.multi_reduction <minimumf>, %17, %cst_32 [2] : vector<4x8x16xf32> to vector<4x8xf32>
    %19 = vector.shape_cast %18 : vector<4x8xf32> to vector<4x8x1xf32>
    %20 = vector.broadcast %19 : vector<4x8x1xf32> to vector<4x8x16xf32>
    %21 = arith.cmpf oeq, %17, %20 : vector<4x8x16xf32>
    %c16_i32 = arith.constant 16 : i32
    %22 = vector.broadcast %c16_i32 : i32 to vector<4x8x16xi32>
    %23 = arith.select %21, %13, %22 : vector<4x8x16xi1>, vector<4x8x16xi32>
    %cst_33 = arith.constant dense<2147483647> : vector<4x8xi32>
    %24 = vector.multi_reduction <minsi>, %23, %cst_33 [2] : vector<4x8x16xi32> to vector<4x8xi32>
    %25 = vector.shape_cast %24 : vector<4x8xi32> to vector<4x8x1xi32>
    %26 = arith.cmpi eq, %25, %5 : vector<4x8x1xi32>
    %27 = arith.extui %26 : vector<4x8x1xi1> to vector<4x8x1xi32>
    %28 = arith.sitofp %27 : vector<4x8x1xi32> to vector<4x8x1xf32>
    %29 = vector.broadcast %12 : vector<4x1x1xf32> to vector<4x8x1xf32>
    %30 = arith.mulf %28, %29 : vector<4x8x1xf32>
    %31 = vector.shape_cast %30 : vector<4x8x1xf32> to vector<1x4x8x1xf32>
    %cst_34 = arith.constant dense<0.000000e+00> : vector<1xf32>
    %32 = vector.multi_reduction <add>, %31, %cst_34 [1, 2, 3] : vector<1x4x8x1xf32> to vector<1xf32>
    %33 = vector.shape_cast %32 : vector<1xf32> to vector<1x1x1x1xf32>
    %34 = vector.extract %33[0, 0, 0, 0] : f32 from vector<1x1x1x1xf32>
    %35 = vector.shape_cast %7 : vector<16x8xf32> to vector<1x16x8xf32>
    %36 = vector.broadcast %35 : vector<1x16x8xf32> to vector<4x16x8xf32>
    %37 = vector.shape_cast %8 : vector<1x16xf32> to vector<1x16xf32>
    %38 = vector.broadcast %37 : vector<1x16xf32> to vector<4x16xf32>
    %39 = tpu.iota {dimensions = array<i32: 1>} : vector<1x3xi32>
    %cst_35 = arith.constant 0.000000e+00 : f32
    %40 = vector.broadcast %cst_35 : f32 to vector<1x3xf32>
    %cst_36 = arith.constant 0.000000e+00 : f32
    %41 = vector.broadcast %cst_36 : f32 to vector<1x3xf32>
    "tpu.trace_start"() <{level = 10 : i32, message = "thf,tfm->thm"}> : () -> ()
    %cst_37 = arith.constant dense<0.000000e+00> : vector<4x16x128xf32>
    %42 = tpu.matmul %36, %3, %cst_37 {dimension_numbers = #tpu.dot_dimension_numbers<[2], [1], [1], [2], [0, 0, 0, 1, 1, 2], [0], [0]>} : vector<4x16x8xf32>, vector<4x8x128xf32>, vector<4x16x128xf32> -> vector<4x16x128xf32>
    "tpu.trace_stop"() : () -> ()
    %cst_38 = arith.constant 0.000000e+00 : f32
    %43 = vector.broadcast %cst_38 : f32 to vector<4x16x128xf32>
    %44 = arith.maximumf %42, %43 : vector<4x16x128xf32>
    %45 = vector.shape_cast %38 : vector<4x16xf32> to vector<4x16x1xf32>
    %46 = vector.broadcast %45 : vector<4x16x1xf32> to vector<4x16x128xf32>
    %47 = arith.mulf %44, %46 : vector<4x16x128xf32>
    %cst_39 = arith.constant dense<0.000000e+00> : vector<4x128xf32>
    %48 = vector.multi_reduction <add>, %47, %cst_39 [1] : vector<4x16x128xf32> to vector<4x128xf32>
    %49 = vector.shape_cast %48 : vector<4x128xf32> to vector<4x8x16xf32>
    %50 = tpu.iota {dimensions = array<i32: 2>} : vector<4x8x16xi32>
    %51 = vector.broadcast %6 : vector<4x8x1xi32> to vector<4x8x16xi32>
    %52 = arith.cmpi slt, %50, %51 : vector<4x8x16xi32>
    %cst_40 = arith.constant -1.000000e+30 : f32
    %53 = vector.broadcast %cst_40 : f32 to vector<4x8x16xf32>
    %54 = arith.select %52, %49, %53 : vector<4x8x16xi1>, vector<4x8x16xf32>
    %cst_41 = arith.constant dense<0xFF800000> : vector<4x8xf32>
    %55 = vector.multi_reduction <maximumf>, %54, %cst_41 [2] : vector<4x8x16xf32> to vector<4x8xf32>
    %56 = vector.shape_cast %55 : vector<4x8xf32> to vector<4x8x1xf32>
    %57 = vector.broadcast %56 : vector<4x8x1xf32> to vector<4x8x16xf32>
    %58 = arith.subf %54, %57 : vector<4x8x16xf32>
    %59 = math.exp %58 : vector<4x8x16xf32>
    %cst_42 = arith.constant dense<0.000000e+00> : vector<4x8xf32>
    %60 = vector.multi_reduction <add>, %59, %cst_42 [2] : vector<4x8x16xf32> to vector<4x8xf32>
    %61 = vector.shape_cast %60 : vector<4x8xf32> to vector<4x8x1xf32>
    %62 = math.log %61 : vector<4x8x1xf32>
    %63 = arith.addf %56, %62 : vector<4x8x1xf32>
    %64 = vector.broadcast %5 : vector<4x8x1xi32> to vector<4x8x16xi32>
    %65 = arith.cmpi eq, %50, %64 : vector<4x8x16xi32>
    %66 = arith.extui %65 : vector<4x8x16xi1> to vector<4x8x16xi32>
    %67 = arith.sitofp %66 : vector<4x8x16xi32> to vector<4x8x16xf32>
    %68 = arith.mulf %67, %49 : vector<4x8x16xf32>
    %cst_43 = arith.constant dense<0.000000e+00> : vector<4x8xf32>
    %69 = vector.multi_reduction <add>, %68, %cst_43 [2] : vector<4x8x16xf32> to vector<4x8xf32>
    %70 = vector.shape_cast %69 : vector<4x8xf32> to vector<4x8x1xf32>
    %71 = arith.subf %63, %70 : vector<4x8x1xf32>
    %72 = vector.broadcast %12 : vector<4x1x1xf32> to vector<4x8x1xf32>
    %73 = arith.mulf %71, %72 : vector<4x8x1xf32>
    %74 = vector.shape_cast %73 : vector<4x8x1xf32> to vector<1x4x8x1xf32>
    %cst_44 = arith.constant dense<0.000000e+00> : vector<1xf32>
    %75 = vector.multi_reduction <add>, %74, %cst_44 [1, 2, 3] : vector<1x4x8x1xf32> to vector<1xf32>
    %76 = vector.shape_cast %75 : vector<1xf32> to vector<1x1x1x1xf32>
    %77 = vector.extract %76[0, 0, 0, 0] : f32 from vector<1x1x1x1xf32>
    %78 = vector.broadcast %56 : vector<4x8x1xf32> to vector<4x8x16xf32>
    %79 = arith.cmpf oeq, %54, %78 : vector<4x8x16xf32>
    %c16_i32_45 = arith.constant 16 : i32
    %80 = vector.broadcast %c16_i32_45 : i32 to vector<4x8x16xi32>
    %81 = arith.select %79, %50, %80 : vector<4x8x16xi1>, vector<4x8x16xi32>
    %cst_46 = arith.constant dense<2147483647> : vector<4x8xi32>
    %82 = vector.multi_reduction <minsi>, %81, %cst_46 [2] : vector<4x8x16xi32> to vector<4x8xi32>
    %83 = vector.shape_cast %82 : vector<4x8xi32> to vector<4x8x1xi32>
    %84 = arith.cmpi eq, %83, %5 : vector<4x8x1xi32>
    %85 = arith.extui %84 : vector<4x8x1xi1> to vector<4x8x1xi32>
    %86 = arith.sitofp %85 : vector<4x8x1xi32> to vector<4x8x1xf32>
    %87 = vector.broadcast %12 : vector<4x1x1xf32> to vector<4x8x1xf32>
    %88 = arith.mulf %86, %87 : vector<4x8x1xf32>
    %89 = vector.shape_cast %88 : vector<4x8x1xf32> to vector<1x4x8x1xf32>
    %cst_47 = arith.constant dense<0.000000e+00> : vector<1xf32>
    %90 = vector.multi_reduction <add>, %89, %cst_47 [1, 2, 3] : vector<1x4x8x1xf32> to vector<1xf32>
    %91 = vector.shape_cast %90 : vector<1xf32> to vector<1x1x1x1xf32>
    %92 = vector.extract %91[0, 0, 0, 0] : f32 from vector<1x1x1x1xf32>
    %c0_i32 = arith.constant 0 : i32
    %93 = vector.broadcast %c0_i32 : i32 to vector<1x3xi32>
    %94 = arith.cmpi eq, %39, %93 : vector<1x3xi32>
    %95 = arith.extui %94 : vector<1x3xi1> to vector<1x3xi32>
    %96 = arith.sitofp %95 : vector<1x3xi32> to vector<1x3xf32>
    %97 = vector.broadcast %77 : f32 to vector<1x3xf32>
    %98 = arith.mulf %97, %96 : vector<1x3xf32>
    %99 = arith.addf %40, %98 : vector<1x3xf32>
    %100 = vector.broadcast %92 : f32 to vector<1x3xf32>
    %101 = arith.mulf %100, %96 : vector<1x3xf32>
    %102 = arith.addf %41, %101 : vector<1x3xf32>
    "tpu.trace_start"() <{level = 10 : i32, message = "thf,tfm->thm"}> : () -> ()
    %cst_48 = arith.constant dense<0.000000e+00> : vector<4x16x128xf32>
    %103 = tpu.matmul %36, %0, %cst_48 {dimension_numbers = #tpu.dot_dimension_numbers<[2], [1], [1], [2], [0, 0, 0, 1, 1, 2], [0], [0]>} : vector<4x16x8xf32>, vector<4x8x128xf32>, vector<4x16x128xf32> -> vector<4x16x128xf32>
    "tpu.trace_stop"() : () -> ()
    %cst_49 = arith.constant 0.000000e+00 : f32
    %104 = vector.broadcast %cst_49 : f32 to vector<4x16x128xf32>
    %105 = arith.maximumf %103, %104 : vector<4x16x128xf32>
    %106 = vector.shape_cast %38 : vector<4x16xf32> to vector<4x16x1xf32>
    %107 = vector.broadcast %106 : vector<4x16x1xf32> to vector<4x16x128xf32>
    %108 = arith.mulf %105, %107 : vector<4x16x128xf32>
    %cst_50 = arith.constant dense<0.000000e+00> : vector<4x128xf32>
    %109 = vector.multi_reduction <add>, %108, %cst_50 [1] : vector<4x16x128xf32> to vector<4x128xf32>
    %110 = vector.shape_cast %109 : vector<4x128xf32> to vector<4x8x16xf32>
    %111 = tpu.iota {dimensions = array<i32: 2>} : vector<4x8x16xi32>
    %112 = vector.broadcast %2 : vector<4x8x1xi32> to vector<4x8x16xi32>
    %113 = arith.cmpi slt, %111, %112 : vector<4x8x16xi32>
    %cst_51 = arith.constant -1.000000e+30 : f32
    %114 = vector.broadcast %cst_51 : f32 to vector<4x8x16xf32>
    %115 = arith.select %113, %110, %114 : vector<4x8x16xi1>, vector<4x8x16xf32>
    %cst_52 = arith.constant dense<0xFF800000> : vector<4x8xf32>
    %116 = vector.multi_reduction <maximumf>, %115, %cst_52 [2] : vector<4x8x16xf32> to vector<4x8xf32>
    %117 = vector.shape_cast %116 : vector<4x8xf32> to vector<4x8x1xf32>
    %118 = vector.broadcast %117 : vector<4x8x1xf32> to vector<4x8x16xf32>
    %119 = arith.subf %115, %118 : vector<4x8x16xf32>
    %120 = math.exp %119 : vector<4x8x16xf32>
    %cst_53 = arith.constant dense<0.000000e+00> : vector<4x8xf32>
    %121 = vector.multi_reduction <add>, %120, %cst_53 [2] : vector<4x8x16xf32> to vector<4x8xf32>
    %122 = vector.shape_cast %121 : vector<4x8xf32> to vector<4x8x1xf32>
    %123 = vector.broadcast %1 : vector<4x8x1xi32> to vector<4x8x16xi32>
    %124 = arith.cmpi eq, %111, %123 : vector<4x8x16xi32>
    %125 = arith.extui %124 : vector<4x8x16xi1> to vector<4x8x16xi32>
    %126 = arith.sitofp %125 : vector<4x8x16xi32> to vector<4x8x16xf32>
    %127 = vector.broadcast %122 : vector<4x8x1xf32> to vector<4x8x16xf32>
    %128 = arith.divf %120, %127 : vector<4x8x16xf32>
    %129 = arith.subf %128, %126 : vector<4x8x16xf32>
    %cst_54 = arith.constant 0.000000e+00 : f32
    %130 = vector.broadcast %cst_54 : f32 to vector<4x8x16xf32>
    %131 = arith.select %113, %129, %130 : vector<4x8x16xi1>, vector<4x8x16xf32>
    %132 = vector.shape_cast %131 : vector<4x8x16xf32> to vector<4x128xf32>
    %133 = vector.shape_cast %132 : vector<4x128xf32> to vector<4x1x128xf32>
    %134 = vector.broadcast %133 : vector<4x1x128xf32> to vector<4x16x128xf32>
    %135 = arith.mulf %105, %134 : vector<4x16x128xf32>
    %cst_55 = arith.constant dense<0.000000e+00> : vector<4x16xf32>
    %136 = vector.multi_reduction <add>, %135, %cst_55 [2] : vector<4x16x128xf32> to vector<4x16xf32>
    %137 = vector.shape_cast %38 : vector<4x16xf32> to vector<4x16x1xf32>
    %138 = vector.shape_cast %132 : vector<4x128xf32> to vector<4x1x128xf32>
    %139 = vector.broadcast %137 : vector<4x16x1xf32> to vector<4x16x128xf32>
    %140 = vector.broadcast %138 : vector<4x1x128xf32> to vector<4x16x128xf32>
    %141 = arith.mulf %139, %140 : vector<4x16x128xf32>
    %cst_56 = arith.constant 0.000000e+00 : f32
    %142 = vector.broadcast %cst_56 : f32 to vector<4x16x128xf32>
    %143 = arith.cmpf ogt, %103, %142 : vector<4x16x128xf32>
    %cst_57 = arith.constant 0.000000e+00 : f32
    %144 = vector.broadcast %cst_57 : f32 to vector<4x16x128xf32>
    %145 = arith.select %143, %141, %144 : vector<4x16x128xi1>, vector<4x16x128xf32>
    "tpu.trace_start"() <{level = 10 : i32, message = "thm,tfm->thf"}> : () -> ()
    %cst_58 = arith.constant dense<0.000000e+00> : vector<4x16x8xf32>
    %146 = tpu.matmul %145, %0, %cst_58 {dimension_numbers = #tpu.dot_dimension_numbers<[2], [2], [1], [1], [0, 0, 0, 1, 1, 1], [0], [0]>} : vector<4x16x128xf32>, vector<4x8x128xf32>, vector<4x16x8xf32> -> vector<4x16x8xf32>
    "tpu.trace_stop"() : () -> ()
    %147 = vector.broadcast %10 : vector<4x1x1xf32> to vector<4x16x8xf32>
    %148 = arith.mulf %147, %146 : vector<4x16x8xf32>
    %149 = arith.subf %36, %148 : vector<4x16x8xf32>
    %150 = vector.shape_cast %10 : vector<4x1x1xf32> to vector<4x1xf32>
    %151 = vector.broadcast %150 : vector<4x1xf32> to vector<4x16xf32>
    %152 = arith.mulf %151, %136 : vector<4x16xf32>
    %153 = arith.subf %38, %152 : vector<4x16xf32>
    "tpu.trace_start"() <{level = 10 : i32, message = "thf,tfm->thm"}> : () -> ()
    %cst_59 = arith.constant dense<0.000000e+00> : vector<4x16x128xf32>
    %154 = tpu.matmul %149, %3, %cst_59 {dimension_numbers = #tpu.dot_dimension_numbers<[2], [1], [1], [2], [0, 0, 0, 1, 1, 2], [0], [0]>} : vector<4x16x8xf32>, vector<4x8x128xf32>, vector<4x16x128xf32> -> vector<4x16x128xf32>
    "tpu.trace_stop"() : () -> ()
    %cst_60 = arith.constant 0.000000e+00 : f32
    %155 = vector.broadcast %cst_60 : f32 to vector<4x16x128xf32>
    %156 = arith.maximumf %154, %155 : vector<4x16x128xf32>
    %157 = vector.shape_cast %153 : vector<4x16xf32> to vector<4x16x1xf32>
    %158 = vector.broadcast %157 : vector<4x16x1xf32> to vector<4x16x128xf32>
    %159 = arith.mulf %156, %158 : vector<4x16x128xf32>
    %cst_61 = arith.constant dense<0.000000e+00> : vector<4x128xf32>
    %160 = vector.multi_reduction <add>, %159, %cst_61 [1] : vector<4x16x128xf32> to vector<4x128xf32>
    %161 = vector.shape_cast %160 : vector<4x128xf32> to vector<4x8x16xf32>
    %162 = tpu.iota {dimensions = array<i32: 2>} : vector<4x8x16xi32>
    %163 = vector.broadcast %6 : vector<4x8x1xi32> to vector<4x8x16xi32>
    %164 = arith.cmpi slt, %162, %163 : vector<4x8x16xi32>
    %cst_62 = arith.constant -1.000000e+30 : f32
    %165 = vector.broadcast %cst_62 : f32 to vector<4x8x16xf32>
    %166 = arith.select %164, %161, %165 : vector<4x8x16xi1>, vector<4x8x16xf32>
    %cst_63 = arith.constant dense<0xFF800000> : vector<4x8xf32>
    %167 = vector.multi_reduction <maximumf>, %166, %cst_63 [2] : vector<4x8x16xf32> to vector<4x8xf32>
    %168 = vector.shape_cast %167 : vector<4x8xf32> to vector<4x8x1xf32>
    %169 = vector.broadcast %168 : vector<4x8x1xf32> to vector<4x8x16xf32>
    %170 = arith.subf %166, %169 : vector<4x8x16xf32>
    %171 = math.exp %170 : vector<4x8x16xf32>
    %cst_64 = arith.constant dense<0.000000e+00> : vector<4x8xf32>
    %172 = vector.multi_reduction <add>, %171, %cst_64 [2] : vector<4x8x16xf32> to vector<4x8xf32>
    %173 = vector.shape_cast %172 : vector<4x8xf32> to vector<4x8x1xf32>
    %174 = math.log %173 : vector<4x8x1xf32>
    %175 = arith.addf %168, %174 : vector<4x8x1xf32>
    %176 = vector.broadcast %5 : vector<4x8x1xi32> to vector<4x8x16xi32>
    %177 = arith.cmpi eq, %162, %176 : vector<4x8x16xi32>
    %178 = arith.extui %177 : vector<4x8x16xi1> to vector<4x8x16xi32>
    %179 = arith.sitofp %178 : vector<4x8x16xi32> to vector<4x8x16xf32>
    %180 = arith.mulf %179, %161 : vector<4x8x16xf32>
    %cst_65 = arith.constant dense<0.000000e+00> : vector<4x8xf32>
    %181 = vector.multi_reduction <add>, %180, %cst_65 [2] : vector<4x8x16xf32> to vector<4x8xf32>
    %182 = vector.shape_cast %181 : vector<4x8xf32> to vector<4x8x1xf32>
    %183 = arith.subf %175, %182 : vector<4x8x1xf32>
    %184 = vector.broadcast %12 : vector<4x1x1xf32> to vector<4x8x1xf32>
    %185 = arith.mulf %183, %184 : vector<4x8x1xf32>
    %186 = vector.shape_cast %185 : vector<4x8x1xf32> to vector<1x4x8x1xf32>
    %cst_66 = arith.constant dense<0.000000e+00> : vector<1xf32>
    %187 = vector.multi_reduction <add>, %186, %cst_66 [1, 2, 3] : vector<1x4x8x1xf32> to vector<1xf32>
    %188 = vector.shape_cast %187 : vector<1xf32> to vector<1x1x1x1xf32>
    %189 = vector.extract %188[0, 0, 0, 0] : f32 from vector<1x1x1x1xf32>
    %190 = vector.broadcast %168 : vector<4x8x1xf32> to vector<4x8x16xf32>
    %191 = arith.cmpf oeq, %166, %190 : vector<4x8x16xf32>
    %c16_i32_67 = arith.constant 16 : i32
    %192 = vector.broadcast %c16_i32_67 : i32 to vector<4x8x16xi32>
    %193 = arith.select %191, %162, %192 : vector<4x8x16xi1>, vector<4x8x16xi32>
    %cst_68 = arith.constant dense<2147483647> : vector<4x8xi32>
    %194 = vector.multi_reduction <minsi>, %193, %cst_68 [2] : vector<4x8x16xi32> to vector<4x8xi32>
    %195 = vector.shape_cast %194 : vector<4x8xi32> to vector<4x8x1xi32>
    %196 = arith.cmpi eq, %195, %5 : vector<4x8x1xi32>
    %197 = arith.extui %196 : vector<4x8x1xi1> to vector<4x8x1xi32>
    %198 = arith.sitofp %197 : vector<4x8x1xi32> to vector<4x8x1xf32>
    %199 = vector.broadcast %12 : vector<4x1x1xf32> to vector<4x8x1xf32>
    %200 = arith.mulf %198, %199 : vector<4x8x1xf32>
    %201 = vector.shape_cast %200 : vector<4x8x1xf32> to vector<1x4x8x1xf32>
    %cst_69 = arith.constant dense<0.000000e+00> : vector<1xf32>
    %202 = vector.multi_reduction <add>, %201, %cst_69 [1, 2, 3] : vector<1x4x8x1xf32> to vector<1xf32>
    %203 = vector.shape_cast %202 : vector<1xf32> to vector<1x1x1x1xf32>
    %204 = vector.extract %203[0, 0, 0, 0] : f32 from vector<1x1x1x1xf32>
    %c1_i32 = arith.constant 1 : i32
    %205 = vector.broadcast %c1_i32 : i32 to vector<1x3xi32>
    %206 = arith.cmpi eq, %39, %205 : vector<1x3xi32>
    %207 = arith.extui %206 : vector<1x3xi1> to vector<1x3xi32>
    %208 = arith.sitofp %207 : vector<1x3xi32> to vector<1x3xf32>
    %209 = vector.broadcast %189 : f32 to vector<1x3xf32>
    %210 = arith.mulf %209, %208 : vector<1x3xf32>
    %211 = arith.addf %99, %210 : vector<1x3xf32>
    %212 = vector.broadcast %204 : f32 to vector<1x3xf32>
    %213 = arith.mulf %212, %208 : vector<1x3xf32>
    %214 = arith.addf %102, %213 : vector<1x3xf32>
    "tpu.trace_start"() <{level = 10 : i32, message = "thf,tfm->thm"}> : () -> ()
    %cst_70 = arith.constant dense<0.000000e+00> : vector<4x16x128xf32>
    %215 = tpu.matmul %149, %0, %cst_70 {dimension_numbers = #tpu.dot_dimension_numbers<[2], [1], [1], [2], [0, 0, 0, 1, 1, 2], [0], [0]>} : vector<4x16x8xf32>, vector<4x8x128xf32>, vector<4x16x128xf32> -> vector<4x16x128xf32>
    "tpu.trace_stop"() : () -> ()
    %cst_71 = arith.constant 0.000000e+00 : f32
    %216 = vector.broadcast %cst_71 : f32 to vector<4x16x128xf32>
    %217 = arith.maximumf %215, %216 : vector<4x16x128xf32>
    %218 = vector.shape_cast %153 : vector<4x16xf32> to vector<4x16x1xf32>
    %219 = vector.broadcast %218 : vector<4x16x1xf32> to vector<4x16x128xf32>
    %220 = arith.mulf %217, %219 : vector<4x16x128xf32>
    %cst_72 = arith.constant dense<0.000000e+00> : vector<4x128xf32>
    %221 = vector.multi_reduction <add>, %220, %cst_72 [1] : vector<4x16x128xf32> to vector<4x128xf32>
    %222 = vector.shape_cast %221 : vector<4x128xf32> to vector<4x8x16xf32>
    %223 = tpu.iota {dimensions = array<i32: 2>} : vector<4x8x16xi32>
    %224 = vector.broadcast %2 : vector<4x8x1xi32> to vector<4x8x16xi32>
    %225 = arith.cmpi slt, %223, %224 : vector<4x8x16xi32>
    %cst_73 = arith.constant -1.000000e+30 : f32
    %226 = vector.broadcast %cst_73 : f32 to vector<4x8x16xf32>
    %227 = arith.select %225, %222, %226 : vector<4x8x16xi1>, vector<4x8x16xf32>
    %cst_74 = arith.constant dense<0xFF800000> : vector<4x8xf32>
    %228 = vector.multi_reduction <maximumf>, %227, %cst_74 [2] : vector<4x8x16xf32> to vector<4x8xf32>
    %229 = vector.shape_cast %228 : vector<4x8xf32> to vector<4x8x1xf32>
    %230 = vector.broadcast %229 : vector<4x8x1xf32> to vector<4x8x16xf32>
    %231 = arith.subf %227, %230 : vector<4x8x16xf32>
    %232 = math.exp %231 : vector<4x8x16xf32>
    %cst_75 = arith.constant dense<0.000000e+00> : vector<4x8xf32>
    %233 = vector.multi_reduction <add>, %232, %cst_75 [2] : vector<4x8x16xf32> to vector<4x8xf32>
    %234 = vector.shape_cast %233 : vector<4x8xf32> to vector<4x8x1xf32>
    %235 = vector.broadcast %1 : vector<4x8x1xi32> to vector<4x8x16xi32>
    %236 = arith.cmpi eq, %223, %235 : vector<4x8x16xi32>
    %237 = arith.extui %236 : vector<4x8x16xi1> to vector<4x8x16xi32>
    %238 = arith.sitofp %237 : vector<4x8x16xi32> to vector<4x8x16xf32>
    %239 = vector.broadcast %234 : vector<4x8x1xf32> to vector<4x8x16xf32>
    %240 = arith.divf %232, %239 : vector<4x8x16xf32>
    %241 = arith.subf %240, %238 : vector<4x8x16xf32>
    %cst_76 = arith.constant 0.000000e+00 : f32
    %242 = vector.broadcast %cst_76 : f32 to vector<4x8x16xf32>
    %243 = arith.select %225, %241, %242 : vector<4x8x16xi1>, vector<4x8x16xf32>
    %244 = vector.shape_cast %243 : vector<4x8x16xf32> to vector<4x128xf32>
    %245 = vector.shape_cast %244 : vector<4x128xf32> to vector<4x1x128xf32>
    %246 = vector.broadcast %245 : vector<4x1x128xf32> to vector<4x16x128xf32>
    %247 = arith.mulf %217, %246 : vector<4x16x128xf32>
    %cst_77 = arith.constant dense<0.000000e+00> : vector<4x16xf32>
    %248 = vector.multi_reduction <add>, %247, %cst_77 [2] : vector<4x16x128xf32> to vector<4x16xf32>
    %249 = vector.shape_cast %153 : vector<4x16xf32> to vector<4x16x1xf32>
    %250 = vector.shape_cast %244 : vector<4x128xf32> to vector<4x1x128xf32>
    %251 = vector.broadcast %249 : vector<4x16x1xf32> to vector<4x16x128xf32>
    %252 = vector.broadcast %250 : vector<4x1x128xf32> to vector<4x16x128xf32>
    %253 = arith.mulf %251, %252 : vector<4x16x128xf32>
    %cst_78 = arith.constant 0.000000e+00 : f32
    %254 = vector.broadcast %cst_78 : f32 to vector<4x16x128xf32>
    %255 = arith.cmpf ogt, %215, %254 : vector<4x16x128xf32>
    %cst_79 = arith.constant 0.000000e+00 : f32
    %256 = vector.broadcast %cst_79 : f32 to vector<4x16x128xf32>
    %257 = arith.select %255, %253, %256 : vector<4x16x128xi1>, vector<4x16x128xf32>
    "tpu.trace_start"() <{level = 10 : i32, message = "thm,tfm->thf"}> : () -> ()
    %cst_80 = arith.constant dense<0.000000e+00> : vector<4x16x8xf32>
    %258 = tpu.matmul %257, %0, %cst_80 {dimension_numbers = #tpu.dot_dimension_numbers<[2], [2], [1], [1], [0, 0, 0, 1, 1, 1], [0], [0]>} : vector<4x16x128xf32>, vector<4x8x128xf32>, vector<4x16x8xf32> -> vector<4x16x8xf32>
    "tpu.trace_stop"() : () -> ()
    %259 = vector.broadcast %10 : vector<4x1x1xf32> to vector<4x16x8xf32>
    %260 = arith.mulf %259, %258 : vector<4x16x8xf32>
    %261 = arith.subf %149, %260 : vector<4x16x8xf32>
    %262 = vector.shape_cast %10 : vector<4x1x1xf32> to vector<4x1xf32>
    %263 = vector.broadcast %262 : vector<4x1xf32> to vector<4x16xf32>
    %264 = arith.mulf %263, %248 : vector<4x16xf32>
    %265 = arith.subf %153, %264 : vector<4x16xf32>
    "tpu.trace_start"() <{level = 10 : i32, message = "thf,tfm->thm"}> : () -> ()
    %cst_81 = arith.constant dense<0.000000e+00> : vector<4x16x128xf32>
    %266 = tpu.matmul %261, %3, %cst_81 {dimension_numbers = #tpu.dot_dimension_numbers<[2], [1], [1], [2], [0, 0, 0, 1, 1, 2], [0], [0]>} : vector<4x16x8xf32>, vector<4x8x128xf32>, vector<4x16x128xf32> -> vector<4x16x128xf32>
    "tpu.trace_stop"() : () -> ()
    %cst_82 = arith.constant 0.000000e+00 : f32
    %267 = vector.broadcast %cst_82 : f32 to vector<4x16x128xf32>
    %268 = arith.maximumf %266, %267 : vector<4x16x128xf32>
    %269 = vector.shape_cast %265 : vector<4x16xf32> to vector<4x16x1xf32>
    %270 = vector.broadcast %269 : vector<4x16x1xf32> to vector<4x16x128xf32>
    %271 = arith.mulf %268, %270 : vector<4x16x128xf32>
    %cst_83 = arith.constant dense<0.000000e+00> : vector<4x128xf32>
    %272 = vector.multi_reduction <add>, %271, %cst_83 [1] : vector<4x16x128xf32> to vector<4x128xf32>
    %273 = vector.shape_cast %272 : vector<4x128xf32> to vector<4x8x16xf32>
    %274 = tpu.iota {dimensions = array<i32: 2>} : vector<4x8x16xi32>
    %275 = vector.broadcast %6 : vector<4x8x1xi32> to vector<4x8x16xi32>
    %276 = arith.cmpi slt, %274, %275 : vector<4x8x16xi32>
    %cst_84 = arith.constant -1.000000e+30 : f32
    %277 = vector.broadcast %cst_84 : f32 to vector<4x8x16xf32>
    %278 = arith.select %276, %273, %277 : vector<4x8x16xi1>, vector<4x8x16xf32>
    %cst_85 = arith.constant dense<0xFF800000> : vector<4x8xf32>
    %279 = vector.multi_reduction <maximumf>, %278, %cst_85 [2] : vector<4x8x16xf32> to vector<4x8xf32>
    %280 = vector.shape_cast %279 : vector<4x8xf32> to vector<4x8x1xf32>
    %281 = vector.broadcast %280 : vector<4x8x1xf32> to vector<4x8x16xf32>
    %282 = arith.subf %278, %281 : vector<4x8x16xf32>
    %283 = math.exp %282 : vector<4x8x16xf32>
    %cst_86 = arith.constant dense<0.000000e+00> : vector<4x8xf32>
    %284 = vector.multi_reduction <add>, %283, %cst_86 [2] : vector<4x8x16xf32> to vector<4x8xf32>
    %285 = vector.shape_cast %284 : vector<4x8xf32> to vector<4x8x1xf32>
    %286 = math.log %285 : vector<4x8x1xf32>
    %287 = arith.addf %280, %286 : vector<4x8x1xf32>
    %288 = vector.broadcast %5 : vector<4x8x1xi32> to vector<4x8x16xi32>
    %289 = arith.cmpi eq, %274, %288 : vector<4x8x16xi32>
    %290 = arith.extui %289 : vector<4x8x16xi1> to vector<4x8x16xi32>
    %291 = arith.sitofp %290 : vector<4x8x16xi32> to vector<4x8x16xf32>
    %292 = arith.mulf %291, %273 : vector<4x8x16xf32>
    %cst_87 = arith.constant dense<0.000000e+00> : vector<4x8xf32>
    %293 = vector.multi_reduction <add>, %292, %cst_87 [2] : vector<4x8x16xf32> to vector<4x8xf32>
    %294 = vector.shape_cast %293 : vector<4x8xf32> to vector<4x8x1xf32>
    %295 = arith.subf %287, %294 : vector<4x8x1xf32>
    %296 = vector.broadcast %12 : vector<4x1x1xf32> to vector<4x8x1xf32>
    %297 = arith.mulf %295, %296 : vector<4x8x1xf32>
    %298 = vector.shape_cast %297 : vector<4x8x1xf32> to vector<1x4x8x1xf32>
    %cst_88 = arith.constant dense<0.000000e+00> : vector<1xf32>
    %299 = vector.multi_reduction <add>, %298, %cst_88 [1, 2, 3] : vector<1x4x8x1xf32> to vector<1xf32>
    %300 = vector.shape_cast %299 : vector<1xf32> to vector<1x1x1x1xf32>
    %301 = vector.extract %300[0, 0, 0, 0] : f32 from vector<1x1x1x1xf32>
    %302 = vector.broadcast %280 : vector<4x8x1xf32> to vector<4x8x16xf32>
    %303 = arith.cmpf oeq, %278, %302 : vector<4x8x16xf32>
    %c16_i32_89 = arith.constant 16 : i32
    %304 = vector.broadcast %c16_i32_89 : i32 to vector<4x8x16xi32>
    %305 = arith.select %303, %274, %304 : vector<4x8x16xi1>, vector<4x8x16xi32>
    %cst_90 = arith.constant dense<2147483647> : vector<4x8xi32>
    %306 = vector.multi_reduction <minsi>, %305, %cst_90 [2] : vector<4x8x16xi32> to vector<4x8xi32>
    %307 = vector.shape_cast %306 : vector<4x8xi32> to vector<4x8x1xi32>
    %308 = arith.cmpi eq, %307, %5 : vector<4x8x1xi32>
    %309 = arith.extui %308 : vector<4x8x1xi1> to vector<4x8x1xi32>
    %310 = arith.sitofp %309 : vector<4x8x1xi32> to vector<4x8x1xf32>
    %311 = vector.broadcast %12 : vector<4x1x1xf32> to vector<4x8x1xf32>
    %312 = arith.mulf %310, %311 : vector<4x8x1xf32>
    %313 = vector.shape_cast %312 : vector<4x8x1xf32> to vector<1x4x8x1xf32>
    %cst_91 = arith.constant dense<0.000000e+00> : vector<1xf32>
    %314 = vector.multi_reduction <add>, %313, %cst_91 [1, 2, 3] : vector<1x4x8x1xf32> to vector<1xf32>
    %315 = vector.shape_cast %314 : vector<1xf32> to vector<1x1x1x1xf32>
    %316 = vector.extract %315[0, 0, 0, 0] : f32 from vector<1x1x1x1xf32>
    %c2_i32 = arith.constant 2 : i32
    %317 = vector.broadcast %c2_i32 : i32 to vector<1x3xi32>
    %318 = arith.cmpi eq, %39, %317 : vector<1x3xi32>
    %319 = arith.extui %318 : vector<1x3xi1> to vector<1x3xi32>
    %320 = arith.sitofp %319 : vector<1x3xi32> to vector<1x3xf32>
    %321 = vector.broadcast %301 : f32 to vector<1x3xf32>
    %322 = arith.mulf %321, %320 : vector<1x3xf32>
    %323 = arith.addf %211, %322 : vector<1x3xf32>
    %324 = vector.broadcast %316 : f32 to vector<1x3xf32>
    %325 = arith.mulf %324, %320 : vector<1x3xf32>
    %326 = arith.addf %214, %325 : vector<1x3xf32>
    %c0_92 = arith.constant 0 : index
    %c0_93 = arith.constant 0 : index
    %c0_94 = arith.constant 0 : index
    %327 = vector.load %arg12[%c0_92, %c0_93, %c0_94] : memref<1x1x3xf32, #tpu.memory_space<vmem>>, vector<1x1x3xf32>
    %328 = vector.shape_cast %327 : vector<1x1x3xf32> to vector<1x3xf32>
    %329 = vector.shape_cast %323 : vector<1x3xf32> to vector<1x1x3xf32>
    tpu.vector_store %arg12[%c0_92, %c0_93, %c0_94], %329 {strides = array<i32>} : memref<1x1x3xf32, #tpu.memory_space<vmem>>, vector<1x1x3xf32>,
    %c0_95 = arith.constant 0 : index
    %c0_96 = arith.constant 0 : index
    %c0_97 = arith.constant 0 : index
    %330 = vector.load %arg13[%c0_95, %c0_96, %c0_97] : memref<1x1x3xf32, #tpu.memory_space<vmem>>, vector<1x1x3xf32>
    %331 = vector.shape_cast %330 : vector<1x1x3xf32> to vector<1x3xf32>
    %332 = vector.shape_cast %326 : vector<1x3xf32> to vector<1x1x3xf32>
    tpu.vector_store %arg13[%c0_95, %c0_96, %c0_97], %332 {strides = array<i32>} : memref<1x1x3xf32, #tpu.memory_space<vmem>>, vector<1x1x3xf32>,
    %cst_98 = arith.constant 1.000000e+00 : f32
    %333 = vector.broadcast %cst_98 : f32 to vector<1x3xf32>
    %334 = vector.broadcast %34 : f32 to vector<1x3xf32>
    %335 = arith.mulf %334, %333 : vector<1x3xf32>
    %c0_99 = arith.constant 0 : index
    %c0_100 = arith.constant 0 : index
    %c0_101 = arith.constant 0 : index
    %336 = vector.load %arg14[%c0_99, %c0_100, %c0_101] : memref<1x1x3xf32, #tpu.memory_space<vmem>>, vector<1x1x3xf32>
    %337 = vector.shape_cast %336 : vector<1x1x3xf32> to vector<1x3xf32>
    %338 = vector.shape_cast %335 : vector<1x3xf32> to vector<1x1x3xf32>
    tpu.vector_store %arg14[%c0_99, %c0_100, %c0_101], %338 {strides = array<i32>} : memref<1x1x3xf32, #tpu.memory_space<vmem>>, vector<1x1x3xf32>,
    return
  }
  func.func @transform_0(%arg0: i32) -> (i32, i32, i32) {
    %c0_i32 = arith.constant 0 : i32
    %c0_i32_0 = arith.constant 0 : i32
    %c0_i32_1 = arith.constant 0 : i32
    return %arg0, %c0_i32, %c0_i32_0 : i32, i32, i32
  }
  func.func @transform_1(%arg0: i32) -> (i32, i32, i32) {
    %c0_i32 = arith.constant 0 : i32
    %c0_i32_0 = arith.constant 0 : i32
    %c0_i32_1 = arith.constant 0 : i32
    return %arg0, %c0_i32, %c0_i32_0 : i32, i32, i32
  }
  func.func @transform_2(%arg0: i32) -> (i32, i32, i32) {
    %c0_i32 = arith.constant 0 : i32
    %c0_i32_0 = arith.constant 0 : i32
    %c0_i32_1 = arith.constant 0 : i32
    return %arg0, %c0_i32, %c0_i32_0 : i32, i32, i32
  }
  func.func @transform_3(%arg0: i32) -> (i32, i32, i32) {
    %c0_i32 = arith.constant 0 : i32
    %c0_i32_0 = arith.constant 0 : i32
    %c0_i32_1 = arith.constant 0 : i32
    return %arg0, %c0_i32, %c0_i32_0 : i32, i32, i32
  }
  func.func @transform_4(%arg0: i32) -> (i32, i32, i32) {
    %c0_i32 = arith.constant 0 : i32
    %c0_i32_0 = arith.constant 0 : i32
    %c0_i32_1 = arith.constant 0 : i32
    return %arg0, %c0_i32, %c0_i32_0 : i32, i32, i32
  }
  func.func @transform_5(%arg0: i32) -> (i32, i32, i32) {
    %c0_i32 = arith.constant 0 : i32
    %c0_i32_0 = arith.constant 0 : i32
    %c0_i32_1 = arith.constant 0 : i32
    return %arg0, %c0_i32, %c0_i32_0 : i32, i32, i32
  }
  func.func @transform_6(%arg0: i32) -> (i32, i32, i32) {
    %c0_i32 = arith.constant 0 : i32
    %c0_i32_0 = arith.constant 0 : i32
    %c0_i32_1 = arith.constant 0 : i32
    return %arg0, %c0_i32, %c0_i32_0 : i32, i32, i32
  }
  func.func @transform_7(%arg0: i32) -> (i32, i32) {
    %c0_i32 = arith.constant 0 : i32
    %c0_i32_0 = arith.constant 0 : i32
    %c0_i32_1 = arith.constant 0 : i32
    return %c0_i32, %c0_i32_0 : i32, i32
  }
  func.func @transform_8(%arg0: i32) -> (i32, i32) {
    %c0_i32 = arith.constant 0 : i32
    %c0_i32_0 = arith.constant 0 : i32
    %c0_i32_1 = arith.constant 0 : i32
    return %c0_i32, %c0_i32_0 : i32, i32
  }
  func.func @transform_9(%arg0: i32) -> (i32, i32, i32, i32) {
    %c0_i32 = arith.constant 0 : i32
    %c0_i32_0 = arith.constant 0 : i32
    %c0_i32_1 = arith.constant 0 : i32
    %c0_i32_2 = arith.constant 0 : i32
    return %arg0, %c0_i32, %c0_i32_0, %c0_i32_1 : i32, i32, i32, i32
  }
  func.func @transform_10(%arg0: i32) -> (i32, i32, i32, i32) {
    %c0_i32 = arith.constant 0 : i32
    %c0_i32_0 = arith.constant 0 : i32
    %c0_i32_1 = arith.constant 0 : i32
    %c0_i32_2 = arith.constant 0 : i32
    return %arg0, %c0_i32, %c0_i32_0, %c0_i32_1 : i32, i32, i32, i32
  }
  func.func @transform_11(%arg0: i32) -> (i32, i32, i32) {
    %c0_i32 = arith.constant 0 : i32
    %c0_i32_0 = arith.constant 0 : i32
    %c0_i32_1 = arith.constant 0 : i32
    return %arg0, %c0_i32, %c0_i32_0 : i32, i32, i32
  }
  func.func @transform_12(%arg0: i32) -> (i32, i32, i32) {
    %c0_i32 = arith.constant 0 : i32
    %c0_i32_0 = arith.constant 0 : i32
    %c0_i32_1 = arith.constant 0 : i32
    return %arg0, %c0_i32, %c0_i32_0 : i32, i32, i32
  }
  func.func @transform_13(%arg0: i32) -> (i32, i32, i32) {
    %c0_i32 = arith.constant 0 : i32
    %c0_i32_0 = arith.constant 0 : i32
    %c0_i32_1 = arith.constant 0 : i32
    return %arg0, %c0_i32, %c0_i32_0 : i32, i32, i32
  }
}

</mosaic_0001>

<bundles_post_ra>
// kernel: tpu_custom_call.1
= control target key start
LH: loop header
LB: loop body
LE: loop exit
PB: predicated region body
PF: predicated region fallthrough
CT: control target
= control target key end

     0   :  { %19 = vsyncpa [#allocation3], 0  ;;  %v82_v3 = vlaneseq  ;;  %v7171_v4 = vmov 0   ;;  %vm7258_vm0 = vcmask 64512   ;;  %s7157_s0 = inlined_call_operand.vmem [shape: f32[4,8,128], index: 0, kind: input, shape index: {}]   ;;  %s7158_s1 = inlined_call_operand.vmem [shape: s32[4,8,1], index: 1, kind: input, shape index: {}]   ;;  %s7159_s2 = inlined_call_operand.vmem [shape: s32[4,8,1], index: 2, kind: input, shape index: {}]   ;;  %s7160_s3 = inlined_call_operand.vmem [shape: f32[4,8,128], index: 3, kind: input, shape index: {}]   ;;  %s7161_s4 = inlined_call_operand.vmem [shape: f32[4,8,16], index: 4, kind: input, shape index: {}]   ;;  %s7162_s5 = inlined_call_operand.vmem [shape: s32[4,8,1], index: 5, kind: input, shape index: {}]   ;;  %s7163_s6 = inlined_call_operand.vmem [shape: s32[4,8,1], index: 6, kind: input, shape index: {}]   ;;  %s7164_s7 = inlined_call_operand.vmem [shape: f32[16,8], index: 7, kind: input, shape index: {}]   ;;  %s7165_s8 = inlined_call_operand.vmem [shape: f32[1,16], index: 8, kind: input, shape index: {}]   ;;  %s7166_s9 = inlined_call_operand.vmem [shape: f32[1,4,1,1], index: 9, kind: input, shape index: {}]   ;;  %s7167_s10 = inlined_call_operand.vmem [shape: f32[1,4,1,1], index: 10, kind: input, shape index: {}]   ;;  %s7168_s11 = inlined_call_operand.hbm [shape: f32[1,1,3], index: 11, kind: output, shape index: {0}]   ;;  %s7169_s12 = inlined_call_operand.hbm [shape: f32[1,1,3], index: 12, kind: output, shape index: {1}]   ;;  %s7170_s13 = inlined_call_operand.hbm [shape: f32[1,1,3], index: 13, kind: output, shape index: {2}]  }
   0x1   :  { %v55_v0 = vld [vmem:[%s7160_s3] sm:$0xff]  ;;  %v56_v1 = vld [vmem:[%s7160_s3 + $0x8] sm:$0xff]  ;;  %v57_v2 = vld [vmem:[%s7160_s3 + $0x10] sm:$0xff]  ;;  %4382 = vset.pattern.permute.xlu1 %v7171_v4 }
   0x2   :  { %255 = vmatpush.msra.mxu0 %v55_v0  ;;  %v58_v5 = vld [vmem:[%s7160_s3 + $0x18] sm:$0xff]  ;;  %v67_v6 = vld [vmem:[%s7163_s6] sm:$0xff]  ;;  %278 = vmatpush.msra.mxu1 %v56_v1  ;;  %v4692_v8 = vshrl.u32 %v82_v3, 7  ;;  %v44_v9 = vld [vmem:[%s7157_s0 + $0x8] sm:$0xff] }
   0x3   :  { %v71_v7 = vld [vmem:[%s7164_s7] sm:$0xff]  ;;  %301 = vmatpush.msra.mxu2 %v57_v2  ;;  %324 = vmatpush.msra.mxu3 %v58_v5  ;;  %v45_v11 = vld [vmem:[%s7157_s0 + $0x10] sm:$0xff]  ;;  %v46_v12 = vld [vmem:[%s7157_s0 + $0x18] sm:$0xff] }
   0x4   :  { %7267 = vst [vmem:[#allocation9_spill] sm:$0xff] %v4692_v8  ;;  %85 = vperm.xlu1 %4382, %v67_v6   ;;  %4273 = vmatmul.msk.f32.vlgmr.msra.gmra.mxu0 %vm7258_vm0, %v71_v7  ;;  %v43_v10 = vld [vmem:[%s7157_s0] sm:$0xff]  ;;  %v69_v13 = vld [vmem:[%s7163_s6 + $0x10] sm:$0xff] }
   0x5   :  { %4275 = vmatmul.msk.f32.vlgmr.msra.gmra.mxu1 %vm7258_vm0, %v71_v7  ;;  %4277 = vmatmul.msk.f32.vlgmr.msra.gmra.mxu2 %vm7258_vm0, %v71_v7 }
   0x6   :  { %4279 = vmatmul.msk.f32.vlgmr.msra.gmra.mxu3 %vm7258_vm0, %v71_v7  ;;  %827 = vmatpush.msrb.mxu1 %v44_v9 }
   0x7   :  { %4380 = vset.pattern.permute.xlu0 %v4692_v8  ;;  %804 = vmatpush.msrb.mxu0 %v43_v10 }
   0x8   :  { %850 = vmatpush.msrb.mxu2 %v45_v11 }
   0x9   :  { %20 = vsyncpa [#allocation5], 0  ;;  %873 = vmatpush.msrb.mxu3 %v46_v12  ;;  %v68_v14 = vld [vmem:[%s7163_s6 + $0x8] sm:$0xff]  ;;  %4383 = vset.pattern.permute.xlu2 %v7171_v4  ;;  %v4400_v16 = vld [vmem:[%s7165_s8] ss:$0 sm:$0xff]  ;;  %v4735_v19 = vadd.s32 8, %v4692_v8 }
   0xa   :  { %v72_v15 = vld [vmem:[%s7164_s7 + $0x8] sm:$0xff]  ;;  %91 = vperm.xlu2 %4383, %v69_v13   ;;  %1656 = vmatpush.xpose.msra.mxu2 %v45_v11  ;;  %v70_v17 = vld [vmem:[%s7163_s6 + $0x18] sm:$0xff]  ;;  %v51_v22 = vld [vmem:[%s7159_s2] sm:$0xff]  ;;  %v4760_v24 = vand.u32 127, %v82_v3  ;;  %vm104_vm1 = vcmask 130048   ;;  %s4590_s20 = smov 96  }
   0xb   :  { %1679 = vmatpush.xpose.msra.mxu3 %v46_v12  ;;  %1610 = vmatpush.xpose.msra.mxu0 %v43_v10  ;;  %v52_v18 = vld [vmem:[%s7159_s2 + $0x8] sm:$0xff]  ;;  %7268 = vst [vmem:[#allocation10_spill] sm:$0xff] %v4735_v19  ;;  %v54_v20 = vld [vmem:[%s7159_s2 + $0x18] sm:$0xff]  ;;  %v59_v25 = vld [vmem:[%s7161_s4] sm:$0xff]  ;;  %s4591_s21 = smov 32   ;;  %vm7261_vm3 = vcmask 1041409  }
   0xc   :  { %88 = vperm.xlu1 %4382, %v68_v14   ;;  %1633 = vmatpush.xpose.msra.mxu1 %v44_v9  ;;  %v50_v21 = vld [vmem:[%s7158_s1 + $0x18] sm:$0xff]  ;;  %v48_v23 = vld [vmem:[%s7158_s1 + $0x8] sm:$0xff]  ;;  %v53_v26 = vld [vmem:[%s7159_s2 + $0x10] sm:$0xff]  ;;  %s4592_s22 = smov 64   ;;  %s4593_s6 = smov 16   ;;  %vm7203_vm8 = vcmask 1042434  }
   0xd   :  { %4274 = vmatmul.msk.f32.gmra.mxu0 %vm7258_vm0, %v72_v15  ;;  %4276 = vmatmul.msk.f32.gmra.mxu1 %vm7258_vm0, %v72_v15  ;;  %v49_v30 = vld [vmem:[%s7158_s1 + $0x10] sm:$0xff]  ;;  %v47_v33 = vld [vmem:[%s7158_s1] sm:$0xff]  ;;  %s4589_s1 = smov 48   ;;  %s4594_s23 = smov 80   ;;  %vm7202_vm9 = vcmask 1043459   ;;  %vm508_vm10 = vcmask 1047556  }
   0xe   :  { %4278 = vmatmul.msk.f32.gmra.mxu2 %vm7258_vm0, %v72_v15  ;;  %4280 = vmatmul.msk.f32.gmra.mxu3 %vm7258_vm0, %v72_v15  ;;  %s4595_s24 = smov 112   ;;  %s4229_s27 = sshll.u32 %s7168_s11, 4  ;;  %s4230_s27 = int_to_ptr.hbm [resolvable:$true] %s4229_s27 }
   0xf   :  { %344 = vperm.xlu0 %4380, %v4400_v16   ;;  %s4600_s28 = smov [#allocation4]   ;;  %s4251_s30 = sshll.u32 %s7170_s13, 4  ;;  %s4252_s30 = int_to_ptr.hbm [resolvable:$true] %s4251_s30 }
  0x12   :  { %94 = vperm.xlu2 %4383, %v70_v17  }
  0x14   :  { %1101 = vperm.xlu1 %4382, %v52_v18  }
  0x15   :  { %4290 = vmatmul.msk.f32.vlgmr.msrb.gmra.mxu0 %vm7258_vm0, %v71_v7  ;;  %4292 = vmatmul.msk.f32.vlgmr.msrb.gmra.mxu1 %vm7258_vm0, %v71_v7 }
  0x16   :  { %4294 = vmatmul.msk.f32.vlgmr.msrb.gmra.mxu2 %vm7258_vm0, %v71_v7  ;;  %4296 = vmatmul.msk.f32.vlgmr.msrb.gmra.mxu3 %vm7258_vm0, %v71_v7 }
  0x17   :  { %4381 = vset.pattern.permute.xlu0 %v4735_v19  ;;  %2072 = vmatpush.msrb.mxu3 %v58_v5 }
  0x18   :  { %1985 = vmatpush.msrb.mxu0 %v55_v0  ;;  %2043 = vmatpush.msrb.mxu2 %v57_v2 }
  0x19   :  { %2014 = vmatpush.msrb.mxu1 %v56_v1 }
  0x1a   :  { %1107 = vperm.xlu2 %4383, %v54_v20  }
  0x1c   :  { %1163 = vperm.xlu1 %4382, %v50_v21  }
  0x1d   :  { %4291 = vmatmul.msk.f32.gmra.mxu0 %vm7258_vm0, %v72_v15  ;;  %4293 = vmatmul.msk.f32.gmra.mxu1 %vm7258_vm0, %v72_v15 }
  0x1e   :  { %4295 = vmatmul.msk.f32.gmra.mxu2 %vm7258_vm0, %v72_v15  ;;  %4297 = vmatmul.msk.f32.gmra.mxu3 %vm7258_vm0, %v72_v15 }
  0x1f   :  { %350 = vperm.xlu0 %4381, %v4400_v16  }
  0x22   :  { %1098 = vperm.xlu2 %4383, %v51_v22  }
  0x27   :  { %4384 = vset.pattern.permute.xlu0 %v7171_v4 }
  0x28   :  { %1104 = vperm.xlu0 %4384, %v53_v26  }
  0x2a   :  { %1157 = vperm.xlu2 %4383, %v48_v23  }
  0x30   :  { %1160 = vperm.xlu0 %4384, %v49_v30  }
  0x38   :  { %1154 = vperm.xlu0 %4384, %v47_v33  }
  0x76   :  { %v4768_v27 = vpop.permute.xlu1 %85 }
  0x77   :  { %7269 = vst [vmem:[#allocation11_spill] sm:$0xff] %v4768_v27  ;;  %vm7199_vm2 = vcmp.lt.s32.totalorder %v4760_v24, %v4768_v27 }
  0x78   :  { %v4775_v28 = vsel %vm7199_vm2, %v59_v25, 1e+30 }
  0x79   :  { %v105_v29 = vsel %vm104_vm1, %v4775_v28, inf }
  0x7a   :  { %106 = vmin.xlane.f32.xlu1 %v105_v29 }
  0x81   :  { %v257_v31 = vpop.f32.mrf.mxu0  ;;  %v4785_v34 = vpop.permute.xlu0 %344 }
  0x82   :  { %v280_v32 = vpop.f32.mrf.mxu1  ;;  %v332_v39 = vmax.f32 %v257_v31, 0.0 }
  0x83   :  { %v334_v40 = vmax.f32 %v280_v32, 0.0 }
  0x84   :  { %v352_v52 = vmul.f32 %v4785_v34, %v332_v39 }
  0x85   :  { %v354_v54 = vmul.f32 %v4785_v34, %v334_v40 }
  0x88   :  { %v303_v35 = vpop.f32.mrf.mxu2 }
  0x89   :  { %v326_v36 = vpop.f32.mrf.mxu3  ;;  %v336_v42 = vmax.f32 %v303_v35, 0.0 }
  0x8a   :  { %v260_v37 = vpop.f32.mrf.mxu0  ;;  %v283_v38 = vpop.f32.mrf.mxu1  ;;  %v338_v43 = vmax.f32 %v326_v36, 0.0 }
  0x8b   :  { %v333_v41 = vmax.f32 %v260_v37, 0.0  ;;  %v335_v44 = vmax.f32 %v283_v38, 0.0  ;;  %v356_v56 = vmul.f32 %v4785_v34, %v336_v42 }
  0x8c   :  { %v358_v57 = vmul.f32 %v4785_v34, %v338_v43 }
  0x91   :  { %v306_v45 = vpop.f32.mrf.mxu2  ;;  %v329_v46 = vpop.f32.mrf.mxu3 }
  0x92   :  { %v337_v47 = vmax.f32 %v306_v45, 0.0  ;;  %v339_v48 = vmax.f32 %v329_v46, 0.0  ;;  %v4787_v49 = vpop.permute.xlu0 %350  ;;  %v4789_v50 = vpop.f32.mrf.mxu0 }
  0x93   :  { %v4791_v51 = vpop.f32.mrf.mxu1  ;;  %v353_v53 = vmul.f32 %v4787_v49, %v333_v41  ;;  %v355_v55 = vmul.f32 %v4787_v49, %v335_v44  ;;  %v7176_v0 = vmax.f32 %v4789_v50, 0.0 }
  0x94   :  { %v359_v58 = vmul.f32 %v4787_v49, %v339_v48  ;;  %v357_v59 = vmul.f32 %v4787_v49, %v337_v47  ;;  %v7174_v3 = vmax.f32 %v4791_v51, 0.0 }
  0x95   :  { %v4801_v60 = vadd.f32 %v353_v53, %v352_v52  ;;  %v4803_v61 = vadd.f32 %v355_v55, %v354_v54  ;;  %v889_v10 = vmul.f32 %v7176_v0, %v4785_v34 }
  0x96   :  { %v4805_v62 = vadd.f32 %v359_v58, %v358_v57  ;;  %v4807_v63 = vadd.f32 %v357_v59, %v356_v56  ;;  %v891_v12 = vmul.f32 %v7174_v3, %v4785_v34 }
  0x97   :  { %7270 = vst [vmem:[#allocation12_spill] sm:$0xff] %v4803_v61 }
  0x98   :  { %7271 = vst [vmem:[#allocation13_spill] sm:$0xff] %v4807_v63 }
  0x99   :  { %v4810_v1 = vpop.f32.mrf.mxu2  ;;  %v4812_v2 = vpop.f32.mrf.mxu3 }
  0x9a   :  { %v4815_v5 = vpop.f32.mrf.mxu0  ;;  %v7179_v14 = vmax.f32 %v4810_v1, 0.0  ;;  %v7173_v16 = vmax.f32 %v4812_v2, 0.0 }
  0x9b   :  { %v7180_v6 = vmax.f32 %v4815_v5, 0.0  ;;  %v4818_v7 = vpop.f32.mrf.mxu1 }
  0x9c   :  { %7272 = vst [vmem:[#allocation14_spill] sm:$0xff] %v4818_v7  ;;  %v7175_v9 = vmax.f32 %v4818_v7, 0.0  ;;  %v893_v26 = vmul.f32 %v7179_v14, %v4785_v34  ;;  %v895_v30 = vmul.f32 %v7173_v16, %v4785_v34 }
  0x9d   :  { %v890_v11 = vmul.f32 %v7180_v6, %v4787_v49 }
  0x9e   :  { %v892_v13 = vmul.f32 %v7175_v9, %v4787_v49 }
  0x9f   :  { %v897_v15 = vadd.f32 %v890_v11, %v889_v10 }
  0xa0   :  { %v904_v17 = vadd.f32 %v892_v13, %v891_v12  ;;  %v4879_v12 = vpop.permute.xlu1 %88  ;;  %v4883_v13 = vpop.permute.xlu2 %91 }
  0xa1   :  { %v898_v18 = vrot.slane %v897_v15, 4  ;;  %v4835_v20 = vpop.f32.mrf.mxu2  ;;  %v4837_v21 = vpop.f32.mrf.mxu3  ;;  %7273 = vst [vmem:[#allocation15_spill] sm:$0xff] %v4879_v12  ;;  %vm7198_vm4 = vcmp.lt.s32.totalorder %v4760_v24, %v4879_v12  ;;  %vm7200_vm7 = vcmp.lt.s32.totalorder %v4760_v24, %v4883_v13 }
  0xa2   :  { %v905_v22 = vrot.slane %v904_v17, 4  ;;  %v7178_v23 = vmax.f32 %v4835_v20, 0.0  ;;  %v7177_v25 = vmax.f32 %v4837_v21, 0.0  ;;  %7274 = vst [vmem:[#allocation16_spill] sm:$0xff] %v4883_v13 }
  0xa3   :  { %v899_v29 = vadd.f32 %v898_v18, %v897_v15 }
  0xa4   :  { %v906_v31 = vadd.f32 %v905_v22, %v904_v17  ;;  %v894_v32 = vmul.f32 %v7178_v23, %v4787_v49  ;;  %v896_v33 = vmul.f32 %v7177_v25, %v4787_v49 }
  0xa5   :  { %v900_v35 = vrot.slane %v899_v29, 2 }
  0xa6   :  { %v907_v36 = vrot.slane %v906_v31, 2  ;;  %v911_v37 = vadd.f32 %v894_v32, %v893_v26  ;;  %v918_v38 = vadd.f32 %v896_v33, %v895_v30 }
  0xa7   :  { %v901_v39 = vadd.f32 %v900_v35, %v899_v29  ;;  %v60_v29 = vld [vmem:[%s7161_s4 + $0x8] sm:$0xff] }
  0xa8   :  { %v908_v40 = vadd.f32 %v907_v36, %v906_v31  ;;  %v912_v41 = vrot.slane %v911_v37, 4  ;;  %v919_v42 = vrot.slane %v918_v38, 4  ;;  %v4885_v15 = vpop.permute.xlu1 %1101  ;;  %v4890_v17 = vpop.permute.xlu2 %94  ;;  %v4914_v31 = vsel %vm7198_vm4, %v60_v29, 1e+30 }
  0xa9   :  { %v902_v43 = vrot.slane %v901_v39, 1  ;;  %7275 = vst [vmem:[#allocation17_spill] sm:$0xff] %v4890_v17  ;;  %vm7197_vm6 = vcmp.lt.s32.totalorder %v4760_v24, %v4890_v17 }
  0xaa   :  { %v909_v44 = vrot.slane %v908_v40, 1  ;;  %v913_v45 = vadd.f32 %v912_v41, %v911_v37  ;;  %v920_v47 = vadd.f32 %v919_v42, %v918_v38  ;;  %v4937_v38 = vpop.permute.xlu0 %1104 }
  0xab   :  { %v903_v46 = vadd.f32 %v902_v43, %v901_v39  ;;  %vm7201_vm13 = vcmp.lt.s32.totalorder %v4760_v24, %v4937_v38 }
  0xac   :  { %v910_v48 = vadd.f32 %v909_v44, %v908_v40  ;;  %v914_v52 = vrot.slane %v913_v45, 2  ;;  %v921_v55 = vrot.slane %v920_v47, 2 }
  0xad   :  { %961 = vrot.lane.b32.xlu1 %v903_v46, %s4589_s1 }
  0xae   :  { %v915_v53 = vadd.f32 %v914_v52, %v913_v45  ;;  %939 = vrot.lane.b32.xlu0 %v910_v48, %s4590_s20  ;;  %971 = vrot.lane.b32.xlu2 %v910_v48, %s4591_s21  ;;  %v985_v54 = vrot.slane %v910_v48, 7  ;;  %v922_v59 = vadd.f32 %v921_v55, %v920_v47 }
  0xb0   :  { %v916_v56 = vrot.slane %v915_v53, 1  ;;  %v4857_v57 = vsel %vm7261_vm3, %v985_v54, %v903_v46  ;;  %v923_v10 = vrot.slane %v922_v59, 1  ;;  %v4892_v18 = vpop.permute.xlu1 %1163  ;;  %v4898_v22 = vpop.permute.xlu2 %1107  ;;  %v61_v54 = vld [vmem:[%s7161_s4 + $0x10] sm:$0xff] }
  0xb1   :  { %v4971_v55 = vsel %vm7200_vm7, %v61_v54, 1e+30  ;;  %vm1112_vm12 = vcmp.lt.s32.totalorder %v4760_v24, %v4898_v22 }
  0xb2   :  { %v4859_v58 = vadd.f32 %v916_v56, %v915_v53  ;;  %v4865_v11 = vadd.f32 %v923_v10, %v922_v59  ;;  %v4943_v40 = vpop.permute.xlu0 %1160  ;;  %v111_v56 = vsel %vm104_vm1, %v4971_v55, inf }
  0xb3   :  { %vm1167_vm4 = vcmp.eq.s32.totalorder %v4760_v24, %v4943_v40 }
  0xb4   :  { %v987_v13 = vrot.slane %v4859_v58, 6 }
  0xb5   :  { %957 = vrot.lane.b32.xlu1 %v4859_v58, %s4592_s22 }
  0xb6   :  { %955 = vrot.lane.b32.xlu2 %v910_v48, %s4592_s22  ;;  %969 = vrot.lane.b32.xlu0 %v903_v46, %s4591_s21 }
  0xb8   :  { %v4916_v32 = vpop.permute.xlu2 %1098 }
  0xb9   :  { %vm1109_vm14 = vcmp.lt.s32.totalorder %v4760_v24, %v4916_v32 }
  0xba   :  { %v4947_v42 = vpop.permute.xlu0 %1154 }
  0xbd   :  { %983 = vrot.lane.b32.xlu1 %v4865_v11, %s4593_s6 }
  0xbe   :  { %937 = vrot.lane.b32.xlu2 %v903_v46, %s4590_s20  ;;  %979 = vrot.lane.b32.xlu0 %v910_v48, %s4593_s6 }
  0xc0   :  { %v4935_v37 = vpop.permute.xlu2 %1157 }
  0xc5   :  { %951 = vrot.lane.b32.xlu1 %v4865_v11, %s4594_s23 }
  0xc6   :  { %947 = vrot.lane.b32.xlu2 %v910_v48, %s4594_s23  ;;  %953 = vrot.lane.b32.xlu0 %v903_v46, %s4592_s22 }
  0xcd   :  { %935 = vrot.lane.b32.xlu1 %v4865_v11, %s4595_s24 }
  0xce   :  { %977 = vrot.lane.b32.xlu2 %v903_v46, %s4593_s6  ;;  %963 = vrot.lane.b32.xlu0 %v910_v48, %s4589_s1 }
  0xd6   :  { %945 = vrot.lane.b32.xlu2 %v903_v46, %s4594_s23  ;;  %931 = vrot.lane.b32.xlu0 %v910_v48, %s4595_s24 }
  0xde   :  { %929 = vrot.lane.b32.xlu2 %v903_v46, %s4595_s24  ;;  %941 = vrot.lane.b32.xlu0 %v4859_v58, %s4590_s20  ;;  %v62_v46 = vld [vmem:[%s7161_s4 + $0x18] sm:$0xff] }
  0xdf   :  { %v4957_v47 = vsel %vm7197_vm6, %v62_v46, 1e+30 }
  0xe0   :  { %v114_v48 = vsel %vm104_vm1, %v4957_v47, inf }
  0xe6   :  { %973 = vrot.lane.b32.xlu2 %v4859_v58, %s4591_s21  ;;  %943 = vrot.lane.b32.xlu0 %v4865_v11, %s4590_s20 }
  0xed   :  { %v107_v26 = vpop.xlane.xlu1 %106 }
  0xee   :  { %975 = vrot.lane.b32.xlu2 %v4865_v11, %s4591_s21  ;;  %981 = vrot.lane.b32.xlu0 %v4859_v58, %s4593_s6  ;;  %vm117_vm5 = vcmp.eq.f32.partialorder %v4775_v28, %v107_v26  ;;  %v108_v28 = vsel %vm104_vm1, %v4914_v31, inf }
  0xef   :  { %v121_v30 = vsel %vm117_vm5, %v4760_v24, 16  ;;  %vm1110_vm5 = vcmp.lt.s32.totalorder %v4760_v24, %v4885_v15 }
  0xf0   :  { %v4925_v33 = vsel %vm104_vm1, %v121_v30, 2147483647 }
  0xf1   :  { %v127_v35 = vshra.s32 %v4925_v33, 16 }
  0xf3   :  { %v4928_v36 = vcvt.s32.f32 %v127_v35 }
  0xf6   :  { %949 = vrot.lane.b32.xlu2 %v4859_v58, %s4594_s23  ;;  %965 = vrot.lane.b32.xlu0 %v4859_v58, %s4589_s1 }
  0xf7   :  { %109 = vmin.xlane.f32.xlu1 %v108_v28 }
  0xfe   :  { %959 = vrot.lane.b32.xlu2 %v4865_v11, %s4592_s22  ;;  %967 = vrot.lane.b32.xlu0 %v4865_v11, %s4589_s1 }
  0xff   :  { %130 = vmin.xlane.f32.xlu1 %v4928_v36 }
 0x106   :  { %933 = vrot.lane.b32.xlu2 %v4859_v58, %s4595_s24 }
 0x108   :  { %v4941_v39 = vpop.permute.xlu2 %971 }
 0x110   :  { %v4945_v41 = vpop.permute.xlu2 %955 }
 0x118   :  { %v938_v43 = vpop.permute.xlu2 %937 }
 0x11f   :  { %v4977_v30 = vpop.permute.xlu1 %961 }
 0x120   :  { %v940_v44 = vpop.permute.xlu0 %939  ;;  %v948_v45 = vpop.permute.xlu2 %947 }
 0x121   :  { %v997_v25 = vrot.slane %v940_v44, 7  ;;  %v1003_v12 = vrot.slane %v948_v45, 7 }
 0x123   :  { %v998_v17 = vsel %vm7261_vm3, %v997_v25, %v938_v43  ;;  %v1021_v25 = vrot.slane %v4941_v39, 7 }
 0x127   :  { %v958_v46 = vpop.permute.xlu1 %957 }
 0x128   :  { %v4963_v52 = vpop.permute.xlu2 %977  ;;  %115 = vmin.xlane.f32.xlu0 %v114_v48  ;;  %v970_v53 = vpop.permute.xlu0 %969  ;;  %v1011_v45 = vrot.slane %v958_v46, 6 }
 0x12f   :  { %112 = vmin.xlane.f32.xlu2 %v111_v56  ;;  %v4981_v16 = vpop.permute.xlu1 %983 }
 0x130   :  { %v946_v59 = vpop.permute.xlu2 %945  ;;  %v4975_v10 = vpop.permute.xlu0 %979 }
 0x131   :  { %v1004_v63 = vsel %vm7261_vm3, %v1003_v12, %v946_v59 }
 0x137   :  { %v952_v9 = vpop.permute.xlu1 %951 }
 0x138   :  { %v930_v26 = vpop.permute.xlu2 %929  ;;  %v954_v29 = vpop.permute.xlu0 %953 }
 0x140   :  { %v974_v28 = vpop.permute.xlu2 %973  ;;  %v4979_v35 = vpop.permute.xlu0 %963 }
 0x141   :  { %v1023_v43 = vrot.slane %v974_v28, 6 }
 0x148   :  { %v976_v48 = vpop.permute.xlu2 %975  ;;  %v932_v4 = vpop.permute.xlu0 %931 }
 0x149   :  { %v991_v27 = vrot.slane %v932_v4, 7  ;;  %v1007_v4 = vrot.slane %v952_v9, 5  ;;  %v1022_v9 = vsel %vm7261_vm3, %v1021_v25, %v970_v53 }
 0x14b   :  { %v992_v58 = vsel %vm7261_vm3, %v991_v27, %v930_v26  ;;  %v1027_v27 = vrot.slane %v4975_v10, 7 }
 0x150   :  { %v950_v54 = vpop.permute.xlu2 %949  ;;  %v942_v3 = vpop.permute.xlu0 %941 }
 0x151   :  { %v999_v23 = vrot.slane %v942_v3, 6  ;;  %v1005_v6 = vrot.slane %v950_v54, 6  ;;  %v936_v3 = vpop.permute.xlu1 %935  ;;  %v989_v54 = vrot.slane %v4865_v11, 5 }
 0x153   :  { %v1000_v19 = vsel %vm7203_vm8, %v999_v23, %v998_v17  ;;  %v988_v23 = vsel %vm7203_vm8, %v987_v13, %v4857_v57  ;;  %v1009_v17 = vrot.slane %v4945_v41, 7  ;;  %v1024_v41 = vsel %vm7203_vm8, %v1023_v43, %v1022_v9 }
 0x154   :  { %v990_v39 = vsel %vm7202_vm9, %v989_v54, %v988_v23  ;;  %v1031_v23 = vrot.slane %v4981_v16, 5 }
 0x155   :  { %v1010_v57 = vsel %vm7261_vm3, %v1009_v17, %v954_v29  ;;  %v1015_v17 = vrot.slane %v4979_v35, 7 }
 0x156   :  { %v1012_v10 = vsel %vm7203_vm8, %v1011_v45, %v1010_v57 }
 0x157   :  { %v1016_v16 = vsel %vm7261_vm3, %v1015_v17, %v4977_v30 }
 0x158   :  { %v960_v0 = vpop.permute.xlu2 %959  ;;  %v944_v56 = vpop.permute.xlu0 %943 }
 0x159   :  { %v1001_v14 = vrot.slane %v944_v56, 5  ;;  %v1006_v56 = vsel %vm7203_vm8, %v1005_v6, %v1004_v63  ;;  %v4596_v6 = vmov 1983009808   ;;  %v1013_v13 = vrot.slane %v960_v0, 5 }
 0x15a   :  { %v1008_v63 = vsel %vm7202_vm9, %v1007_v4, %v1006_v56  ;;  %v511_v11 = vunpack.c.l.s4 %v4596_v6  ;;  %v1028_v0 = vsel %vm7261_vm3, %v1027_v27, %v4963_v52  ;;  %v4597_v4 = vmov 1934713408  }
 0x15b   :  { %v1002_v7 = vsel %vm7202_vm9, %v1001_v14, %v1000_v19  ;;  %v1025_v14 = vrot.slane %v976_v48, 5  ;;  %v1047_v59 = vrot.slane %v1008_v63, 4 }
 0x15c   :  { %v1041_v12 = vrot.slane %v1002_v7, 4  ;;  %v5005_v53 = vunpack.c.0.s8 %v511_v11 }
 0x15d   :  { %v1026_v46 = vsel %vm7202_vm9, %v1025_v14, %v1024_v41 }
 0x15e   :  { %v1042_v26 = vsel %vm508_vm10, %v1041_v12, %v990_v39 }
 0x15f   :  { %v1046_v56 = vperm.slane %v1042_v26, %v5005_v53 }
 0x160   :  { %v934_v8 = vpop.permute.xlu2 %933  ;;  %v982_v61 = vpop.permute.xlu0 %981 }
 0x161   :  { %v993_v44 = vrot.slane %v934_v8, 6  ;;  %v995_v8 = vrot.slane %v936_v3, 5  ;;  %v1029_v28 = vrot.slane %v982_v61, 6  ;;  %v1014_v3 = vsel %vm7202_vm9, %v1013_v13, %v1012_v10 }
 0x162   :  { %v1053_v61 = vrot.slane %v1026_v46, 4 }
 0x163   :  { %v994_v19 = vsel %vm7203_vm8, %v993_v44, %v992_v58  ;;  %v1030_v54 = vsel %vm7203_vm8, %v1029_v28, %v1028_v0  ;;  %v537_v58 = vunpack.c.l.s4 %v4597_v4 }
 0x164   :  { %v996_v7 = vsel %vm7202_vm9, %v995_v8, %v994_v19  ;;  %v1054_v12 = vsel %vm508_vm10, %v1053_v61, %v1014_v3  ;;  %v1067_v8 = vrot.slane %v1046_v56, 4  ;;  %v1032_v14 = vsel %vm7202_vm9, %v1031_v23, %v1030_v54 }
 0x165   :  { %v1048_v44 = vsel %vm508_vm10, %v1047_v59, %v996_v7  ;;  %v5027_v11 = vunpack.c.0.s8 %v537_v58  ;;  %v1058_v35 = vperm.slane %v1054_v12, %v5005_v53  ;;  %v1059_v27 = vrot.slane %v1032_v14, 4 }
 0x166   :  { %v1052_v43 = vperm.slane %v1048_v44, %v5005_v53 }
 0x167   :  { %v1079_v41 = vrot.slane %v1058_v35, 4 }
 0x168   :  { %v966_v48 = vpop.permute.xlu0 %965  ;;  %v1068_v9 = vsel %vm508_vm10, %v1052_v43, %v1067_v8  ;;  %v1065_v28 = vrot.slane %v1052_v43, 4 }
 0x169   :  { %v1017_v19 = vrot.slane %v966_v48, 6  ;;  %v1076_v7 = vperm.slane %v1068_v9, %v5027_v11 }
 0x16a   :  { %v110_v29 = vpop.xlane.xlu1 %109  ;;  %v1066_v61 = vsel %vm508_vm10, %v1065_v28, %v1046_v56 }
 0x16b   :  { %vm118_vm11 = vcmp.eq.f32.partialorder %v4914_v31, %v110_v29  ;;  %v1018_v39 = vsel %vm7203_vm8, %v1017_v19, %v1016_v16  ;;  %v1095_v46 = vrot.slane %v1076_v7, 4  ;;  %v1072_v17 = vperm.slane %v1066_v61, %v5027_v11 }
 0x16c   :  { %v122_v25 = vsel %vm118_vm11, %v4760_v24, 16 }
 0x16d   :  { %v5020_v52 = vsel %vm104_vm1, %v122_v25, 2147483647  ;;  %v1091_v16 = vrot.slane %v1072_v17, 4 }
 0x16e   :  { %v142_v31 = vshra.s32 %v5020_v52, 16 }
 0x170   :  { %v968_v63 = vpop.permute.xlu0 %967  ;;  %v5025_v6 = vcvt.s32.f32 %v142_v31 }
 0x171   :  { %v1019_v45 = vrot.slane %v968_v63, 5 }
 0x172   :  { %145 = vmin.xlane.f32.xlu0 %v5025_v6 }
 0x173   :  { %v1020_v57 = vsel %vm7202_vm9, %v1019_v45, %v1018_v39 }
 0x174   :  { %v1060_v13 = vsel %vm508_vm10, %v1059_v27, %v1020_v57  ;;  %v126_v27 = vand.u32 65535, %v4925_v33 }
 0x175   :  { %v1064_v59 = vperm.slane %v1060_v13, %v5005_v53 }
 0x176   :  { %v128_v39 = vcvt.s32.f32 %v126_v27 }
 0x177   :  { %v1077_v30 = vrot.slane %v1064_v59, 4  ;;  %v1080_v26 = vsel %vm508_vm10, %v1064_v59, %v1079_v41 }
 0x178   :  { %v1088_v48 = vperm.slane %v1080_v26, %v5027_v11 }
 0x179   :  { %v1078_v10 = vsel %vm508_vm10, %v1077_v30, %v1058_v35 }
 0x17a   :  { %v1096_v44 = vsel %vm508_vm10, %v1088_v48, %v1095_v46  ;;  %v1093_v29 = vrot.slane %v1088_v48, 4  ;;  %v1084_v0 = vperm.slane %v1078_v10, %v5027_v11 }
 0x17b   :  { %v1116_v3 = vsel %vm1112_vm12, %v1096_v44, -1e+30 }
 0x17c   :  { %v1126_v54 = vsel %vm104_vm1, %v1116_v3, -inf  ;;  %v1094_v25 = vsel %vm508_vm10, %v1093_v29, %v1076_v7  ;;  %v1089_v4 = vrot.slane %v1084_v0, 4  ;;  %v1092_v35 = vsel %vm508_vm10, %v1084_v0, %v1091_v16 }
 0x17d   :  { %1127 = vmax.xlane.f32.xlu0 %v1126_v54  ;;  %v1115_v58 = vsel %vm7201_vm13, %v1094_v25, -1e+30  ;;  %v1114_v45 = vsel %vm1110_vm5, %v1092_v35, -1e+30  ;;  %v141_v7 = vand.u32 65535, %v5020_v52 }
 0x17e   :  { %v1123_v23 = vsel %vm104_vm1, %v1115_v58, -inf  ;;  %v1090_v56 = vsel %vm508_vm10, %v1089_v4, %v1072_v17  ;;  %v1120_v9 = vsel %vm104_vm1, %v1114_v45, -inf }
 0x17f   :  { %1124 = vmax.xlane.f32.xlu1 %v1123_v23  ;;  %v1113_v43 = vsel %vm1109_vm14, %v1090_v56, -1e+30  ;;  %v143_v59 = vcvt.s32.f32 %v141_v7 }
 0x180   :  { %v1117_v12 = vsel %vm104_vm1, %v1113_v43, -inf }
 0x187   :  { %1118 = vmax.xlane.f32.xlu1 %v1117_v12 }
 0x19b   :  { %v5081_v13 = vpop.xlane.xlu0 %115 }
 0x1a2   :  { %v113_v19 = vpop.xlane.xlu2 %112 }
 0x1a3   :  { %vm119_vm15 = vcmp.eq.f32.partialorder %v4971_v55, %v113_v19  ;;  %v5076_v55 = vpop.xlane.xlu1 %130 }
 0x1a4   :  { %v123_v31 = vsel %vm119_vm15, %v4760_v24, 16  ;;  %vm132_vm11 = vcmp.eq.f32.partialorder %v4928_v36, %v5076_v55 }
 0x1a5   :  { %v155_v8 = vsel %vm104_vm1, %v123_v31, 2147483647  ;;  %v133_v57 = vsel %vm132_vm11, %v128_v39, inf }
 0x1a6   :  { %v157_v14 = vshra.s32 %v155_v8, 16  ;;  %v156_v61 = vand.u32 65535, %v155_v8 }
 0x1a8   :  { %v159_v63 = vcvt.s32.f32 %v157_v14  ;;  %v158_v4 = vcvt.s32.f32 %v156_v61 }
 0x1aa   :  { %160 = vmin.xlane.f32.xlu2 %v159_v63 }
 0x1b2   :  { %1121 = vmax.xlane.f32.xlu2 %v1120_v9 }
 0x1ba   :  { %134 = vmin.xlane.f32.xlu2 %v133_v57 }
 0x1e5   :  { %v5084_v41 = vpop.xlane.xlu0 %145 }
 0x1e6   :  { %vm147_vm15 = vcmp.eq.f32.partialorder %v5025_v6, %v5084_v41 }
 0x1e7   :  { %v148_v30 = vsel %vm147_vm15, %v143_v59, inf }
 0x1e8   :  { %149 = vmin.xlane.f32.xlu1 %v148_v30  ;;  %v7205_v30 = vmov 0.0  }
 0x1f0   :  { %v1128_v6 = vpop.xlane.xlu0 %1127 }
 0x1f1   :  { %v1132_v0 = vsub.f32 %v1116_v3, %v1128_v6 }
 0x1f2   :  { %v1125_v26 = vpop.xlane.xlu1 %1124 }
 0x1f3   :  { %v1131_v33 = vsub.f32 %v1115_v58, %v1125_v26  ;;  %v1139_v54 = vmul.f32 1.442695, %v1132_v0  ;;  %v5109_v26 = vsel %vm1167_vm4, 1.0, %v7205_v30 }
 0x1f5   :  { %v1137_v28 = vmul.f32 1.442695, %v1131_v33 }
 0x1f7   :  { %4409 = vpow2.f32 %v1137_v28 }
 0x1fa   :  { %v1119_v36 = vpop.xlane.xlu1 %1118 }
 0x1fb   :  { %v1129_v48 = vsub.f32 %v1113_v43, %v1119_v36 }
 0x1fd   :  { %v4410_v46 = vpop.eup %4409  ;;  %v1133_v10 = vmul.f32 1.442695, %v1129_v48 }
 0x1fe   :  { %v1147_v44 = vsel %vm104_vm1, %v4410_v46, 0.0 }
 0x1ff   :  { %4411 = vpow2.f32 %v1133_v10  ;;  %1148 = vadd.xlane.f32.xlu2 %v1147_v44 }
 0x200   :  { %4413 = vpow2.f32 %v1139_v54 }
 0x205   :  { %v5089_v52 = vpop.eup %4411 }
 0x206   :  { %v1141_v29 = vsel %vm104_vm1, %v5089_v52, 0.0  ;;  %v5096_v23 = vpop.eup %4413 }
 0x207   :  { %1142 = vadd.xlane.f32.xlu2 %v1141_v29  ;;  %v1150_v43 = vsel %vm104_vm1, %v5096_v23, 0.0 }
 0x21d   :  { %v5093_v25 = vpop.xlane.xlu2 %160 }
 0x21e   :  { %vm162_vm11 = vcmp.eq.f32.partialorder %v159_v63, %v5093_v25 }
 0x21f   :  { %v163_v58 = vsel %vm162_vm11, %v158_v4, inf }
 0x220   :  { %164 = vmin.xlane.f32.xlu0 %v163_v58 }
 0x225   :  { %v1122_v17 = vpop.xlane.xlu2 %1121 }
 0x226   :  { %v1130_v56 = vsub.f32 %v1114_v45, %v1122_v17 }
 0x228   :  { %v1135_v12 = vmul.f32 1.442695, %v1130_v56  ;;  %1151 = vadd.xlane.f32.xlu0 %v1150_v43 }
 0x22a   :  { %4415 = vpow2.f32 %v1135_v12 }
 0x22d   :  { %v5104_v31 = vpop.xlane.xlu2 %134 }
 0x230   :  { %v5100_v3 = vpop.eup %4415 }
 0x231   :  { %v1144_v19 = vsel %vm104_vm1, %v5100_v3, 0.0 }
 0x232   :  { %1145 = vadd.xlane.f32.xlu1 %v1144_v19 }
 0x25b   :  { %v5133_v58 = vpop.xlane.xlu1 %149 }
 0x272   :  { %v1149_v8 = vpop.xlane.xlu2 %1148 }
 0x273   :  { %4417 = vrcp.f32 %v1149_v8  ;;  %v1218_v35 = vand.u32 2147483648, %v1149_v8  ;;  %v1216_v9 = vand.u32 2147483647, %v1149_v8  ;;  %vm1212_vm11 = vweird.f32 %v1149_v8 }
 0x275   :  { %v1219_v39 = vor.u32 1.1754944e-38, %v1218_v35  ;;  %vm1217_vm2 = vcmp.eq.f32.partialorder %v1216_v9, 8.507059e+37 }
 0x279   :  { %v4418_v14 = vpop.eup %4417 }
 0x27a   :  { %v1208_v63 = vmul.f32 %v4418_v14, %v1149_v8  ;;  %vm1213_vm15 = vweird.f32 %v4418_v14  ;;  %v1143_v44 = vpop.xlane.xlu2 %1142 }
 0x27b   :  { %vm1214_vm6 = vmor %vm1212_vm11, %vm1213_vm15  ;;  %4419 = vrcp.f32 %v1143_v44  ;;  %v1186_v9 = vand.u32 2147483647, %v1143_v44 }
 0x27c   :  { %v1209_v16 = vsub.f32 1.0, %v1208_v63 }
 0x27d   :  { %vm1187_vm8 = vcmp.eq.f32.partialorder %v1186_v9, 8.507059e+37 }
 0x27e   :  { %v1210_v45 = vmul.f32 %v4418_v14, %v1209_v16  ;;  %v1188_v16 = vand.u32 2147483648, %v1143_v44 }
 0x280   :  { %v1211_v27 = vadd.f32 %v4418_v14, %v1210_v45 }
 0x281   :  { %v4420_v61 = vpop.eup %4419 }
 0x282   :  { %v1215_v57 = vsel %vm1214_vm6, %v4418_v14, %v1211_v27  ;;  %v1178_v54 = vmul.f32 %v4420_v61, %v1143_v44  ;;  %vm1182_vm6 = vweird.f32 %v1143_v44 }
 0x283   :  { %v1220_v7 = vsel %vm1217_vm2, %v1219_v39, %v1215_v57  ;;  %vm1183_vm2 = vweird.f32 %v4420_v61 }
 0x284   :  { %v1221_v59 = vmul.f32 %v4410_v46, %v1220_v7  ;;  %v1179_v17 = vsub.f32 1.0, %v1178_v54  ;;  %vm5135_vm15 = vmor %vm1182_vm6, %vm1183_vm2  ;;  %vm1165_vm2 = vcmp.eq.s32.totalorder %v4760_v24, %v4947_v42  ;;  %vm120_vm6 = vcmp.eq.f32.partialorder %v4957_v47, %v5081_v13 }
 0x286   :  { %v1239_v33 = vsub.f32 %v1221_v59, %v5109_v26  ;;  %v1180_v43 = vmul.f32 %v4420_v61, %v1179_v17  ;;  %v1189_v59 = vor.u32 1.1754944e-38, %v1188_v16 }
 0x288   :  { %v5115_v28 = vsel %vm7201_vm13, %v1239_v33, 0.0  ;;  %v1181_v14 = vadd.f32 %v4420_v61, %v1180_v43  ;;  %vm1168_vm13 = vcmp.eq.s32.totalorder %v4760_v24, %v4892_v18 }
 0x289   :  { %v1326_v36 = vperm.slane %v5115_v28, %v5005_v53 }
 0x28a   :  { %v1185_v57 = vsel %vm5135_vm15, %v4420_v61, %v1181_v14  ;;  %v1321_v14 = vrot.slane %v5115_v28, 4  ;;  %vm1513_vm15 = vcmask 261120  }
 0x28b   :  { %v5120_v40 = vperm.slane %v1326_v36, %v5027_v11  ;;  %v1331_v48 = vrot.slane %v1326_v36, 4  ;;  %v1190_v44 = vsel %vm1187_vm8, %v1189_v59, %v1185_v57 }
 0x28d   :  { %v1351_v46 = vrot.slane %v5120_v40, 4  ;;  %v1332_v10 = vsel %vm508_vm10, 0.0, %v1331_v48 }
 0x28e   :  { %v5125_v29 = vperm.slane %v1332_v10, %v5027_v11 }
 0x28f   :  { %v1352_v6 = vsel %vm508_vm10, 0.0, %v1351_v46 }
 0x290   :  { %1405 = vrot.lane.b32.xlu0 %v1352_v6, %s4593_s6  ;;  %1421 = vrot.lane.b32.xlu2 %v5125_v29, %s4591_s21  ;;  %v5145_v6 = vsel %vm1168_vm13, 1.0, %v7205_v30  ;;  %vm1166_vm13 = vcmp.eq.s32.totalorder %v4760_v24, %v4935_v37  ;;  %v1322_v37 = vsel %vm508_vm10, 0.0, %v1321_v14 }
 0x291   :  { %v5170_v57 = vsel %vm1166_vm13, 1.0, %v7205_v30  ;;  %vm1583_vm13 = vcmp.gt.f32.partialorder %v4810_v1, 0.0 }
 0x293   :  { %v5131_v0 = vpop.xlane.xlu0 %164 }
 0x29b   :  { %v1152_v4 = vpop.xlane.xlu0 %1151 }
 0x29c   :  { %4421 = vrcp.f32 %v1152_v4  ;;  %v1233_v63 = vand.u32 2147483648, %v1152_v4  ;;  %v1231_v45 = vand.u32 2147483647, %v1152_v4  ;;  %vm1227_vm11 = vweird.f32 %v1152_v4 }
 0x29e   :  { %v1234_v7 = vor.u32 1.1754944e-38, %v1233_v63  ;;  %vm1232_vm9 = vcmp.eq.f32.partialorder %v1231_v45, 8.507059e+37 }
 0x2a2   :  { %v4422_v56 = vpop.eup %4421 }
 0x2a3   :  { %v1223_v12 = vmul.f32 %v4422_v56, %v1152_v4  ;;  %vm1228_vm4 = vweird.f32 %v4422_v56  ;;  %v1191_v4 = vmul.f32 %v5089_v52, %v1190_v44 }
 0x2a4   :  { %vm1229_vm7 = vmor %vm1227_vm11, %vm1228_vm4  ;;  %vm1518_vm11 = vcmask 392192  }
 0x2a5   :  { %v1224_v19 = vsub.f32 1.0, %v1223_v12  ;;  %v1146_v8 = vpop.xlane.xlu1 %1145  ;;  %v5156_v12 = vsel %vm1165_vm2, 1.0, %v7205_v30  ;;  %vm7262_vm2 = vcmask 523264  }
 0x2a6   :  { %4423 = vrcp.f32 %v1146_v8  ;;  %v1203_v18 = vand.u32 2147483648, %v1146_v8  ;;  %vm1197_vm8 = vweird.f32 %v1146_v8  ;;  %v1237_v45 = vsub.f32 %v1191_v4, %v5156_v12 }
 0x2a7   :  { %v1225_v35 = vmul.f32 %v4422_v56, %v1224_v19 }
 0x2a8   :  { %v1204_v42 = vor.u32 1.1754944e-38, %v1203_v18 }
 0x2a9   :  { %v1226_v39 = vadd.f32 %v4422_v56, %v1225_v35 }
 0x2ab   :  { %v1230_v33 = vsel %vm1229_vm7, %v4422_v56, %v1226_v39  ;;  %v1201_v56 = vand.u32 2147483647, %v1146_v8 }
 0x2ac   :  { %v4424_v36 = vpop.eup %4423  ;;  %v1235_v48 = vsel %vm1232_vm9, %v1234_v7, %v1230_v33 }
 0x2ad   :  { %v1193_v46 = vmul.f32 %v4424_v36, %v1146_v8  ;;  %v1236_v10 = vmul.f32 %v5096_v23, %v1235_v48  ;;  %vm1198_vm7 = vweird.f32 %v4424_v36  ;;  %vm1202_vm4 = vcmp.eq.f32.partialorder %v1201_v56, 8.507059e+37 }
 0x2ae   :  { %vm1199_vm9 = vmor %vm1197_vm8, %vm1198_vm7  ;;  %vm7260_vm7 = vcmask 654336   ;;  %vm7259_vm8 = vcmask 785408  }
 0x2af   :  { %v1194_v54 = vsub.f32 1.0, %v1193_v46  ;;  %v1240_v61 = vsub.f32 %v1236_v10, %v5145_v6 }
 0x2b1   :  { %v1195_v17 = vmul.f32 %v4424_v36, %v1194_v54  ;;  %v1244_v23 = vsel %vm1112_vm12, %v1240_v61, 0.0 }
 0x2b2   :  { %v1364_v43 = vperm.slane %v1244_v23, %v5005_v53  ;;  %v1359_v16 = vrot.slane %v1244_v23, 4 }
 0x2b3   :  { %v1196_v19 = vadd.f32 %v4424_v36, %v1195_v17 }
 0x2b4   :  { %v1369_v63 = vrot.slane %v1364_v43, 4  ;;  %v5160_v52 = vperm.slane %v1364_v43, %v5027_v11  ;;  %v1360_v59 = vsel %vm508_vm10, 0.0, %v1359_v16 }
 0x2b5   :  { %v1200_v35 = vsel %vm1199_vm9, %v4424_v36, %v1196_v19  ;;  %v1241_v36 = vsel %vm1109_vm14, %v1237_v45, 0.0  ;;  %v1368_v48 = vperm.slane %v1360_v59, %v5005_v53  ;;  %vm7204_vm9 = vcmask 916480  }
 0x2b6   :  { %v1370_v9 = vsel %vm508_vm10, 0.0, %v1369_v63  ;;  %v1389_v8 = vrot.slane %v5160_v52, 4  ;;  %v1205_v27 = vsel %vm1202_vm4, %v1204_v42, %v1200_v35  ;;  %v1250_v44 = vperm.slane %v1241_v36, %v5005_v53 }
 0x2b7   :  { %v1378_v28 = vperm.slane %v1370_v9, %v5027_v11  ;;  %v1206_v39 = vmul.f32 %v5100_v3, %v1205_v27  ;;  %v1330_v3 = vperm.slane %v1322_v37, %v5005_v53  ;;  %v1384_v18 = vperm.slane %v1368_v48, %v5027_v11 }
 0x2b8   :  { %v1390_v7 = vsel %vm508_vm10, 0.0, %v1389_v8  ;;  %v5195_v17 = vperm.slane %v1250_v44, %v5027_v11  ;;  %v1255_v35 = vrot.slane %v1250_v44, 4  ;;  %vm1585_vm4 = vcmp.gt.f32.partialorder %v4812_v2, 0.0 }
 0x2b9   :  { %1423 = vrot.lane.b32.xlu0 %v1378_v28, %s4591_s21  ;;  %1407 = vrot.lane.b32.xlu1 %v1390_v7, %s4593_s6  ;;  %v1238_v33 = vsub.f32 %v1206_v39, %v5170_v57  ;;  %v1346_v61 = vperm.slane %v1330_v3, %v5027_v11  ;;  %v1391_v42 = vrot.slane %v1378_v28, 4  ;;  %v1245_v28 = vrot.slane %v1241_v36, 4 }
 0x2ba   :  { %v1275_v43 = vrot.slane %v5195_v17, 4  ;;  %v1256_v27 = vsel %vm508_vm10, 0.0, %v1255_v35  ;;  %v1393_v44 = vrot.slane %v1384_v18, 4 }
 0x2bb   :  { %v1242_v46 = vsel %vm1110_vm5, %v1238_v33, 0.0  ;;  %v1392_v9 = vsel %vm508_vm10, 0.0, %v1391_v42  ;;  %v1355_v39 = vrot.slane %v1346_v61, 4  ;;  %v1264_v7 = vperm.slane %v1256_v27, %v5027_v11 }
 0x2bc   :  { %v1288_v10 = vperm.slane %v1242_v46, %v5005_v53  ;;  %v1283_v14 = vrot.slane %v1242_v46, 4  ;;  %v1276_v16 = vsel %vm508_vm10, 0.0, %v1275_v43  ;;  %v1246_v59 = vsel %vm508_vm10, 0.0, %v1245_v28 }
 0x2bd   :  { %v1356_v33 = vsel %vm508_vm10, 0.0, %v1355_v39  ;;  %v1379_v46 = vrot.slane %v1368_v48, 4  ;;  %v1353_v48 = vrot.slane %v5125_v29, 4 }
 0x2be   :  { %v5189_v54 = vperm.slane %v1288_v10, %v5027_v11  ;;  %v1293_v56 = vrot.slane %v1288_v10, 4  ;;  %v1284_v45 = vsel %vm508_vm10, 0.0, %v1283_v14  ;;  %v1254_v10 = vperm.slane %v1246_v59, %v5005_v53 }
 0x2bf   :  { %v1292_v8 = vperm.slane %v1284_v45, %v5005_v53  ;;  %v1380_v36 = vsel %vm508_vm10, 0.0, %v1379_v46  ;;  %v1341_v14 = vrot.slane %v1330_v3, 4  ;;  %v1277_v45 = vrot.slane %v1264_v7, 4 }
 0x2c0   :  { %v1313_v4 = vrot.slane %v5189_v54, 4  ;;  %v1294_v19 = vsel %vm508_vm10, 0.0, %v1293_v56  ;;  %v1388_v56 = vperm.slane %v1380_v36, %v5027_v11 }
 0x2c1   :  { %1453 = vrot.lane.b32.xlu0 %v1346_v61, %s4592_s22  ;;  %1455 = vrot.lane.b32.xlu1 %v1384_v18, %s4592_s22  ;;  %v1302_v63 = vperm.slane %v1294_v19, %v5027_v11  ;;  %v1308_v37 = vperm.slane %v1292_v8, %v5027_v11  ;;  %v1270_v61 = vperm.slane %v1254_v10, %v5027_v11  ;;  %v1354_v18 = vsel %vm508_vm10, 0.0, %v1353_v48 }
 0x2c2   :  { %v1314_v23 = vsel %vm508_vm10, 0.0, %v1313_v4  ;;  %v1394_v4 = vsel %vm508_vm10, 0.0, %v1393_v44  ;;  %v1303_v3 = vrot.slane %v1292_v8, 4  ;;  %v1278_v27 = vsel %vm508_vm10, 0.0, %v1277_v45 }
 0x2c3   :  { %1403 = vrot.lane.b32.xlu2 %v1314_v23, %s4593_s6  ;;  %v1317_v23 = vrot.slane %v1308_v37, 4  ;;  %v1315_v43 = vrot.slane %v1302_v63, 4  ;;  %v1279_v35 = vrot.slane %v1270_v61, 4  ;;  %v1395_v28 = vrot.slane %v1388_v56, 4 }
 0x2c5   :  { %v1318_v19 = vsel %vm508_vm10, 0.0, %v1317_v23  ;;  %v1316_v42 = vsel %vm508_vm10, 0.0, %v1315_v43  ;;  %v1396_v59 = vsel %vm508_vm10, 0.0, %v1395_v28 }
 0x2c9   :  { %1401 = vrot.lane.b32.xlu1 %v1276_v16, %s4593_s6  ;;  %1419 = vrot.lane.b32.xlu0 %v1302_v63, %s4591_s21  ;;  %v1342_v16 = vsel %vm508_vm10, 0.0, %v1341_v14  ;;  %v1280_v63 = vsel %vm508_vm10, 0.0, %v1279_v35  ;;  %v361_v14 = vrot.slane %v4801_v60, 4 }
 0x2ca   :  { %v1350_v29 = vperm.slane %v1342_v16, %v5027_v11 }
 0x2cb   :  { %1439 = vrot.lane.b32.xlu2 %v1392_v9, %s4589_s1  ;;  %v1265_v9 = vrot.slane %v1254_v10, 4 }
 0x2cc   :  { %v1357_v39 = vrot.slane %v1350_v29, 4 }
 0x2d1   :  { %1417 = vrot.lane.b32.xlu0 %v1264_v7, %s4591_s21  ;;  %1451 = vrot.lane.b32.xlu1 %v1308_v37, %s4592_s22  ;;  %v1304_v37 = vsel %vm508_vm10, 0.0, %v1303_v3  ;;  %v1266_v7 = vsel %vm508_vm10, 0.0, %v1265_v9  ;;  %v382_v3 = vrot.slane %v4805_v62, 4 }
 0x2d2   :  { %v1312_v46 = vperm.slane %v1304_v37, %v5027_v11  ;;  %v1274_v10 = vperm.slane %v1266_v7, %v5027_v11 }
 0x2d3   :  { %1469 = vrot.lane.b32.xlu2 %v1356_v33, %s4594_s23  ;;  %v1358_v33 = vsel %vm508_vm10, 0.0, %v1357_v39  ;;  %v383_v39 = vadd.f32 %v382_v3, %v4805_v62 }
 0x2d4   :  { %v1281_v8 = vrot.slane %v1274_v10, 4  ;;  %v1319_v44 = vrot.slane %v1312_v46, 4 }
 0x2d6   :  { %v1282_v36 = vsel %vm508_vm10, 0.0, %v1281_v8 }
 0x2d9   :  { %1471 = vrot.lane.b32.xlu0 %v1394_v4, %s4594_s23  ;;  %1449 = vrot.lane.b32.xlu1 %v1270_v61, %s4592_s22  ;;  %v1320_v61 = vsel %vm508_vm10, 0.0, %v1319_v44  ;;  %v124_v4 = vsel %vm120_vm6, %v4760_v24, 16  ;;  %vm1579_vm6 = vcmp.gt.f32.partialorder %v4789_v50, 0.0 }
 0x2db   :  { %1487 = vrot.lane.b32.xlu2 %v1388_v56, %s4590_s20  ;;  %v5259_v56 = vsel %vm104_vm1, %v124_v4, 2147483647 }
 0x2dc   :  { %v172_v23 = vshra.s32 %v5259_v56, 16 }
 0x2de   :  { %v5262_v43 = vcvt.s32.f32 %v172_v23 }
 0x2e1   :  { %1437 = vrot.lane.b32.xlu1 %v1354_v18, %s4589_s1  ;;  %1467 = vrot.lane.b32.xlu0 %v1318_v19, %s4594_s23 }
 0x2e3   :  { %1435 = vrot.lane.b32.xlu2 %v1316_v42, %s4589_s1  ;;  %v362_v42 = vadd.f32 %v361_v14, %v4801_v60  ;;  %v384_v60 = vrot.slane %v383_v39, 2 }
 0x2e5   :  { %v363_v35 = vrot.slane %v362_v42, 2 }
 0x2e7   :  { %v364_v45 = vadd.f32 %v363_v35, %v362_v42 }
 0x2e9   :  { %1485 = vrot.lane.b32.xlu1 %v1350_v29, %s4590_s20  ;;  %1465 = vrot.lane.b32.xlu0 %v1280_v63, %s4594_s23  ;;  %v365_v9 = vrot.slane %v364_v45, 1 }
 0x2ea   :  { %v1422_v48 = vpop.permute.xlu2 %1421 }
 0x2eb   :  { %1433 = vrot.lane.b32.xlu2 %v1278_v27, %s4589_s1  ;;  %v5268_v28 = vadd.f32 %v365_v9, %v364_v45 }
 0x2f1   :  { %1503 = vrot.lane.b32.xlu1 %v1396_v59, %s4595_s24  ;;  %1501 = vrot.lane.b32.xlu0 %v1358_v33, %s4595_s24  ;;  %v75_v59 = vld [vmem:[%s7166_s9 + $0x1] sm:$0x1] }
 0x2f3   :  { %1483 = vrot.lane.b32.xlu2 %v1312_v46, %s4590_s20  ;;  %v385_v46 = vadd.f32 %v384_v60, %v383_v39 }
 0x2f5   :  { %v386_v44 = vrot.slane %v385_v46, 1 }
 0x2f9   :  { %1497 = vrot.lane.b32.xlu0 %v1282_v36, %s4595_s24  ;;  %1499 = vrot.lane.b32.xlu1 %v1320_v61, %s4595_s24  ;;  %v5276_v36 = vadd.f32 %v386_v44, %v385_v46 }
 0x2fb   :  { %1481 = vrot.lane.b32.xlu2 %v1274_v10, %s4590_s20 }
 0x302   :  { %v1406_v18 = vpop.permute.xlu0 %1405 }
 0x303   :  { %v1511_v35 = vsel %vm104_vm1, %v5120_v40, %v1406_v18 }
 0x304   :  { %v1516_v3 = vsel %vm1513_vm15, %v1511_v35, %v1422_v48 }
 0x31d   :  { %v1404_v19 = vpop.permute.xlu2 %1403 }
 0x31e   :  { %v1510_v48 = vsel %vm104_vm1, %v5189_v54, %v1404_v19 }
 0x323   :  { %175 = vmin.xlane.f32.xlu1 %v5262_v43 }
 0x325   :  { %v1440_v13 = vpop.permute.xlu2 %1439 }
 0x32b   :  { %v1424_v16 = vpop.permute.xlu0 %1423  ;;  %v1408_v47 = vpop.permute.xlu1 %1407 }
 0x32c   :  { %v1512_v45 = vsel %vm104_vm1, %v5160_v52, %v1408_v47 }
 0x32d   :  { %v1470_v27 = vpop.permute.xlu2 %1469  ;;  %v1517_v9 = vsel %vm1513_vm15, %v1512_v45, %v1424_v16 }
 0x32e   :  { %v1522_v46 = vsel %vm1518_vm11, %v1517_v9, %v1440_v13 }
 0x333   :  { %v1454_v29 = vpop.permute.xlu0 %1453  ;;  %v1456_v63 = vpop.permute.xlu1 %1455 }
 0x334   :  { %v1527_v44 = vsel %vm7262_vm2, %v1522_v46, %v1456_v63 }
 0x335   :  { %v1488_v33 = vpop.permute.xlu2 %1487 }
 0x33b   :  { %v1420_v37 = vpop.permute.xlu0 %1419  ;;  %v1402_v7 = vpop.permute.xlu1 %1401 }
 0x33c   :  { %392 = vrot.lane.b32.xlu1 %v5268_v28, %s4595_s24  ;;  %v1509_v16 = vsel %vm104_vm1, %v5195_v17, %v1402_v7 }
 0x33d   :  { %v1436_v4 = vpop.permute.xlu2 %1435 }
 0x343   :  { %v1418_v10 = vpop.permute.xlu0 %1417  ;;  %v1452_v8 = vpop.permute.xlu1 %1451 }
 0x344   :  { %1733 = vperm.xlu1 %4382, %v75_v59   ;;  %v1514_v13 = vsel %vm1513_vm15, %v1509_v16, %v1418_v10 }
 0x345   :  { %v1434_v42 = vpop.permute.xlu2 %1433 }
 0x34b   :  { %v1472_v61 = vpop.permute.xlu0 %1471  ;;  %v1450_v62 = vpop.permute.xlu1 %1449 }
 0x34c   :  { %398 = vrot.lane.b32.xlu1 %v5276_v36, %s4595_s24  ;;  %v1532_v18 = vsel %vm7260_vm7, %v1527_v44, %v1472_v61 }
 0x34d   :  { %v1484_v52 = vpop.permute.xlu2 %1483  ;;  %v1537_v61 = vsel %vm7259_vm8, %v1532_v18, %v1488_v33 }
 0x353   :  { %v1468_v23 = vpop.permute.xlu0 %1467  ;;  %v1438_v14 = vpop.permute.xlu1 %1437 }
 0x354   :  { %406 = vrot.lane.b32.xlu1 %v5276_v36, %s4590_s20  ;;  %v1521_v59 = vsel %vm1518_vm11, %v1516_v3, %v1438_v14  ;;  %v1515_v14 = vsel %vm1513_vm15, %v1510_v48, %v1420_v37 }
 0x355   :  { %v1526_v40 = vsel %vm7262_vm2, %v1521_v59, %v1454_v29  ;;  %v1520_v17 = vsel %vm1518_vm11, %v1515_v14, %v1436_v4  ;;  %v1482_v4 = vpop.permute.xlu2 %1481  ;;  %v5357_v14 = vld [vmem:[%s7157_s0 + $0x8] sm:$0xff] }
 0x356   :  { %v1531_v47 = vsel %vm7260_vm7, %v1526_v40, %v1470_v27  ;;  %v1519_v27 = vsel %vm1518_vm11, %v1514_v13, %v1434_v42  ;;  %v1525_v37 = vsel %vm7262_vm2, %v1520_v17, %v1452_v8  ;;  %v5320_v8 = vld [vmem:[%s7157_s0 + $0x18] sm:$0xff]  ;;  %v7281_v17 = vmax.f32 %v4835_v20, 0.0 }
 0x357   :  { %v1524_v7 = vsel %vm7262_vm2, %v1519_v27, %v1450_v62  ;;  %v1530_v3 = vsel %vm7260_vm7, %v1525_v37, %v1468_v23  ;;  %v5326_v62 = vld [vmem:[%s7157_s0 + $0x10] sm:$0xff] }
 0x35b   :  { %v1466_v39 = vpop.permute.xlu0 %1465  ;;  %v1486_v60 = vpop.permute.xlu1 %1485 }
 0x35c   :  { %v1536_v63 = vsel %vm7259_vm8, %v1531_v47, %v1486_v60  ;;  %v1529_v60 = vsel %vm7260_vm7, %v1524_v7, %v1466_v39  ;;  %v1535_v39 = vsel %vm7259_vm8, %v1530_v3, %v1484_v52  ;;  %v171_v7 = vand.u32 65535, %v5259_v56  ;;  %v4404_v56 = vld [vmem:[%s7166_s9 + $0x3] ss:$0 sm:$0xff] }
 0x35d   :  { %v1534_v42 = vsel %vm7259_vm8, %v1529_v60, %v1482_v4 }
 0x35e   :  { %v173_v3 = vcvt.s32.f32 %v171_v7 }
 0x363   :  { %v1502_v29 = vpop.permute.xlu0 %1501  ;;  %v1504_v35 = vpop.permute.xlu1 %1503 }
 0x364   :  { %v1541_v45 = vsel %vm7204_vm9, %v1536_v63, %v1502_v29  ;;  %v1542_v9 = vsel %vm7204_vm9, %v1537_v61, %v1504_v35  ;;  %v7278_v29 = vld [vmem:[#allocation14_spill] sm:$0xff]  ;;  %v7279_v61 = vmax.f32 %v4815_v5, 0.0 }
 0x365   :  { %v1545_v54 = vperm.slane %v1541_v45, 0  ;;  %v5304_v19 = vperm.slane %v1542_v9, 0  ;;  %v7280_v45 = vmax.f32 %v4810_v1, 0.0 }
 0x367   :  { %v1575_v10 = vmul.f32 %v1545_v54, %v4785_v34  ;;  %v1577_v33 = vmul.f32 %v5304_v19, %v4785_v34  ;;  %v1576_v52 = vmul.f32 %v1545_v54, %v4787_v49  ;;  %v1578_v47 = vmul.f32 %v5304_v19, %v4787_v49 }
 0x368   :  { %v1551_v9 = vmul.f32 %v1545_v54, %v7280_v45  ;;  %v1552_v27 = vmul.f32 %v1545_v54, %v7281_v17  ;;  %v136_v45 = vcvt.f32.s32 %v5104_v31  ;;  %v4402_v31 = vld [vmem:[%s7167_s10 + $0x1] ss:$0 sm:$0xff] }
 0x369   :  { %4306 = vmatmul.msk.f32.vlgmr.msra.gmra.mxu2 %vm1583_vm13, %v1575_v10  ;;  %4308 = vmatmul.msk.f32.vlgmr.msra.gmra.mxu3 %vm1585_vm4, %v1577_v33  ;;  %vm1581_vm13 = vcmp.gt.f32.partialorder %v4791_v51, 0.0  ;;  %vm1584_vm4 = vcmp.gt.f32.partialorder %v4835_v20, 0.0  ;;  %v7283_v20 = vld [vmem:[#allocation12_spill] sm:$0xff] }
 0x36a   :  { %2633 = vmatpush.msra.mxu3 %v5320_v8  ;;  %2610 = vmatpush.msra.mxu2 %v5326_v62  ;;  %v368_v54 = vrot.slane %v7283_v20, 4 }
 0x36b   :  { %v1498_v23 = vpop.permute.xlu0 %1497  ;;  %v1500_v59 = vpop.permute.xlu1 %1499 }
 0x36c   :  { %v1539_v46 = vsel %vm7204_vm9, %v1534_v42, %v1498_v23  ;;  %v1540_v44 = vsel %vm7204_vm9, %v1535_v39, %v1500_v59  ;;  %vm1586_vm9 = vcmp.gt.f32.partialorder %v4837_v21, 0.0  ;;  %v369_v42 = vadd.f32 %v368_v54, %v7283_v20  ;;  %v4405_v39 = vld [vmem:[%s7166_s9] ss:$0 sm:$0xff] }
 0x36d   :  { %v5333_v40 = vperm.slane %v1539_v46, 0  ;;  %v5335_v18 = vperm.slane %v1540_v44, 0 }
 0x36f   :  { %v1571_v48 = vmul.f32 %v5333_v40, %v4785_v34  ;;  %v1573_v16 = vmul.f32 %v5335_v18, %v4785_v34  ;;  %v5351_v34 = vld [vmem:[%s7157_s0] sm:$0xff]  ;;  %v1572_v13 = vmul.f32 %v5333_v40, %v4787_v49  ;;  %v1574_v63 = vmul.f32 %v5335_v18, %v4787_v49  ;;  %v7282_v49 = vld [vmem:[#allocation13_spill] sm:$0xff] }
 0x370   :  { %v1548_v35 = vmul.f32 %v5333_v40, %v7279_v61  ;;  %v375_v37 = vrot.slane %v7282_v49, 4  ;;  %v151_v61 = vcvt.f32.s32 %v5133_v58  ;;  %v4401_v58 = vld [vmem:[%s7167_s10] ss:$0 sm:$0xff] }
 0x371   :  { %4302 = vmatmul.msk.f32.vlgmr.msra.gmra.mxu0 %vm1579_vm6, %v1571_v48  ;;  %4304 = vmatmul.msk.f32.vlgmr.msra.gmra.mxu1 %vm1581_vm13, %v1573_v16  ;;  %vm1582_vm6 = vcmp.gt.f32.partialorder %v7278_v29, 0.0  ;;  %v74_v48 = vld [vmem:[%s7166_s9] sm:$0x1]  ;;  %v77_v16 = vld [vmem:[%s7166_s9 + $0x3] sm:$0x1] }
 0x372   :  { %4307 = vmatmul.msk.f32.gmra.mxu2 %vm1584_vm4, %v1576_v52  ;;  %4309 = vmatmul.msk.f32.gmra.mxu3 %vm1586_vm9, %v1578_v47  ;;  %vm1580_vm9 = vcmp.gt.f32.partialorder %v4815_v5, 0.0  ;;  %v376_v10 = vadd.f32 %v375_v37, %v7282_v49  ;;  %v7284_v52 = vmax.f32 %v4837_v21, 0.0  ;;  %v137_v21 = vcvt.f32.s32 %v5076_v55  ;;  %v64_v37 = vld [vmem:[%s7162_s5 + $0x8] sm:$0xff]  ;;  %v63_v55 = vld [vmem:[%s7162_s5] sm:$0xff] }
 0x373   :  { %2564 = vmatpush.msra.mxu0 %v5351_v34  ;;  %2587 = vmatpush.msra.mxu1 %v5357_v14 }
 0x374   :  { %v377_v60 = vrot.slane %v376_v10, 2  ;;  %v1554_v47 = vmul.f32 %v5304_v19, %v7284_v52  ;;  %v138_v17 = vshll.u32 %v137_v21, 16 }
 0x376   :  { %v378_v1 = vadd.f32 %v377_v60, %v376_v10  ;;  %v139_v7 = vadd.s32 %v138_v17, %v136_v45 }
 0x378   :  { %v379_v4 = vrot.slane %v378_v1, 1 }
 0x379   :  { %4303 = vmatmul.msk.f32.gmra.mxu0 %vm1580_vm9, %v1572_v13  ;;  %4305 = vmatmul.msk.f32.gmra.mxu1 %vm1582_vm6, %v1574_v63  ;;  %v152_v13 = vcvt.f32.s32 %v5084_v41  ;;  %v167_v63 = vcvt.f32.s32 %v5093_v25  ;;  %v65_v25 = vld [vmem:[%s7162_s5 + $0x10] sm:$0xff]  ;;  %vm185_vm9 = vcmp.eq.s32.totalorder %v139_v7, %v63_v55 }
 0x37a   :  { %v5377_v23 = vadd.f32 %v379_v4, %v378_v1 }
 0x37e   :  { %1557 = vadd.xlane.f32.xlu1 %v1548_v35  ;;  %v153_v35 = vshll.u32 %v152_v13, 16 }
 0x380   :  { %v154_v49 = vadd.s32 %v153_v35, %v151_v61 }
 0x382   :  { %vm186_vm4 = vcmp.eq.s32.totalorder %v154_v49, %v64_v37  ;;  %v7287_v49 = vmax.f32 %v4789_v50, 0.0  ;;  %v5475_v50 = vld [vmem:[%s7164_s7 + $0x8] sm:$0xff] }
 0x384   :  { %v1547_v37 = vmul.f32 %v5333_v40, %v7287_v49 }
 0x386   :  { %1563 = vadd.xlane.f32.xlu1 %v1551_v9  ;;  %v166_v9 = vcvt.f32.s32 %v5131_v0  ;;  %v4270_v0 = vsel %vm186_vm4, 1.0, %v7205_v30 }
 0x387   :  { %v210_v1 = vmul.f32 %v4402_v31, %v4270_v0  ;;  %v7291_v0 = vmax.f32 %v7278_v29, 0.0  ;;  %v4408_v29 = vld [vmem:[%s7166_s9 + $0x2] ss:$0 sm:$0xff] }
 0x38e   :  { %1565 = vadd.xlane.f32.xlu1 %v1552_v27  ;;  %v168_v27 = vshll.u32 %v167_v63, 16 }
 0x390   :  { %v169_v41 = vadd.s32 %v168_v27, %v166_v9  ;;  %v5454_v9 = vld [vmem:[%s7164_s7] sm:$0xff] }
 0x392   :  { %vm187_vm6 = vcmp.eq.s32.totalorder %v169_v41, %v65_v25 }
 0x393   :  { %v4271_v60 = vsel %vm187_vm6, 1.0, %v7205_v30  ;;  %vm7257_vm6 = vcmask 130112  }
 0x396   :  { %v176_v33 = vpop.xlane.xlu1 %175 }
 0x397   :  { %vm177_vm13 = vcmp.eq.f32.partialorder %v5262_v43, %v176_v33  ;;  %v370_v43 = vrot.slane %v369_v42, 2  ;;  %v182_v10 = vcvt.f32.s32 %v176_v33 }
 0x398   :  { %v178_v5 = vsel %vm177_vm13, %v173_v3, inf  ;;  %v4406_v3 = vld [vmem:[%s7167_s10 + $0x2] ss:$0 sm:$0xff]  ;;  %vm7256_vm13 = vcmask 7168  }
 0x399   :  { %179 = vmin.xlane.f32.xlu2 %v178_v5  ;;  %v371_v59 = vadd.f32 %v370_v43, %v369_v42  ;;  %v4269_v5 = vsel %vm185_vm9, 1.0, %v7205_v30  ;;  %v183_v54 = vshll.u32 %v182_v10, 16  ;;  %v211_v42 = vmul.f32 %v4406_v3, %v4271_v60  ;;  %v66_v43 = vld [vmem:[%s7162_s5 + $0x18] sm:$0xff]  ;;  %v4496_v60 = vld [vmem:[%s7160_s3] sm:$0xff] }
 0x39a   :  { %v209_v20 = vmul.f32 %v4401_v58, %v4269_v5  ;;  %v4495_v5 = vld [vmem:[%s7160_s3 + $0x18] sm:$0xff]  ;;  %vm7208_vm9 = vcmask 16384  }
 0x39b   :  { %v372_v46 = vrot.slane %v371_v59, 1 }
 0x39d   :  { %v5389_v44 = vadd.f32 %v372_v46, %v371_v59  ;;  %v215_v59 = vsel %vm7256_vm13, %v210_v1, 0.0  ;;  %v76_v1 = vld [vmem:[%s7166_s9 + $0x2] sm:$0x1] }
 0x3a7   :  { %412 = vrot.lane.b32.xlu1 %v5377_v23, %s4594_s23 }
 0x3b1   :  { %1708 = vperm.xlu2 %4383, %v4404_v56  }
 0x3b9   :  { %1696 = vperm.xlu2 %4383, %v4405_v39   ;;  %v4407_v39 = vld [vmem:[%s7167_s10 + $0x3] ss:$0 sm:$0xff] }
 0x3c1   :  { %394 = vrot.lane.b32.xlu2 %v5389_v44, %s4595_s24 }
 0x3c9   :  { %1728 = vperm.xlu2 %4383, %v74_v48   ;;  %v214_v48 = vsel %vm7256_vm13, %v209_v20, 0.0 }
 0x3d1   :  { %1569 = vadd.xlane.f32.xlu1 %v1554_v47  ;;  %1743 = vperm.xlu2 %4383, %v77_v16   ;;  %v217_v16 = vsel %vm7256_vm13, %v211_v42, 0.0  ;;  %v216_v47 = vadd.f32 %v215_v59, %v214_v48 }
 0x3d3   :  { %v218_v63 = vadd.f32 %v217_v16, %v216_v47 }
 0x3d9   :  { %396 = vrot.lane.b32.xlu2 %v5377_v23, %s4595_s24 }
 0x3e1   :  { %402 = vrot.lane.b32.xlu2 %v5389_v44, %s4590_s20 }
 0x3e9   :  { %404 = vrot.lane.b32.xlu2 %v5377_v23, %s4590_s20 }
 0x3ec   :  { %v1681_v46 = vpop.f32.mrf.mxu3 }
 0x3ee   :  { %v1612_v27 = vpop.f32.mrf.mxu0 }
 0x3f1   :  { %410 = vrot.lane.b32.xlu2 %v5389_v44, %s4594_s23 }
 0x3f5   :  { %v1684_v7 = vpop.f32.mrf.mxu3 }
 0x3f6   :  { %v1615_v58 = vpop.f32.mrf.mxu0 }
 0x40c   :  { %v180_v4 = vpop.xlane.xlu2 %179 }
 0x40d   :  { %v181_v56 = vcvt.f32.s32 %v180_v4 }
 0x40f   :  { %v184_v33 = vadd.s32 %v183_v54, %v181_v56 }
 0x411   :  { %vm188_vm4 = vcmp.eq.s32.totalorder %v184_v33, %v66_v43  ;;  %v5533_v43 = vpop.permute.xlu1 %392  ;;  %v7299_v33 = vmax.f32 %v4791_v51, 0.0 }
 0x412   :  { %v4272_v52 = vsel %vm188_vm4, 1.0, %v7205_v30  ;;  %7298 = vst [vmem:[#allocation26_spill] sm:$0xff] %v5533_v43  ;;  %vm7321_vm4 = vcmask 1042434  }
 0x413   :  { %v212_v13 = vmul.f32 %v4407_v39, %v4272_v52  ;;  %v1549_v39 = vmul.f32 %v5335_v18, %v7299_v33 }
 0x414   :  { %v5447_v21 = vpop.permute.xlu2 %1708 }
 0x415   :  { %7285 = vst [vmem:[#allocation14_spill] sm:$0xff] %v5447_v21  ;;  %v1717_v61 = vmul.f32 %v5447_v21, %v1681_v46  ;;  %v219_v35 = vsel %vm7256_vm13, %v212_v13, 0.0  ;;  %v1718_v41 = vmul.f32 %v5447_v21, %v1684_v7  ;;  %vm7337_vm13 = vcmask 1043459  }
 0x416   :  { %v220_v45 = vadd.f32 %v219_v35, %v218_v63 }
 0x417   :  { %v5457_v17 = vsub.f32 %v5454_v9, %v1717_v61  ;;  %v5478_v40 = vsub.f32 %v5475_v50, %v1718_v41 }
 0x418   :  { %221 = vadd.xlane.f32.xlu0 %v220_v45 }
 0x419   :  { %7286 = vst [vmem:[#allocation13_spill] sm:$0xff] %v5457_v17  ;;  %4316 = vmatmul.msk.f32.vlgmr.msrb.gmra.mxu3 %vm7258_vm0, %v5457_v17  ;;  %v5540_v46 = vpop.permute.xlu1 %1733 }
 0x41a   :  { %1555 = vadd.xlane.f32.xlu2 %v1547_v37  ;;  %3393 = vmatpush.xpose.msrb.mxu3 %v5320_v8  ;;  %7290 = vst [vmem:[#allocation19_spill] sm:$0xff] %v5478_v40  ;;  %v1550_v8 = vmul.f32 %v5335_v18, %v7291_v0 }
 0x41b   :  { %7301 = vst [vmem:[#allocation28_spill] sm:$0xff] %v5540_v46 }
 0x41c   :  { %v5466_v55 = vpop.permute.xlu2 %1696 }
 0x41d   :  { %7288 = vst [vmem:[#allocation12_spill] sm:$0xff] %v5466_v55  ;;  %v1711_v25 = vmul.f32 %v5466_v55, %v1612_v27  ;;  %v1712_v10 = vmul.f32 %v5466_v55, %v1615_v58  ;;  %v1658_v58 = vpop.f32.mrf.mxu2 }
 0x41f   :  { %v5470_v31 = vsub.f32 %v5454_v9, %v1711_v25  ;;  %v5490_v3 = vsub.f32 %v5475_v50, %v1712_v10 }
 0x421   :  { %7289 = vst [vmem:[#allocation18_spill] sm:$0xff] %v5470_v31  ;;  %4310 = vmatmul.msk.f32.vlgmr.msrb.gmra.mxu0 %vm7258_vm0, %v5470_v31  ;;  %4317 = vmatmul.msk.f32.gmra.mxu3 %vm7258_vm0, %v5478_v40  ;;  %v5544_v16 = vpop.permute.xlu1 %398 }
 0x422   :  { %1561 = vadd.xlane.f32.xlu2 %v1550_v8  ;;  %3324 = vmatpush.xpose.msrb.mxu0 %v5351_v34  ;;  %7292 = vst [vmem:[#allocation20_spill] sm:$0xff] %v5490_v3  ;;  %v4403_v34 = vld [vmem:[%s7166_s9 + $0x1] ss:$0 sm:$0xff] }
 0x423   :  { %7303 = vst [vmem:[#allocation30_spill] sm:$0xff] %v5544_v16 }
 0x424   :  { %v5521_v4 = vpop.permute.xlu2 %394 }
 0x425   :  { %7293 = vst [vmem:[#allocation21_spill] sm:$0xff] %v5521_v4 }
 0x429   :  { %4311 = vmatmul.msk.f32.gmra.mxu0 %vm7258_vm0, %v5490_v3  ;;  %4329 = vmatmul.msk.f32.vlgmr.msra.gmra.mxu3 %vm7258_vm0, %v5457_v17  ;;  %v5548_v37 = vpop.permute.xlu1 %406 }
 0x42a   :  { %3740 = vmatpush.msra.mxu3 %v4495_v5  ;;  %7304 = vst [vmem:[#allocation31_spill] sm:$0xff] %v5548_v37 }
 0x42c   :  { %1704 = vperm.xlu0 %4384, %v4408_v29   ;;  %v5525_v20 = vpop.permute.xlu2 %1728 }
 0x42d   :  { %7294 = vst [vmem:[#allocation22_spill] sm:$0xff] %v5525_v20 }
 0x431   :  { %4323 = vmatmul.msk.f32.vlgmr.msra.gmra.mxu0 %vm7258_vm0, %v5470_v31  ;;  %4330 = vmatmul.msk.f32.gmra.mxu3 %vm7258_vm0, %v5478_v40  ;;  %v1558_v10 = vpop.xlane.xlu1 %1557 }
 0x432   :  { %3653 = vmatpush.msra.mxu0 %v4496_v60  ;;  %v1763_v29 = vperm.slane %v1558_v10, 0  ;;  %v1764_v5 = vperm.slane %v1558_v10, 1 }
 0x434   :  { %1700 = vperm.xlu0 %4384, %v4403_v34   ;;  %v5527_v54 = vpop.permute.xlu2 %1743 }
 0x435   :  { %7295 = vst [vmem:[#allocation23_spill] sm:$0xff] %v5527_v54 }
 0x439   :  { %4324 = vmatmul.msk.f32.gmra.mxu0 %vm7258_vm0, %v5490_v3 }
 0x43a   :  { %416 = vrot.lane.b32.xlu2 %v5268_v28, %s4592_s22 }
 0x43c   :  { %1738 = vperm.xlu0 %4384, %v76_v1   ;;  %v5529_v56 = vpop.permute.xlu2 %396  ;;  %v1765_v1 = vperm.slane %v1558_v10, 2 }
 0x43d   :  { %7296 = vst [vmem:[#allocation24_spill] sm:$0xff] %v5529_v56 }
 0x444   :  { %400 = vrot.lane.b32.xlu0 %v5268_v28, %s4590_s20  ;;  %v5531_v42 = vpop.permute.xlu2 %402 }
 0x445   :  { %7297 = vst [vmem:[#allocation25_spill] sm:$0xff] %v5531_v42 }
 0x44c   :  { %408 = vrot.lane.b32.xlu0 %v5268_v28, %s4594_s23  ;;  %v5538_v59 = vpop.permute.xlu2 %404 }
 0x44d   :  { %7300 = vst [vmem:[#allocation27_spill] sm:$0xff] %v5538_v59 }
 0x454   :  { %v5542_v48 = vpop.permute.xlu2 %410 }
 0x455   :  { %7302 = vst [vmem:[#allocation29_spill] sm:$0xff] %v5542_v48 }
 0x476   :  { %1559 = vadd.xlane.f32.xlu0 %v1549_v39  ;;  %v1766_v39 = vperm.slane %v1558_v10, 3 }
 0x48a   :  { %414 = vrot.lane.b32.xlu0 %v5276_v36, %s4594_s23 }
 0x48b   :  { %v222_v52 = vpop.xlane.xlu0 %221 }
 0x48c   :  { %v223_v47 = vrot.slane %v222_v52, 4 }
 0x48d   :  { %v1556_v13 = vpop.xlane.xlu2 %1555 }
 0x48e   :  { %v224_v63 = vadd.f32 %v223_v47, %v222_v52  ;;  %v1755_v61 = vperm.slane %v1556_v13, 0  ;;  %v1756_v51 = vperm.slane %v1556_v13, 1  ;;  %v1757_v35 = vperm.slane %v1556_v13, 2 }
 0x48f   :  { %v1758_v18 = vperm.slane %v1556_v13, 3  ;;  %v1759_v45 = vperm.slane %v1556_v13, 4  ;;  %v1760_v49 = vperm.slane %v1556_v13, 5  ;;  %v1761_v7 = vperm.slane %v1556_v13, 6 }
 0x490   :  { %1819 = vst [vmem:[#allocation1] ss:$9 sm:$0xff] %v1755_v61  ;;  %v225_v27 = vrot.slane %v224_v63, 2  ;;  %v1762_v25 = vperm.slane %v1556_v13, 7  ;;  %v1767_v52 = vperm.slane %v1558_v10, 4  ;;  %v1635_v13 = vpop.f32.mrf.mxu1  ;;  %v1769_v61 = vperm.slane %v1558_v10, 6 }
 0x491   :  { %1821 = vst [vmem:[#allocation1 + $0x1] ss:$9 sm:$0xff] %v1756_v51  ;;  %v1770_v51 = vperm.slane %v1558_v10, 7 }
 0x492   :  { %1823 = vst [vmem:[#allocation1 + $0x2] ss:$9 sm:$0xff] %v1757_v35  ;;  %v226_v41 = vadd.f32 %v225_v27, %v224_v63  ;;  %v1768_v63 = vperm.slane %v1558_v10, 5  ;;  %v1661_v35 = vpop.f32.mrf.mxu2 }
 0x493   :  { %1825 = vst [vmem:[#allocation1 + $0x3] ss:$9 sm:$0xff] %v1758_v18 }
 0x494   :  { %1827 = vst [vmem:[#allocation1 + $0x4] ss:$9 sm:$0xff] %v1759_v45  ;;  %v227_v0 = vrot.slane %v226_v41, 1 }
 0x495   :  { %1829 = vst [vmem:[#allocation1 + $0x5] ss:$9 sm:$0xff] %v1760_v49 }
 0x496   :  { %1831 = vst [vmem:[#allocation1 + $0x6] ss:$9 sm:$0xff] %v1761_v7  ;;  %v228_v8 = vadd.f32 %v227_v0, %v226_v41 }
 0x497   :  { %1833 = vst [vmem:[#allocation1 + $0x7] ss:$9 sm:$0xff] %v1762_v25 }
 0x498   :  { %4352 = vpush %v228_v8 }
 0x49e   :  { %v1834_v34 = vld [vmem:[#allocation1] sm:$0xff]  ;;  %v5550_v60 = vpop.permute.xlu0 %1704 }
 0x49f   :  { %7305 = vst [vmem:[#allocation32_spill] sm:$0xff] %v5550_v60  ;;  %v1715_v33 = vmul.f32 %v5550_v60, %v1658_v58  ;;  %v1716_v18 = vmul.f32 %v5550_v60, %v1661_v35 }
 0x4a0   :  { %1835 = vst [vmem:[#allocation1] ss:$9 sm:$0xff] %v1763_v29 }
 0x4a1   :  { %1836 = vst [vmem:[#allocation1 + $0x1] ss:$9 sm:$0xff] %v1764_v5  ;;  %v5554_v47 = vsub.f32 %v5454_v9, %v1715_v33  ;;  %v5567_v7 = vsub.f32 %v5475_v50, %v1716_v18 }
 0x4a2   :  { %1837 = vst [vmem:[#allocation1 + $0x2] ss:$9 sm:$0xff] %v1765_v1 }
 0x4a3   :  { %7306 = vst [vmem:[#allocation33_spill] sm:$0xff] %v5554_v47  ;;  %4314 = vmatmul.msk.f32.vlgmr.msrb.gmra.mxu2 %vm7258_vm0, %v5554_v47 }
 0x4a4   :  { %1838 = vst [vmem:[#allocation1 + $0x3] ss:$9 sm:$0xff] %v1766_v39  ;;  %3370 = vmatpush.xpose.msrb.mxu2 %v5326_v62  ;;  %v1638_v62 = vpop.f32.mrf.mxu1 }
 0x4a5   :  { %1839 = vst [vmem:[#allocation1 + $0x4] ss:$9 sm:$0xff] %v1767_v52 }
 0x4a6   :  { %1840 = vst [vmem:[#allocation1 + $0x5] ss:$9 sm:$0xff] %v1768_v63  ;;  %v5560_v45 = vpop.permute.xlu0 %1700 }
 0x4a7   :  { %1841 = vst [vmem:[#allocation1 + $0x6] ss:$9 sm:$0xff] %v1769_v61  ;;  %v1713_v27 = vmul.f32 %v5560_v45, %v1635_v13  ;;  %v1714_v25 = vmul.f32 %v5560_v45, %v1638_v62  ;;  %v1562_v61 = vpop.xlane.xlu2 %1561 }
 0x4a8   :  { %1842 = vst [vmem:[#allocation1 + $0x7] ss:$9 sm:$0xff] %v1770_v51  ;;  %v1779_v51 = vperm.slane %v1562_v61, 0  ;;  %v1780_v35 = vperm.slane %v1562_v61, 1  ;;  %v1782_v62 = vperm.slane %v1562_v61, 3 }
 0x4a9   :  { %7307 = vst [vmem:[#allocation34_spill] sm:$0xff] %v5560_v45  ;;  %v5564_v49 = vsub.f32 %v5454_v9, %v1713_v27  ;;  %v5576_v0 = vsub.f32 %v5475_v50, %v1714_v25  ;;  %v7311_v9 = vmax.f32 %v4812_v2, 0.0  ;;  %v4498_v2 = vld [vmem:[%s7160_s3 + $0x8] sm:$0xff]  ;;  %v1781_v27 = vperm.slane %v1562_v61, 2 }
 0x4aa   :  { %7309 = vst [vmem:[#allocation36_spill] sm:$0xff] %v5567_v7  ;;  %v1784_v25 = vperm.slane %v1562_v61, 5 }
 0x4ab   :  { %7308 = vst [vmem:[#allocation35_spill] sm:$0xff] %v5564_v49  ;;  %4312 = vmatmul.msk.f32.vlgmr.msrb.gmra.mxu1 %vm7258_vm0, %v5564_v49  ;;  %4315 = vmatmul.msk.f32.gmra.mxu2 %vm7258_vm0, %v5567_v7  ;;  %v1553_v8 = vmul.f32 %v5304_v19, %v7311_v9  ;;  %v1785_v9 = vperm.slane %v1562_v61, 6 }
 0x4ac   :  { %3347 = vmatpush.xpose.msrb.mxu1 %v5357_v14  ;;  %7310 = vst [vmem:[#allocation37_spill] sm:$0xff] %v5576_v0  ;;  %v4497_v14 = vld [vmem:[%s7160_s3 + $0x10] sm:$0xff] }
 0x4ae   :  { %v5597_v50 = vpop.permute.xlu0 %1738 }
 0x4af   :  { %v1843_v41 = vld [vmem:[#allocation1] sm:$0xff]  ;;  %7312 = vst [vmem:[#allocation38_spill] sm:$0xff] %v5597_v50 }
 0x4b0   :  { %1902 = vperm.xlu1 %4382, %v1843_v41   ;;  %v1783_v41 = vperm.slane %v1562_v61, 4 }
 0x4b3   :  { %4313 = vmatmul.msk.f32.gmra.mxu1 %vm7258_vm0, %v5576_v0  ;;  %4327 = vmatmul.msk.f32.vlgmr.msra.gmra.mxu2 %vm7258_vm0, %v5554_v47 }
 0x4b4   :  { %1567 = vadd.xlane.f32.xlu0 %v1553_v8  ;;  %3711 = vmatpush.msra.mxu2 %v4497_v14  ;;  %v1786_v8 = vperm.slane %v1562_v61, 7  ;;  %v1564_v14 = vpop.xlane.xlu1 %1563 }
 0x4b6   :  { %v5600_v58 = vpop.permute.xlu0 %400 }
 0x4b7   :  { %7313 = vst [vmem:[#allocation39_spill] sm:$0xff] %v5600_v58 }
 0x4bb   :  { %4325 = vmatmul.msk.f32.vlgmr.msra.gmra.mxu1 %vm7258_vm0, %v5564_v49  ;;  %4328 = vmatmul.msk.f32.gmra.mxu2 %vm7258_vm0, %v5567_v7 }
 0x4bc   :  { %3682 = vmatpush.msra.mxu1 %v4498_v2  ;;  %v1787_v2 = vperm.slane %v1564_v14, 0 }
 0x4be   :  { %v5602_v10 = vpop.permute.xlu0 %408 }
 0x4bf   :  { %7314 = vst [vmem:[#allocation40_spill] sm:$0xff] %v5602_v10 }
 0x4c3   :  { %4326 = vmatmul.msk.f32.gmra.mxu1 %vm7258_vm0, %v5576_v0  ;;  %vm7339_vm0 = vmmov %vm7321_vm4 }
 0x4c8   :  { %1899 = vperm.xlu0 %4384, %v1834_v34  }
 0x4c9   :  { %s4353_s18 = spop %4352 }
 0x4ca   :  { %v4220_v19 = vstv %s4353_s18 }
 0x4cb   :  { %4221 = vst.msk [vmem:[#allocation6] sm:$0x1] %vm7208_vm9, %v4220_v19  ;;  %v1788_v19 = vperm.slane %v1564_v14, 1  ;;  %vm7322_vm9 = vcmask 1043459  }
 0x4e9   :  { %v1560_v29 = vpop.xlane.xlu0 %1559 }
 0x4ea   :  { %v1771_v5 = vperm.slane %v1560_v29, 0  ;;  %v1772_v1 = vperm.slane %v1560_v29, 1  ;;  %v1773_v33 = vperm.slane %v1560_v29, 2  ;;  %v1774_v39 = vperm.slane %v1560_v29, 3 }
 0x4eb   :  { %v1775_v52 = vperm.slane %v1560_v29, 4  ;;  %v1776_v13 = vperm.slane %v1560_v29, 5  ;;  %v1777_v34 = vperm.slane %v1560_v29, 6  ;;  %v1778_v63 = vperm.slane %v1560_v29, 7 }
 0x4ec   :  { %1844 = vst [vmem:[#allocation1] ss:$9 sm:$0xff] %v1771_v5  ;;  %v1789_v5 = vperm.slane %v1564_v14, 2 }
 0x4ed   :  { %1845 = vst [vmem:[#allocation1 + $0x1] ss:$9 sm:$0xff] %v1772_v1  ;;  %v1790_v1 = vperm.slane %v1564_v14, 3 }
 0x4ee   :  { %1846 = vst [vmem:[#allocation1 + $0x2] ss:$9 sm:$0xff] %v1773_v33  ;;  %v1791_v33 = vperm.slane %v1564_v14, 4 }
 0x4ef   :  { %1847 = vst [vmem:[#allocation1 + $0x3] ss:$9 sm:$0xff] %v1774_v39  ;;  %v1792_v39 = vperm.slane %v1564_v14, 5 }
 0x4f0   :  { %1848 = vst [vmem:[#allocation1 + $0x4] ss:$9 sm:$0xff] %v1775_v52  ;;  %v1793_v52 = vperm.slane %v1564_v14, 6 }
 0x4f1   :  { %1849 = vst [vmem:[#allocation1 + $0x5] ss:$9 sm:$0xff] %v1776_v13  ;;  %v1794_v13 = vperm.slane %v1564_v14, 7 }
 0x4f2   :  { %1850 = vst [vmem:[#allocation1 + $0x6] ss:$9 sm:$0xff] %v1777_v34  ;;  %v1566_v34 = vpop.xlane.xlu1 %1565 }
 0x4f3   :  { %1851 = vst [vmem:[#allocation1 + $0x7] ss:$9 sm:$0xff] %v1778_v63  ;;  %v1795_v63 = vperm.slane %v1566_v34, 0  ;;  %v1796_v61 = vperm.slane %v1566_v34, 1 }
 0x4fa   :  { %v1852_v18 = vld [vmem:[#allocation1] sm:$0xff] }
 0x4fb   :  { %1853 = vst [vmem:[#allocation1] ss:$9 sm:$0xff] %v1779_v51  ;;  %1905 = vperm.xlu0 %4384, %v1852_v18   ;;  %v1798_v18 = vperm.slane %v1566_v34, 3 }
 0x4fc   :  { %1854 = vst [vmem:[#allocation1 + $0x1] ss:$9 sm:$0xff] %v1780_v35  ;;  %v1797_v35 = vperm.slane %v1566_v34, 2 }
 0x4fd   :  { %1855 = vst [vmem:[#allocation1 + $0x2] ss:$9 sm:$0xff] %v1781_v27  ;;  %v1799_v27 = vperm.slane %v1566_v34, 4 }
 0x4fe   :  { %1856 = vst [vmem:[#allocation1 + $0x3] ss:$9 sm:$0xff] %v1782_v62  ;;  %v1800_v62 = vperm.slane %v1566_v34, 5 }
 0x4ff   :  { %1857 = vst [vmem:[#allocation1 + $0x4] ss:$9 sm:$0xff] %v1783_v41  ;;  %v1801_v41 = vperm.slane %v1566_v34, 6 }
 0x500   :  { %1858 = vst [vmem:[#allocation1 + $0x5] ss:$9 sm:$0xff] %v1784_v25  ;;  %v1802_v25 = vperm.slane %v1566_v34, 7  ;;  %v7317_v34 = vld [vmem:[#allocation9_spill] sm:$0xff] }
 0x501   :  { %1859 = vst [vmem:[#allocation1 + $0x6] ss:$9 sm:$0xff] %v1785_v9  ;;  %v5604_v9 = vpop.permute.xlu0 %414 }
 0x502   :  { %1860 = vst [vmem:[#allocation1 + $0x7] ss:$9 sm:$0xff] %v1786_v8 }
 0x503   :  { %7315 = vst [vmem:[#allocation41_spill] sm:$0xff] %v5604_v9 }
 0x509   :  { %v1861_v29 = vld [vmem:[#allocation1] sm:$0xff] }
 0x50a   :  { %1862 = vst [vmem:[#allocation1] ss:$9 sm:$0xff] %v1787_v2  ;;  %1908 = vperm.xlu2 %4383, %v1861_v29  }
 0x50b   :  { %1863 = vst [vmem:[#allocation1 + $0x1] ss:$9 sm:$0xff] %v1788_v19 }
 0x50c   :  { %1864 = vst [vmem:[#allocation1 + $0x2] ss:$9 sm:$0xff] %v1789_v5 }
 0x50d   :  { %1865 = vst [vmem:[#allocation1 + $0x3] ss:$9 sm:$0xff] %v1790_v1 }
 0x50e   :  { %1866 = vst [vmem:[#allocation1 + $0x4] ss:$9 sm:$0xff] %v1791_v33 }
 0x50f   :  { %1867 = vst [vmem:[#allocation1 + $0x5] ss:$9 sm:$0xff] %v1792_v39  ;;  %v5606_v39 = vpop.permute.xlu1 %412 }
 0x510   :  { %1868 = vst [vmem:[#allocation1 + $0x6] ss:$9 sm:$0xff] %v1793_v52 }
 0x511   :  { %1869 = vst [vmem:[#allocation1 + $0x7] ss:$9 sm:$0xff] %v1794_v13 }
 0x512   :  { %7316 = vst [vmem:[#allocation42_spill] sm:$0xff] %v5606_v39 }
 0x518   :  { %v1870_v51 = vld [vmem:[#allocation1] sm:$0xff] }
 0x519   :  { %1871 = vst [vmem:[#allocation1] ss:$9 sm:$0xff] %v1795_v63  ;;  %1911 = vperm.xlu0 %4384, %v1870_v51   ;;  %v1570_v63 = vpop.xlane.xlu1 %1569 }
 0x51a   :  { %1872 = vst [vmem:[#allocation1 + $0x1] ss:$9 sm:$0xff] %v1796_v61  ;;  %v1811_v61 = vperm.slane %v1570_v63, 0  ;;  %v1812_v51 = vperm.slane %v1570_v63, 1 }
 0x51b   :  { %1873 = vst [vmem:[#allocation1 + $0x2] ss:$9 sm:$0xff] %v1797_v35 }
 0x51c   :  { %1874 = vst [vmem:[#allocation1 + $0x3] ss:$9 sm:$0xff] %v1798_v18  ;;  %v1813_v18 = vperm.slane %v1570_v63, 2 }
 0x51d   :  { %1875 = vst [vmem:[#allocation1 + $0x4] ss:$9 sm:$0xff] %v1799_v27  ;;  %v1814_v27 = vperm.slane %v1570_v63, 3 }
 0x51e   :  { %1876 = vst [vmem:[#allocation1 + $0x5] ss:$9 sm:$0xff] %v1800_v62  ;;  %v1815_v62 = vperm.slane %v1570_v63, 4 }
 0x51f   :  { %1877 = vst [vmem:[#allocation1 + $0x6] ss:$9 sm:$0xff] %v1801_v41  ;;  %v1816_v41 = vperm.slane %v1570_v63, 5 }
 0x520   :  { %1878 = vst [vmem:[#allocation1 + $0x7] ss:$9 sm:$0xff] %v1802_v25  ;;  %v1817_v25 = vperm.slane %v1570_v63, 6 }
 0x527   :  { %v1879_v8 = vld [vmem:[#allocation1] sm:$0xff]  ;;  %v1568_v14 = vpop.xlane.xlu0 %1567 }
 0x528   :  { %1914 = vperm.xlu2 %4383, %v1879_v8   ;;  %v1803_v2 = vperm.slane %v1568_v14, 0  ;;  %v1804_v19 = vperm.slane %v1568_v14, 1  ;;  %v1805_v29 = vperm.slane %v1568_v14, 2  ;;  %v1806_v5 = vperm.slane %v1568_v14, 3 }
 0x529   :  { %v1807_v1 = vperm.slane %v1568_v14, 4  ;;  %v1808_v33 = vperm.slane %v1568_v14, 5  ;;  %v1809_v52 = vperm.slane %v1568_v14, 6  ;;  %v1810_v13 = vperm.slane %v1568_v14, 7 }
 0x52a   :  { %1880 = vst [vmem:[#allocation1] ss:$9 sm:$0xff] %v1803_v2  ;;  %v1818_v8 = vperm.slane %v1570_v63, 7  ;;  %v7318_v2 = vld [vmem:[#allocation10_spill] sm:$0xff] }
 0x52b   :  { %1881 = vst [vmem:[#allocation1 + $0x1] ss:$9 sm:$0xff] %v1804_v19 }
 0x52c   :  { %1882 = vst [vmem:[#allocation1 + $0x2] ss:$9 sm:$0xff] %v1805_v29  ;;  %v5611_v29 = vpop.permute.xlu2 %416 }
 0x52d   :  { %1883 = vst [vmem:[#allocation1 + $0x3] ss:$9 sm:$0xff] %v1806_v5 }
 0x52e   :  { %1884 = vst [vmem:[#allocation1 + $0x4] ss:$9 sm:$0xff] %v1807_v1 }
 0x52f   :  { %1885 = vst [vmem:[#allocation1 + $0x5] ss:$9 sm:$0xff] %v1808_v33  ;;  %v1903_v33 = vpop.permute.xlu1 %1902 }
 0x530   :  { %1886 = vst [vmem:[#allocation1 + $0x6] ss:$9 sm:$0xff] %v1809_v52  ;;  %4387 = vset.pattern.permute.xlu2 %v7317_v34 }
 0x531   :  { %1887 = vst [vmem:[#allocation1 + $0x7] ss:$9 sm:$0xff] %v1810_v13  ;;  %v5614_v13 = vadd.s32 4294967288, %v4760_v24 }
 0x532   :  { %7319 = vst [vmem:[#allocation43_spill] sm:$0xff] %v5611_v29 }
 0x533   :  { %7320 = vst [vmem:[#allocation44_spill] sm:$0xff] %v5614_v13 }
 0x538   :  { %v1888_v35 = vld [vmem:[#allocation1] sm:$0xff] }
 0x539   :  { %1889 = vst [vmem:[#allocation1] ss:$9 sm:$0xff] %v1811_v61  ;;  %1917 = vperm.xlu1 %4382, %v1888_v35  }
 0x53a   :  { %1890 = vst [vmem:[#allocation1 + $0x1] ss:$9 sm:$0xff] %v1812_v51  ;;  %v1900_v19 = vpop.permute.xlu0 %1899 }
 0x53b   :  { %1891 = vst [vmem:[#allocation1 + $0x2] ss:$9 sm:$0xff] %v1813_v18  ;;  %v1922_v35 = vperm.slane %v1900_v19, %v4760_v24 }
 0x53c   :  { %1892 = vst [vmem:[#allocation1 + $0x3] ss:$9 sm:$0xff] %v1814_v27 }
 0x53d   :  { %1893 = vst [vmem:[#allocation1 + $0x4] ss:$9 sm:$0xff] %v1815_v62 }
 0x53e   :  { %1894 = vst [vmem:[#allocation1 + $0x5] ss:$9 sm:$0xff] %v1816_v41  ;;  %v1924_v41 = vperm.slane %v1903_v33, %v5614_v13  ;;  %v7211_v33 = vperm.slane %v5540_v46, 0 }
 0x53f   :  { %1895 = vst [vmem:[#allocation1 + $0x6] ss:$9 sm:$0xff] %v1817_v25 }
 0x540   :  { %1896 = vst [vmem:[#allocation1 + $0x7] ss:$9 sm:$0xff] %v1818_v8 }
 0x541   :  { %4385 = vset.pattern.permute.xlu1 %v7317_v34 }
 0x547   :  { %v1897_v14 = vld [vmem:[#allocation1] sm:$0xff] }
 0x548   :  { %1920 = vperm.xlu0 %4384, %v1897_v14  }
 0x550   :  { %4386 = vset.pattern.permute.xlu0 %v7318_v2 }
 0x564   :  { %v1909_v1 = vpop.permute.xlu2 %1908 }
 0x565   :  { %v1928_v18 = vperm.slane %v1909_v1, %v5614_v13  ;;  %v7212_v1 = vperm.slane %v5525_v20, 0 }
 0x56d   :  { %v1906_v5 = vpop.permute.xlu0 %1905 }
 0x56e   :  { %v1927_v63 = vperm.slane %v1906_v5, %v4760_v24  ;;  %v1926_v5 = vsel %vm7257_vm6, %v1924_v41, %v1922_v35 }
 0x570   :  { %v1929_v25 = vsel %vm7257_vm6, %v1928_v18, %v1927_v63  ;;  %v7209_v63 = vperm.slane %v5527_v54, 0 }
 0x571   :  { %v1936_v19 = vsel %vm7261_vm3, %v1929_v25, %v1926_v5 }
 0x582   :  { %v1915_v61 = vpop.permute.xlu2 %1914 }
 0x583   :  { %v1931_v27 = vperm.slane %v1915_v61, %v5614_v13 }
 0x58b   :  { %v1912_v52 = vpop.permute.xlu0 %1911 }
 0x58c   :  { %v1930_v51 = vperm.slane %v1912_v52, %v4760_v24 }
 0x58e   :  { %v1932_v8 = vsel %vm7257_vm6, %v1931_v27, %v1930_v51  ;;  %v7210_v51 = vperm.slane %v5597_v50, 0 }
 0x58f   :  { %v1937_v61 = vsel %vm7321_vm4, %v1932_v8, %v1936_v19 }
 0x5ab   :  { %v1918_v62 = vpop.permute.xlu1 %1917 }
 0x5ac   :  { %v1933_v30 = vperm.slane %v1918_v62, %v4760_v24 }
 0x5ba   :  { %v1921_v14 = vpop.permute.xlu0 %1920 }
 0x5bb   :  { %v1934_v52 = vperm.slane %v1921_v14, %v5614_v13  ;;  %v4499_v14 = vld [vmem:[%s7165_s8] ss:$0 sm:$0xff]  ;;  %s4599_s8 = smov [#allocation2]  }
 0x5bc   :  { %s7143_s19 = sshll.u32 %s4599_s8, 4  ;;  %s4228_s19 = int_to_ptr.vmem [resolvable:$true] %s7143_s19 }
 0x5bd   :  { %v1935_v3 = vsel %vm7257_vm6, %v1934_v52, %v1933_v30  ;;  %vm7338_vm6 = vmmov %vm7321_vm4 }
 0x5be   :  { %v1938_v35 = vsel %vm7322_vm9, %v1935_v3, %v1937_v61  ;;  %vm7335_vm9 = vmmov %vm7321_vm4 }
 0x5bf   :  { %v1939_v18 = vrot.slane %v1938_v35, 1  ;;  %v1940_v27 = vrot.slane %v1938_v35, 2  ;;  %v1941_v62 = vrot.slane %v1938_v35, 3  ;;  %v1946_v41 = vmul.f32 %v1938_v35, %v7212_v1 }
 0x5c1   :  { %v1947_v25 = vmul.f32 %v1939_v18, %v7211_v33  ;;  %v1948_v30 = vmul.f32 %v1940_v27, %v7210_v51  ;;  %v1949_v8 = vmul.f32 %v1941_v62, %v7209_v63  ;;  %1954 = vst [vmem:[#allocation1] ss:$9 sm:$0xff] %v1946_v41  ;;  %v7324_v18 = vmov 0   ;;  %v2016_v27 = vpop.f32.mrf.mxu1  ;;  %v2074_v41 = vpop.f32.mrf.mxu3 }
 0x5c2   :  { %v2082_v63 = vmax.f32 %v2016_v27, 0.0  ;;  %v2086_v43 = vmax.f32 %v2074_v41, 0.0 }
 0x5c3   :  { %1956 = vst [vmem:[#allocation1 + $0x1] ss:$9 sm:$0xff] %v1947_v25  ;;  %v2045_v25 = vpop.f32.mrf.mxu2 }
 0x5c4   :  { %1958 = vst [vmem:[#allocation1 + $0x2] ss:$9 sm:$0xff] %v1948_v30  ;;  %v2084_v56 = vmax.f32 %v2045_v25, 0.0 }
 0x5c5   :  { %1960 = vst [vmem:[#allocation1 + $0x3] ss:$9 sm:$0xff] %v1949_v8  ;;  %v5660_v8 = vpop.f32.mrf.mxu0 }
 0x5c6   :  { %v2080_v10 = vmax.f32 %v5660_v8, 0.0 }
 0x5c9   :  { %v2019_v62 = vpop.f32.mrf.mxu1 }
 0x5cc   :  { %v1961_v3 = vld [vmem:[#allocation1] sm:$0xff] }
 0x5cd   :  { %v5646_v5 = vsub.f32 %v4499_v14, %v1961_v3  ;;  %v2077_v3 = vpop.f32.mrf.mxu3  ;;  %v2048_v14 = vpop.f32.mrf.mxu2 }
 0x5ce   :  { %v1990_v33 = vpop.f32.mrf.mxu0 }
 0x5cf   :  { %7323 = vst [vmem:[#allocation45_spill] sm:$0xff] %v5646_v5  ;;  %v2114_v52 = vperm.slane %v5646_v5, 2  ;;  %v2101_v19 = vperm.slane %v5646_v5, 1  ;;  %v2088_v61 = vperm.slane %v5646_v5, 0  ;;  %v2127_v35 = vperm.slane %v5646_v5, 3 }
 0x5d0   :  { %v2081_v4 = vmax.f32 %v1990_v33, 0.0 }
 0x5d1   :  { %2119 = vperm.xlu2 %4387, %v2114_v52   ;;  %2112 = vperm.xlu0 %4386, %v2101_v19   ;;  %v5658_v30 = vpop.f32.mrf.mxu1 }
 0x5d2   :  { %2106 = vperm.xlu1 %4385, %v2101_v19  }
 0x5d5   :  { %v5676_v50 = vpop.f32.mrf.mxu3  ;;  %v5682_v46 = vpop.f32.mrf.mxu2 }
 0x5d6   :  { %v5688_v16 = vpop.f32.mrf.mxu0 }
 0x5d7   :  { %7326 = vst [vmem:[#allocation47_spill] sm:$0xff] %v5688_v16 }
 0x5d9   :  { %4389 = vset.pattern.permute.xlu0 %v7317_v34  ;;  %2093 = vperm.xlu2 %4387, %v2088_v61   ;;  %v5662_v19 = vpop.f32.mrf.mxu1 }
 0x5da   :  { %4388 = vset.pattern.permute.xlu1 %v7318_v2 }
 0x5dd   :  { %v5690_v7 = vpop.f32.mrf.mxu3 }
 0x5de   :  { %v5730_v9 = vpop.f32.mrf.mxu0 }
 0x5df   :  { %7332 = vst [vmem:[#allocation52_spill] sm:$0xff] %v5730_v9  ;;  %v7234_v37 = vmax.f32 %v5730_v9, 0.0 }
 0x5e1   :  { %2132 = vperm.xlu0 %4389, %v2127_v35   ;;  %4390 = vset.pattern.permute.xlu2 %v7318_v2 }
 0x5e2   :  { %2125 = vperm.xlu1 %4388, %v2114_v52  }
 0x5e9   :  { %2138 = vperm.xlu2 %4390, %v2127_v35   ;;  %4391 = vset.pattern.permute.xlu0 %v7324_v18  ;;  %v2083_v35 = vmax.f32 %v2019_v62, 0.0 }
 0x5ea   :  { %2099 = vperm.xlu1 %4388, %v2088_v61   ;;  %v7222_v61 = vmax.f32 %v5662_v19, 0.0 }
 0x5f1   :  { %4392 = vset.pattern.permute.xlu2 %v7324_v18 }
 0x5f2   :  { %4393 = vset.pattern.permute.xlu1 %v7324_v18  ;;  %v7224_v18 = vmax.f32 %v5658_v30, 0.0 }
 0x62b   :  { %v5664_v52 = vpop.permute.xlu2 %2119 }
 0x643   :  { %v5668_v51 = vpop.permute.xlu0 %2112 }
 0x644   :  { %v2143_v1 = vmul.f32 %v5668_v51, %v2083_v35  ;;  %v2652_v5 = vmul.f32 %v7222_v61, %v5668_v51  ;;  %v5674_v54 = vpop.permute.xlu1 %2106  ;;  %v5686_v35 = vpop.permute.xlu2 %2093 }
 0x645   :  { %v2142_v62 = vmul.f32 %v5674_v54, %v2082_v63  ;;  %v2651_v27 = vmul.f32 %v7224_v18, %v5674_v54  ;;  %v5692_v63 = vpop.f32.mrf.mxu2 }
 0x646   :  { %7327 = vst [vmem:[#allocation48_spill] sm:$0xff] %v5692_v63 }
 0x647   :  { %v5684_v20 = vadd.f32 %v2143_v1, %v2142_v62  ;;  %v2664_v13 = vadd.f32 %v2652_v5, %v2651_v27  ;;  %v2087_v1 = vmax.f32 %v2077_v3, 0.0  ;;  %v7227_v5 = vmax.f32 %v5676_v50, 0.0 }
 0x648   :  { %v7226_v62 = vmax.f32 %v5690_v7, 0.0  ;;  %v2085_v27 = vmax.f32 %v2048_v14, 0.0 }
 0x649   :  { %7325 = vst [vmem:[#allocation46_spill] sm:$0xff] %v5684_v20  ;;  %v2665_v2 = vrot.slane %v2664_v13, 4  ;;  %v2144_v20 = vmul.f32 %v5664_v52, %v2084_v56  ;;  %v7329_v56 = vmax.f32 %v5682_v46, 0.0 }
 0x64b   :  { %v2666_v34 = vadd.f32 %v2665_v2, %v2664_v13  ;;  %v7229_v13 = vmax.f32 %v5692_v63, 0.0 }
 0x64c   :  { %v5694_v39 = vpop.permute.xlu2 %2138 }
 0x64d   :  { %v2667_v61 = vrot.slane %v2666_v34, 2  ;;  %v2147_v41 = vmul.f32 %v5694_v39, %v2087_v1  ;;  %v2656_v25 = vmul.f32 %v7226_v62, %v5694_v39 }
 0x64f   :  { %v2668_v29 = vadd.f32 %v2667_v61, %v2666_v34 }
 0x651   :  { %v2669_v18 = vrot.slane %v2668_v29, 1 }
 0x653   :  { %v5701_v34 = vadd.f32 %v2669_v18, %v2668_v29  ;;  %v5703_v61 = vpop.permute.xlu0 %2132  ;;  %v2653_v29 = vmul.f32 %v7329_v56, %v5664_v52 }
 0x654   :  { %v2146_v3 = vmul.f32 %v5703_v61, %v2086_v43  ;;  %v2655_v14 = vmul.f32 %v7227_v5, %v5703_v61  ;;  %v5713_v2 = vpop.permute.xlu1 %2125 }
 0x655   :  { %7328 = vst [vmem:[#allocation49_spill] sm:$0xff] %v5713_v2  ;;  %v2145_v18 = vmul.f32 %v5713_v2, %v2085_v27  ;;  %v2654_v1 = vmul.f32 %v7229_v13, %v5713_v2  ;;  %2731 = vrot.lane.b32.xlu1 %v5701_v34, %s4591_s21  ;;  %2699 = vrot.lane.b32.xlu2 %v5701_v34, %s4590_s20  ;;  %v7233_v13 = vmax.f32 %v5688_v16, 0.0 }
 0x656   :  { %v5726_v43 = vadd.f32 %v2147_v41, %v2146_v3  ;;  %v2678_v62 = vadd.f32 %v2656_v25, %v2655_v14  ;;  %v2140_v41 = vmul.f32 %v5686_v35, %v2080_v10 }
 0x657   :  { %v5728_v5 = vadd.f32 %v2145_v18, %v2144_v20  ;;  %v2671_v31 = vadd.f32 %v2654_v1, %v2653_v29  ;;  %v2649_v20 = vmul.f32 %v7233_v13, %v5686_v35 }
 0x658   :  { %7330 = vst [vmem:[#allocation50_spill] sm:$0xff] %v5726_v43  ;;  %v2679_v56 = vrot.slane %v2678_v62, 4 }
 0x659   :  { %7331 = vst [vmem:[#allocation51_spill] sm:$0xff] %v5728_v5  ;;  %v2672_v27 = vrot.slane %v2671_v31, 4 }
 0x65a   :  { %v2680_v55 = vadd.f32 %v2679_v56, %v2678_v62 }
 0x65b   :  { %v2673_v47 = vadd.f32 %v2672_v27, %v2671_v31 }
 0x65c   :  { %v5736_v3 = vpop.permute.xlu1 %2099  ;;  %v2681_v8 = vrot.slane %v2680_v55, 2 }
 0x65d   :  { %7333 = vst [vmem:[#allocation53_spill] sm:$0xff] %v5736_v3  ;;  %v2674_v25 = vrot.slane %v2673_v47, 2  ;;  %v2141_v14 = vmul.f32 %v5736_v3, %v2081_v4  ;;  %v2650_v33 = vmul.f32 %v7234_v37, %v5736_v3  ;;  %2715 = vrot.lane.b32.xlu2 %v5701_v34, %s4592_s22 }
 0x65e   :  { %v2682_v1 = vadd.f32 %v2681_v8, %v2680_v55 }
 0x65f   :  { %v2675_v31 = vadd.f32 %v2674_v25, %v2673_v47  ;;  %v5747_v62 = vadd.f32 %v2141_v14, %v2140_v41  ;;  %v2657_v10 = vadd.f32 %v2650_v33, %v2649_v20  ;;  %v2745_v20 = vrot.slane %v5701_v34, 7 }
 0x660   :  { %v2683_v4 = vrot.slane %v2682_v1, 1 }
 0x661   :  { %7334 = vst [vmem:[#allocation54_spill] sm:$0xff] %v5747_v62  ;;  %v2676_v29 = vrot.slane %v2675_v31, 1  ;;  %v2658_v18 = vrot.slane %v2657_v10, 4 }
 0x662   :  { %v5753_v47 = vadd.f32 %v2683_v4, %v2682_v1 }
 0x663   :  { %v2677_v56 = vadd.f32 %v2676_v29, %v2675_v31  ;;  %v2659_v27 = vadd.f32 %v2658_v18, %v2657_v10 }
 0x665   :  { %v2660_v13 = vrot.slane %v2659_v27, 2  ;;  %2701 = vrot.lane.b32.xlu0 %v2677_v56, %s4590_s20  ;;  %2733 = vrot.lane.b32.xlu1 %v2677_v56, %s4591_s21  ;;  %v2747_v25 = vrot.slane %v2677_v56, 6 }
 0x666   :  { %2739 = vrot.lane.b32.xlu2 %v5701_v34, %s4593_s6 }
 0x667   :  { %v2661_v37 = vadd.f32 %v2660_v13, %v2659_v27 }
 0x669   :  { %v2662_v43 = vrot.slane %v2661_v37, 1 }
 0x66b   :  { %v2663_v41 = vadd.f32 %v2662_v43, %v2661_v37 }
 0x66d   :  { %2729 = vrot.lane.b32.xlu1 %v2663_v41, %s4591_s21  ;;  %2735 = vrot.lane.b32.xlu0 %v5753_v47, %s4591_s21  ;;  %v2746_v55 = vsel %vm7261_vm3, %v2745_v20, %v2663_v41 }
 0x66e   :  { %2707 = vrot.lane.b32.xlu2 %v5701_v34, %s4594_s23  ;;  %v5763_v14 = vsel %vm7335_vm9, %v2747_v25, %v2746_v55  ;;  %vm7336_vm9 = vmmov %vm7321_vm4 }
 0x675   :  { %2697 = vrot.lane.b32.xlu1 %v2663_v41, %s4590_s20  ;;  %2703 = vrot.lane.b32.xlu0 %v5753_v47, %s4590_s20 }
 0x676   :  { %2709 = vrot.lane.b32.xlu2 %v2677_v56, %s4594_s23 }
 0x67d   :  { %2717 = vrot.lane.b32.xlu1 %v2677_v56, %s4592_s22  ;;  %2741 = vrot.lane.b32.xlu0 %v2677_v56, %s4593_s6 }
 0x67e   :  { %2723 = vrot.lane.b32.xlu2 %v5701_v34, %s4589_s1 }
 0x685   :  { %2713 = vrot.lane.b32.xlu1 %v2663_v41, %s4592_s22  ;;  %2719 = vrot.lane.b32.xlu0 %v5753_v47, %s4592_s22 }
 0x686   :  { %2691 = vrot.lane.b32.xlu2 %v5701_v34, %s4595_s24 }
 0x68d   :  { %2737 = vrot.lane.b32.xlu1 %v2663_v41, %s4593_s6  ;;  %2743 = vrot.lane.b32.xlu0 %v5753_v47, %s4593_s6 }
 0x68e   :  { %2725 = vrot.lane.b32.xlu2 %v2677_v56, %s4589_s1 }
 0x695   :  { %2705 = vrot.lane.b32.xlu1 %v2663_v41, %s4594_s23  ;;  %2711 = vrot.lane.b32.xlu0 %v5753_v47, %s4594_s23 }
 0x696   :  { %2727 = vrot.lane.b32.xlu2 %v5753_v47, %s4589_s1 }
 0x69d   :  { %2693 = vrot.lane.b32.xlu1 %v2677_v56, %s4595_s24  ;;  %2721 = vrot.lane.b32.xlu0 %v2663_v41, %s4589_s1 }
 0x6a5   :  { %2689 = vrot.lane.b32.xlu1 %v2663_v41, %s4595_s24  ;;  %2695 = vrot.lane.b32.xlu0 %v5753_v47, %s4595_s24 }
 0x6af   :  { %v2700_v37 = vpop.permute.xlu2 %2699 }
 0x6b0   :  { %v2757_v0 = vrot.slane %v2700_v37, 7 }
 0x6b7   :  { %v2716_v13 = vpop.permute.xlu2 %2715 }
 0x6b8   :  { %v2769_v60 = vrot.slane %v2716_v13, 7 }
 0x6c0   :  { %v2740_v43 = vpop.permute.xlu2 %2739 }
 0x6c1   :  { %v2787_v40 = vrot.slane %v2740_v43, 7 }
 0x6c7   :  { %v2732_v34 = vpop.permute.xlu1 %2731 }
 0x6c8   :  { %v2708_v31 = vpop.permute.xlu2 %2707  ;;  %v2781_v48 = vrot.slane %v2732_v34, 7 }
 0x6d0   :  { %v2710_v18 = vpop.permute.xlu2 %2709 }
 0x6d7   :  { %v2702_v33 = vpop.permute.xlu0 %2701  ;;  %v2734_v8 = vpop.permute.xlu1 %2733 }
 0x6d8   :  { %v2724_v56 = vpop.permute.xlu2 %2723  ;;  %v2783_v42 = vrot.slane %v2734_v8, 6  ;;  %v2759_v16 = vrot.slane %v2702_v33, 6 }
 0x6df   :  { %v2730_v10 = vpop.permute.xlu1 %2729  ;;  %v2736_v29 = vpop.permute.xlu0 %2735 }
 0x6e0   :  { %v5792_v55 = vpop.permute.xlu2 %2691  ;;  %v2782_v58 = vsel %vm7261_vm3, %v2781_v48, %v2730_v10  ;;  %v2785_v49 = vrot.slane %v2736_v29, 5 }
 0x6e1   :  { %v2784_v17 = vsel %vm7321_vm4, %v2783_v42, %v2782_v58  ;;  %vm7340_vm4 = vmmov %vm7337_vm13 }
 0x6e2   :  { %v2786_v37 = vsel %vm7337_vm13, %v2785_v49, %v2784_v17  ;;  %vm7341_vm8 = vmmov %vm7340_vm4 }
 0x6e3   :  { %v2813_v10 = vrot.slane %v2786_v37, 4  ;;  %vm7342_vm7 = vmmov %vm7340_vm4 }
 0x6e4   :  { %vm7345_vm13 = vmmov %vm7340_vm4 }
 0x6e7   :  { %v2698_v1 = vpop.permute.xlu1 %2697  ;;  %v2704_v27 = vpop.permute.xlu0 %2703 }
 0x6e8   :  { %v2726_v59 = vpop.permute.xlu2 %2725  ;;  %v2758_v63 = vsel %vm7261_vm3, %v2757_v0, %v2698_v1  ;;  %v2761_v43 = vrot.slane %v2704_v27, 5  ;;  %v2763_v0 = vrot.slane %v2708_v31, 7  ;;  %v2775_v1 = vrot.slane %v2724_v56, 7 }
 0x6e9   :  { %v2777_v33 = vrot.slane %v2726_v59, 6  ;;  %v2749_v56 = vrot.slane %v5753_v47, 5 }
 0x6ef   :  { %v2718_v4 = vpop.permute.xlu1 %2717  ;;  %v2742_v20 = vpop.permute.xlu0 %2741 }
 0x6f0   :  { %v2771_v21 = vrot.slane %v2718_v4, 6  ;;  %v2789_v13 = vrot.slane %v2742_v20, 6  ;;  %v2728_v29 = vpop.permute.xlu2 %2727 }
 0x6f1   :  { %v2779_v49 = vrot.slane %v2728_v29, 5 }
 0x6f7   :  { %v2714_v25 = vpop.permute.xlu1 %2713  ;;  %v2720_v41 = vpop.permute.xlu0 %2719 }
 0x6f8   :  { %v2770_v45 = vsel %vm7261_vm3, %v2769_v60, %v2714_v25  ;;  %v2773_v2 = vrot.slane %v2720_v41, 5  ;;  %v2760_v60 = vsel %vm7338_vm6, %v2759_v16, %v2758_v63  ;;  %vm7346_vm6 = vmmov %vm7340_vm4 }
 0x6f9   :  { %v2772_v48 = vsel %vm7336_vm9, %v2771_v21, %v2770_v45  ;;  %vm7347_vm9 = vmmov %vm7339_vm0 }
 0x6fa   :  { %v2774_v58 = vsel %vm7340_vm4, %v2773_v2, %v2772_v48 }
 0x6fb   :  { %v2814_v21 = vsel %vm508_vm10, %v2813_v10, %v2774_v58 }
 0x6fc   :  { %v2818_v4 = vperm.slane %v2814_v21, %v5005_v53 }
 0x6fe   :  { %v2839_v48 = vrot.slane %v2818_v4, 4 }
 0x6ff   :  { %v2738_v62 = vpop.permute.xlu1 %2737  ;;  %v2744_v5 = vpop.permute.xlu0 %2743 }
 0x700   :  { %v2788_v34 = vsel %vm7261_vm3, %v2787_v40, %v2738_v62  ;;  %v2791_v8 = vrot.slane %v2744_v5, 5  ;;  %v2762_v40 = vsel %vm7341_vm8, %v2761_v43, %v2760_v60  ;;  %v2765_v5 = vrot.slane %v2710_v18, 6  ;;  %vm7344_vm8 = vmmov %vm7339_vm0 }
 0x701   :  { %v2790_v42 = vsel %vm7339_vm0, %v2789_v13, %v2788_v34  ;;  %v2801_v2 = vrot.slane %v2762_v40, 4  ;;  %v2751_v13 = vrot.slane %v5792_v55, 7 }
 0x702   :  { %v2792_v62 = vsel %vm7342_vm7, %v2791_v8, %v2790_v42  ;;  %vm7343_vm7 = vmmov %vm7340_vm4 }
 0x703   :  { %v2819_v27 = vrot.slane %v2792_v62, 4 }
 0x707   :  { %v2706_v9 = vpop.permute.xlu1 %2705  ;;  %v2712_v3 = vpop.permute.xlu0 %2711 }
 0x708   :  { %v2764_v16 = vsel %vm7261_vm3, %v2763_v0, %v2706_v9  ;;  %v2767_v20 = vrot.slane %v2712_v3, 5  ;;  %v2750_v9 = vsel %vm7345_vm13, %v2749_v56, %v5763_v14 }
 0x709   :  { %v2766_v25 = vsel %vm7344_vm8, %v2765_v5, %v2764_v16  ;;  %v2802_v34 = vsel %vm508_vm10, %v2801_v2, %v2750_v9 }
 0x70a   :  { %v2768_v47 = vsel %vm7346_vm6, %v2767_v20, %v2766_v25  ;;  %v2806_v8 = vperm.slane %v2802_v34, %v5005_v53 }
 0x70b   :  { %v2807_v14 = vrot.slane %v2768_v47, 4 }
 0x70c   :  { %v2827_v62 = vrot.slane %v2806_v8, 4 }
 0x70f   :  { %v2694_v17 = vpop.permute.xlu1 %2693  ;;  %v2722_v45 = vpop.permute.xlu0 %2721 }
 0x710   :  { %v2776_v63 = vsel %vm7261_vm3, %v2775_v1, %v2722_v45  ;;  %v2753_v37 = vrot.slane %v2694_v17, 6 }
 0x711   :  { %v2778_v31 = vsel %vm7339_vm0, %v2777_v33, %v2776_v63  ;;  %vm7348_vm0 = vcmp.lt.s32.totalorder %v4760_v24, %v4937_v38 }
 0x712   :  { %v2780_v59 = vsel %vm7343_vm7, %v2779_v49, %v2778_v31 }
 0x713   :  { %v2820_v41 = vsel %vm508_vm10, %v2819_v27, %v2780_v59 }
 0x714   :  { %v2824_v18 = vperm.slane %v2820_v41, %v5005_v53 }
 0x716   :  { %v2840_v58 = vsel %vm508_vm10, %v2824_v18, %v2839_v48  ;;  %v2837_v1 = vrot.slane %v2824_v18, 4 }
 0x717   :  { %v2690_v3 = vpop.permute.xlu1 %2689  ;;  %v2696_v43 = vpop.permute.xlu0 %2695  ;;  %v2848_v0 = vperm.slane %v2840_v58, %v5027_v11 }
 0x718   :  { %v2752_v60 = vsel %vm7261_vm3, %v2751_v13, %v2690_v3  ;;  %v2755_v42 = vrot.slane %v2696_v43, 5  ;;  %v2838_v16 = vsel %vm508_vm10, %v2837_v1, %v2818_v4 }
 0x719   :  { %v2754_v10 = vsel %vm7347_vm9, %v2753_v37, %v2752_v60  ;;  %v2853_v45 = vrot.slane %v2848_v0, 4  ;;  %v2844_v20 = vperm.slane %v2838_v16, %v5027_v11 }
 0x71a   :  { %v2756_v29 = vsel %vm7340_vm4, %v2755_v42, %v2754_v10 }
 0x71b   :  { %v2808_v55 = vsel %vm508_vm10, %v2807_v14, %v2756_v29  ;;  %v2849_v34 = vrot.slane %v2844_v20, 4 }
 0x71c   :  { %v2812_v40 = vperm.slane %v2808_v55, %v5005_v53 }
 0x71e   :  { %v2825_v33 = vrot.slane %v2812_v40, 4  ;;  %v2828_v21 = vsel %vm508_vm10, %v2812_v40, %v2827_v62 }
 0x71f   :  { %v2836_v17 = vperm.slane %v2828_v21, %v5027_v11 }
 0x720   :  { %v2826_v49 = vsel %vm508_vm10, %v2825_v33, %v2806_v8 }
 0x721   :  { %v2854_v63 = vsel %vm508_vm10, %v2853_v45, %v2836_v17  ;;  %v2855_v5 = vrot.slane %v2836_v17, 4  ;;  %v2832_v2 = vperm.slane %v2826_v49, %v5027_v11 }
 0x722   :  { %v2859_v27 = vsel %vm7348_vm0, %v2854_v63, -1e+30 }
 0x723   :  { %v2867_v31 = vsel %vm104_vm1, %v2859_v27, -inf  ;;  %v2856_v56 = vsel %vm508_vm10, %v2848_v0, %v2855_v5  ;;  %v2851_v59 = vrot.slane %v2832_v2, 4  ;;  %v2850_v13 = vsel %vm508_vm10, %v2849_v34, %v2832_v2 }
 0x724   :  { %2868 = vmax.xlane.f32.xlu2 %v2867_v31  ;;  %v2860_v4 = vsel %vm1112_vm12, %v2856_v56, -1e+30  ;;  %v2857_v48 = vsel %vm1109_vm14, %v2850_v13, -1e+30 }
 0x725   :  { %v2870_v25 = vsel %vm104_vm1, %v2860_v4, -inf  ;;  %v2852_v41 = vsel %vm508_vm10, %v2844_v20, %v2851_v59  ;;  %v2861_v47 = vsel %vm104_vm1, %v2857_v48, -inf }
 0x726   :  { %2871 = vmax.xlane.f32.xlu1 %v2870_v25  ;;  %v2858_v9 = vsel %vm1110_vm5, %v2852_v41, -1e+30 }
 0x727   :  { %v2864_v18 = vsel %vm104_vm1, %v2858_v9, -inf }
 0x728   :  { %2865 = vmax.xlane.f32.xlu0 %v2864_v18 }
 0x73c   :  { %420 = vrot.lane.b32.xlu2 %v5377_v23, %s4592_s22 }
 0x73f   :  { %418 = vrot.lane.b32.xlu1 %v5389_v44, %s4592_s22 }
 0x765   :  { %2862 = vmax.xlane.f32.xlu2 %v2861_v47 }
 0x797   :  { %v2869_v37 = vpop.xlane.xlu2 %2868 }
 0x798   :  { %v2875_v3 = vsub.f32 %v2859_v27, %v2869_v37 }
 0x799   :  { %v2872_v43 = vpop.xlane.xlu1 %2871 }
 0x79a   :  { %v2881_v8 = vmul.f32 1.442695, %v2875_v3  ;;  %v2876_v60 = vsub.f32 %v2860_v4, %v2872_v43 }
 0x79b   :  { %v2866_v42 = vpop.xlane.xlu0 %2865 }
 0x79c   :  { %4425 = vpow2.f32 %v2881_v8  ;;  %v2883_v58 = vmul.f32 1.442695, %v2876_v60  ;;  %v2874_v14 = vsub.f32 %v2858_v9, %v2866_v42 }
 0x79e   :  { %4427 = vpow2.f32 %v2883_v58  ;;  %v2879_v10 = vmul.f32 1.442695, %v2874_v14 }
 0x79f   :  { %v5865_v33 = vpop.permute.xlu2 %420 }
 0x7a0   :  { %4429 = vpow2.f32 %v2879_v10 }
 0x7a2   :  { %v4426_v29 = vpop.eup %4425 }
 0x7a3   :  { %v2891_v55 = vsel %vm104_vm1, %v4426_v29, 0.0 }
 0x7a4   :  { %v4428_v0 = vpop.eup %4427  ;;  %2892 = vadd.xlane.f32.xlu1 %v2891_v55 }
 0x7a5   :  { %v2894_v1 = vsel %vm104_vm1, %v4428_v0, 0.0 }
 0x7a6   :  { %2895 = vadd.xlane.f32.xlu0 %v2894_v1  ;;  %v5861_v40 = vpop.eup %4429 }
 0x7a7   :  { %v2888_v62 = vsel %vm104_vm1, %v5861_v40, 0.0 }
 0x7ac   :  { %2889 = vadd.xlane.f32.xlu1 %v2888_v62 }
 0x7b1   :  { %v5871_v63 = vpop.permute.xlu1 %418 }
 0x7d8   :  { %v2863_v21 = vpop.xlane.xlu2 %2862 }
 0x7d9   :  { %v2873_v17 = vsub.f32 %v2857_v48, %v2863_v21 }
 0x7db   :  { %v2877_v45 = vmul.f32 1.442695, %v2873_v17 }
 0x7dd   :  { %4431 = vpow2.f32 %v2877_v45 }
 0x7e3   :  { %v5867_v49 = vpop.eup %4431 }
 0x7e4   :  { %v2885_v16 = vsel %vm104_vm1, %v5867_v49, 0.0 }
 0x7e5   :  { %2886 = vadd.xlane.f32.xlu0 %v2885_v16 }
 0x817   :  { %v2893_v5 = vpop.xlane.xlu1 %2892 }
 0x818   :  { %4433 = vrcp.f32 %v2893_v5  ;;  %v2936_v25 = vand.u32 2147483647, %v2893_v5  ;;  %v2938_v41 = vand.u32 2147483648, %v2893_v5  ;;  %vm2932_vm8 = vweird.f32 %v2893_v5 }
 0x819   :  { %v2896_v2 = vpop.xlane.xlu0 %2895 }
 0x81a   :  { %4435 = vrcp.f32 %v2896_v2  ;;  %v2953_v34 = vand.u32 2147483648, %v2896_v2  ;;  %v2951_v47 = vand.u32 2147483647, %v2896_v2  ;;  %vm2937_vm9 = vcmp.eq.f32.partialorder %v2936_v25, 8.507059e+37 }
 0x81b   :  { %v2939_v3 = vor.u32 1.1754944e-38, %v2938_v41  ;;  %vm2947_vm4 = vweird.f32 %v2896_v2 }
 0x81c   :  { %v2954_v58 = vor.u32 1.1754944e-38, %v2953_v34  ;;  %vm2952_vm3 = vcmp.eq.f32.partialorder %v2951_v47, 8.507059e+37 }
 0x81e   :  { %v4434_v27 = vpop.eup %4433 }
 0x81f   :  { %v2928_v31 = vmul.f32 %v4434_v27, %v2893_v5  ;;  %v2890_v56 = vpop.xlane.xlu1 %2889  ;;  %vm2933_vm7 = vweird.f32 %v4434_v27 }
 0x820   :  { %v4436_v20 = vpop.eup %4435  ;;  %4437 = vrcp.f32 %v2890_v56  ;;  %vm2934_vm6 = vmor %vm2932_vm8, %vm2933_vm7  ;;  %v2921_v62 = vand.u32 2147483647, %v2890_v56  ;;  %v2923_v21 = vand.u32 2147483648, %v2890_v56  ;;  %vm2917_vm7 = vweird.f32 %v2890_v56 }
 0x821   :  { %v2929_v59 = vsub.f32 1.0, %v2928_v31  ;;  %v2943_v4 = vmul.f32 %v4436_v20, %v2896_v2  ;;  %vm2948_vm13 = vweird.f32 %v4436_v20  ;;  %vm7349_vm8 = vcmp.lt.s32.totalorder %v4760_v24, %v4937_v38 }
 0x822   :  { %vm2949_vm0 = vmor %vm2947_vm4, %vm2948_vm13  ;;  %vm7352_vm4 = vcmask 785408  }
 0x823   :  { %v2930_v9 = vmul.f32 %v4434_v27, %v2929_v59  ;;  %v2944_v18 = vsub.f32 1.0, %v2943_v4 }
 0x825   :  { %v2931_v13 = vadd.f32 %v4434_v27, %v2930_v9  ;;  %v2945_v48 = vmul.f32 %v4436_v20, %v2944_v18 }
 0x826   :  { %v4438_v37 = vpop.eup %4437 }
 0x827   :  { %v2935_v43 = vsel %vm2934_vm6, %v4434_v27, %v2931_v13  ;;  %v2946_v8 = vadd.f32 %v4436_v20, %v2945_v48  ;;  %v2913_v60 = vmul.f32 %v4438_v37, %v2890_v56  ;;  %vm2918_vm2 = vweird.f32 %v4438_v37 }
 0x828   :  { %v2940_v42 = vsel %vm2937_vm9, %v2939_v3, %v2935_v43  ;;  %vm2919_vm13 = vmor %vm2917_vm7, %vm2918_vm2  ;;  %vm7351_vm9 = vcmask 654336  }
 0x829   :  { %v2941_v14 = vmul.f32 %v4426_v29, %v2940_v42  ;;  %v2950_v10 = vsel %vm2949_vm0, %v4436_v20, %v2946_v8  ;;  %v2914_v55 = vsub.f32 1.0, %v2913_v60  ;;  %v2924_v29 = vor.u32 1.1754944e-38, %v2923_v21 }
 0x82a   :  { %v2955_v1 = vsel %vm2952_vm3, %v2954_v58, %v2950_v10  ;;  %vm2922_vm3 = vcmp.eq.f32.partialorder %v2921_v62, 8.507059e+37  ;;  %vm7353_vm0 = vcmask 916480  }
 0x82b   :  { %v2915_v17 = vmul.f32 %v4438_v37, %v2914_v55  ;;  %v2959_v45 = vsub.f32 %v2941_v14, %v5109_v26  ;;  %v2956_v16 = vmul.f32 %v4428_v0, %v2955_v1 }
 0x82d   :  { %v2916_v5 = vadd.f32 %v4438_v37, %v2915_v17  ;;  %v2963_v2 = vsel %vm7349_vm8, %v2959_v45, 0.0  ;;  %v2960_v27 = vsub.f32 %v2956_v16, %v5145_v6  ;;  %vm3299_vm8 = vcmp.gt.f32.partialorder %v5676_v50, 0.0 }
 0x82e   :  { %v3046_v31 = vperm.slane %v2963_v2, %v5005_v53  ;;  %v3041_v8 = vrot.slane %v2963_v2, 4 }
 0x82f   :  { %v2920_v20 = vsel %vm2919_vm13, %v4438_v37, %v2916_v5  ;;  %v2964_v59 = vsel %vm1112_vm12, %v2960_v27, 0.0  ;;  %vm7355_vm13 = vmmov %vm7351_vm9 }
 0x830   :  { %v2925_v26 = vsel %vm2922_vm3, %v2924_v29, %v2920_v20  ;;  %v3051_v0 = vrot.slane %v3046_v31, 4  ;;  %v5883_v56 = vperm.slane %v3046_v31, %v5027_v11  ;;  %v3084_v38 = vperm.slane %v2964_v59, %v5005_v53  ;;  %vm7356_vm3 = vmmov %vm7352_vm4 }
 0x831   :  { %v2926_v4 = vmul.f32 %v5861_v40, %v2925_v26  ;;  %v3079_v9 = vrot.slane %v2964_v59, 4  ;;  %v3042_v14 = vsel %vm508_vm10, 0.0, %v3041_v8 }
 0x832   :  { %v3052_v6 = vsel %vm508_vm10, 0.0, %v3051_v0  ;;  %v3071_v25 = vrot.slane %v5883_v56, 4  ;;  %v5893_v22 = vperm.slane %v3084_v38, %v5027_v11  ;;  %v3089_v13 = vrot.slane %v3084_v38, 4 }
 0x833   :  { %v5890_v41 = vperm.slane %v3052_v6, %v5027_v11  ;;  %v2958_v18 = vsub.f32 %v2926_v4, %v5170_v57  ;;  %v3080_v57 = vsel %vm508_vm10, 0.0, %v3079_v9  ;;  %v5923_v55 = vperm.slane %v3042_v14, %v5005_v53 }
 0x834   :  { %v3072_v34 = vsel %vm508_vm10, 0.0, %v3071_v25  ;;  %v3109_v40 = vrot.slane %v5893_v22, 4  ;;  %v3090_v43 = vsel %vm508_vm10, 0.0, %v3089_v13  ;;  %v3088_v42 = vperm.slane %v3080_v57, %v5005_v53 }
 0x835   :  { %3141 = vrot.lane.b32.xlu1 %v5890_v41, %s4591_s21  ;;  %3125 = vrot.lane.b32.xlu0 %v3072_v34, %s4593_s6  ;;  %v2962_v48 = vsel %vm1110_vm5, %v2958_v18, 0.0  ;;  %v3098_v15 = vperm.slane %v3090_v43, %v5027_v11  ;;  %v3066_v62 = vperm.slane %v5923_v55, %v5027_v11 }
 0x836   :  { %v3008_v47 = vperm.slane %v2962_v48, %v5005_v53  ;;  %v3110_v37 = vsel %vm508_vm10, 0.0, %v3109_v40  ;;  %v5920_v10 = vperm.slane %v3088_v42, %v5027_v11  ;;  %v3099_v27 = vrot.slane %v3088_v42, 4 }
 0x837   :  { %3127 = vrot.lane.b32.xlu2 %v3110_v37, %s4593_s6  ;;  %v3111_v1 = vrot.slane %v3098_v15, 4  ;;  %v3075_v45 = vrot.slane %v3066_v62, 4  ;;  %v3003_v57 = vrot.slane %v2962_v48, 4 }
 0x838   :  { %v5909_v3 = vperm.slane %v3008_v47, %v5027_v11  ;;  %v3013_v17 = vrot.slane %v3008_v47, 4  ;;  %v3100_v29 = vsel %vm508_vm10, 0.0, %v3099_v27 }
 0x839   :  { %v3112_v21 = vsel %vm508_vm10, 0.0, %v3111_v1  ;;  %v3076_v2 = vsel %vm508_vm10, 0.0, %v3075_v45  ;;  %v5939_v31 = vperm.slane %v3100_v29, %v5027_v11 }
 0x83a   :  { %v3033_v60 = vrot.slane %v5909_v3, 4  ;;  %v3014_v16 = vsel %vm508_vm10, 0.0, %v3013_v17  ;;  %v3113_v17 = vrot.slane %v5920_v10, 4 }
 0x83b   :  { %v3022_v5 = vperm.slane %v3014_v16, %v5027_v11 }
 0x83c   :  { %v3034_v58 = vsel %vm508_vm10, 0.0, %v3033_v60  ;;  %v3114_v27 = vsel %vm508_vm10, 0.0, %v3113_v17 }
 0x83d   :  { %3123 = vrot.lane.b32.xlu1 %v3034_v58, %s4593_s6  ;;  %3143 = vrot.lane.b32.xlu0 %v3098_v15, %s4591_s21  ;;  %v3035_v59 = vrot.slane %v3022_v5, 4  ;;  %v3004_v15 = vsel %vm508_vm10, 0.0, %v3003_v57 }
 0x83f   :  { %3175 = vrot.lane.b32.xlu2 %v5920_v10, %s4592_s22  ;;  %v3036_v26 = vsel %vm508_vm10, 0.0, %v3035_v59 }
 0x845   :  { %3159 = vrot.lane.b32.xlu1 %v3112_v21, %s4589_s1  ;;  %3173 = vrot.lane.b32.xlu0 %v3066_v62, %s4592_s22 }
 0x84d   :  { %3189 = vrot.lane.b32.xlu1 %v3076_v2, %s4594_s23  ;;  %3139 = vrot.lane.b32.xlu0 %v3022_v5, %s4591_s21 }
 0x855   :  { %3207 = vrot.lane.b32.xlu1 %v5939_v31, %s4590_s20 }
 0x858   :  { %v2887_v20 = vpop.xlane.xlu0 %2886 }
 0x859   :  { %4439 = vrcp.f32 %v2887_v20  ;;  %v2908_v6 = vand.u32 2147483648, %v2887_v20  ;;  %v2906_v9 = vand.u32 2147483647, %v2887_v20  ;;  %vm2902_vm5 = vweird.f32 %v2887_v20 }
 0x85b   :  { %v2909_v34 = vor.u32 1.1754944e-38, %v2908_v6  ;;  %vm2907_vm6 = vcmp.eq.f32.partialorder %v2906_v9, 8.507059e+37 }
 0x85d   :  { %3155 = vrot.lane.b32.xlu1 %v3036_v26, %s4589_s1 }
 0x85f   :  { %v4440_v0 = vpop.eup %4439 }
 0x860   :  { %v2898_v38 = vmul.f32 %v4440_v0, %v2887_v20  ;;  %vm2903_vm12 = vweird.f32 %v4440_v0 }
 0x861   :  { %vm2904_vm2 = vmor %vm2902_vm5, %vm2903_vm12 }
 0x862   :  { %v2899_v4 = vsub.f32 1.0, %v2898_v38  ;;  %vm7357_vm12 = vmmov %vm7353_vm0 }
 0x864   :  { %v2900_v25 = vmul.f32 %v4440_v0, %v2899_v4  ;;  %v3073_v4 = vrot.slane %v5890_v41, 4 }
 0x866   :  { %v2901_v18 = vadd.f32 %v4440_v0, %v2900_v25  ;;  %v3074_v25 = vsel %vm508_vm10, 0.0, %v3073_v4 }
 0x868   :  { %v2905_v13 = vsel %vm2904_vm2, %v4440_v0, %v2901_v18  ;;  %v3061_v18 = vrot.slane %v5923_v55, 4  ;;  %vm3295_vm2 = vcmp.gt.f32.partialorder %v5658_v30, 0.0 }
 0x869   :  { %v2910_v40 = vsel %vm2907_vm6, %v2909_v34, %v2905_v13  ;;  %vm3300_vm6 = vcmp.gt.f32.partialorder %v5690_v7, 0.0 }
 0x86a   :  { %v2911_v47 = vmul.f32 %v5867_v49, %v2910_v40  ;;  %v3062_v34 = vsel %vm508_vm10, 0.0, %v3061_v18  ;;  %v3115_v40 = vrot.slane %v5939_v31, 4 }
 0x86b   :  { %v3070_v13 = vperm.slane %v3062_v34, %v5027_v11 }
 0x86c   :  { %v2957_v37 = vsub.f32 %v2911_v47, %v5156_v12  ;;  %v3012_v12 = vperm.slane %v3004_v15, %v5005_v53 }
 0x86d   :  { %v3077_v41 = vrot.slane %v3070_v13, 4 }
 0x86e   :  { %v2961_v43 = vsel %vm1109_vm14, %v2957_v37, 0.0  ;;  %v3023_v21 = vrot.slane %v3012_v12, 4  ;;  %v3028_v16 = vperm.slane %v3012_v12, %v5027_v11  ;;  %v3116_v37 = vsel %vm508_vm10, 0.0, %v3115_v40 }
 0x86f   :  { %v2970_v8 = vperm.slane %v2961_v43, %v5005_v53  ;;  %v2965_v32 = vrot.slane %v2961_v43, 4  ;;  %v3078_v55 = vsel %vm508_vm10, 0.0, %v3077_v41  ;;  %vm7350_vm14 = vcmask 523264  }
 0x870   :  { %v3024_v5 = vsel %vm508_vm10, 0.0, %v3023_v21  ;;  %v3037_v10 = vrot.slane %v3028_v16, 4  ;;  %vm7354_vm7 = vmmov %vm7350_vm14 }
 0x871   :  { %v5952_v60 = vperm.slane %v2970_v8, %v5027_v11  ;;  %v2975_v42 = vrot.slane %v2970_v8, 4  ;;  %v2966_v45 = vsel %vm508_vm10, 0.0, %v2965_v32  ;;  %v3032_v29 = vperm.slane %v3024_v5, %v5027_v11  ;;  %vm7358_vm5 = vmmov %vm7354_vm7 }
 0x872   :  { %v2974_v2 = vperm.slane %v2966_v45, %v5005_v53  ;;  %v3038_v0 = vsel %vm508_vm10, 0.0, %v3037_v10 }
 0x873   :  { %v2995_v58 = vrot.slane %v5952_v60, 4  ;;  %v2976_v14 = vsel %vm508_vm10, 0.0, %v2975_v42  ;;  %v3039_v8 = vrot.slane %v3032_v29, 4 }
 0x874   :  { %v2984_v49 = vperm.slane %v2976_v14, %v5027_v11  ;;  %v2985_v20 = vrot.slane %v2974_v2, 4  ;;  %v2990_v59 = vperm.slane %v2974_v2, %v5027_v11 }
 0x875   :  { %v2996_v48 = vsel %vm508_vm10, 0.0, %v2995_v58  ;;  %v3040_v15 = vsel %vm508_vm10, 0.0, %v3039_v8 }
 0x876   :  { %3121 = vrot.lane.b32.xlu2 %v2996_v48, %s4593_s6  ;;  %3137 = vrot.lane.b32.xlu0 %v2984_v49, %s4591_s21  ;;  %v2997_v1 = vrot.slane %v2984_v49, 4  ;;  %v2986_v26 = vsel %vm508_vm10, 0.0, %v2985_v20  ;;  %v2999_v6 = vrot.slane %v2990_v59, 4 }
 0x877   :  { %v2994_v38 = vperm.slane %v2986_v26, %v5027_v11 }
 0x878   :  { %v2998_v62 = vsel %vm508_vm10, 0.0, %v2997_v1  ;;  %v3000_v9 = vsel %vm508_vm10, 0.0, %v2999_v6 }
 0x879   :  { %3153 = vrot.lane.b32.xlu1 %v2998_v62, %s4589_s1  ;;  %v3001_v47 = vrot.slane %v2994_v38, 4 }
 0x87b   :  { %v3002_v57 = vsel %vm508_vm10, 0.0, %v3001_v47 }
 0x87e   :  { %3171 = vrot.lane.b32.xlu2 %v3028_v16, %s4592_s22  ;;  %3191 = vrot.lane.b32.xlu0 %v3114_v27, %s4594_s23 }
 0x881   :  { %3203 = vrot.lane.b32.xlu1 %v3032_v29, %s4590_s20 }
 0x886   :  { %3187 = vrot.lane.b32.xlu0 %v3038_v0, %s4594_s23  ;;  %3169 = vrot.lane.b32.xlu2 %v2990_v59, %s4592_s22 }
 0x889   :  { %3201 = vrot.lane.b32.xlu1 %v2994_v38, %s4590_s20 }
 0x88e   :  { %3157 = vrot.lane.b32.xlu2 %v3074_v25, %s4589_s1  ;;  %3185 = vrot.lane.b32.xlu0 %v3000_v9, %s4594_s23 }
 0x891   :  { %422 = vrot.lane.b32.xlu1 %v5276_v36, %s4592_s22  ;;  %v3128_v43 = vpop.permute.xlu2 %3127 }
 0x892   :  { %v3232_v4 = vsel %vm104_vm1, %v5893_v22, %v3128_v43 }
 0x896   :  { %3205 = vrot.lane.b32.xlu2 %v3070_v13, %s4590_s20  ;;  %424 = vrot.lane.b32.xlu0 %v5268_v28, %s4589_s1 }
 0x899   :  { %428 = vrot.lane.b32.xlu1 %v5377_v23, %s4589_s1  ;;  %v3176_v58 = vpop.permute.xlu2 %3175 }
 0x89e   :  { %426 = vrot.lane.b32.xlu2 %v5389_v44, %s4589_s1  ;;  %430 = vrot.lane.b32.xlu0 %v5276_v36, %s4589_s1 }
 0x8a1   :  { %434 = vrot.lane.b32.xlu1 %v5389_v44, %s4591_s21 }
 0x8a6   :  { %432 = vrot.lane.b32.xlu2 %v5268_v28, %s4591_s21  ;;  %436 = vrot.lane.b32.xlu0 %v5377_v23, %s4591_s21 }
 0x8a7   :  { %v3126_v42 = vpop.permute.xlu0 %3125  ;;  %v3142_v48 = vpop.permute.xlu1 %3141 }
 0x8a9   :  { %440 = vrot.lane.b32.xlu1 %v5268_v28, %s4593_s6 }
 0x8ae   :  { %438 = vrot.lane.b32.xlu2 %v5276_v36, %s4591_s21  ;;  %442 = vrot.lane.b32.xlu0 %v5389_v44, %s4593_s6 }
 0x8af   :  { %v3144_v14 = vpop.permute.xlu0 %3143  ;;  %v3124_v62 = vpop.permute.xlu1 %3123 }
 0x8b0   :  { %v3236_v6 = vsel %vm1513_vm15, %v3232_v4, %v3144_v14  ;;  %v3230_v22 = vsel %vm104_vm1, %v5909_v3, %v3124_v62  ;;  %v3231_v14 = vsel %vm104_vm1, %v5883_v56, %v3126_v42 }
 0x8b6   :  { %444 = vrot.lane.b32.xlu2 %v5377_v23, %s4593_s6  ;;  %3221 = vrot.lane.b32.xlu0 %v3078_v55, %s4595_s24 }
 0x8b7   :  { %v3174_v31 = vpop.permute.xlu0 %3173  ;;  %v3160_v45 = vpop.permute.xlu1 %3159 }
 0x8b8   :  { %v3240_v18 = vsel %vm1518_vm11, %v3236_v6, %v3160_v45 }
 0x8b9   :  { %v3244_v34 = vsel %vm7350_vm14, %v3240_v18, %v3176_v58  ;;  %vm7359_vm14 = vmmov %vm7351_vm9 }
 0x8be   :  { %3223 = vrot.lane.b32.xlu2 %v3116_v37, %s4595_s24  ;;  %3217 = vrot.lane.b32.xlu0 %v3002_v57, %s4595_s24 }
 0x8bf   :  { %v3140_v32 = vpop.permute.xlu0 %3139  ;;  %v3190_v29 = vpop.permute.xlu1 %3189 }
 0x8c0   :  { %v3234_v57 = vsel %vm1513_vm15, %v3230_v22, %v3140_v32  ;;  %v3235_v32 = vsel %vm1513_vm15, %v3231_v14, %v3142_v48 }
 0x8c6   :  { %3219 = vrot.lane.b32.xlu2 %v3040_v15, %s4595_s24 }
 0x8c7   :  { %v3208_v59 = vpop.permute.xlu1 %3207 }
 0x8cf   :  { %v3156_v38 = vpop.permute.xlu1 %3155 }
 0x8d0   :  { %v3122_v49 = vpop.permute.xlu2 %3121  ;;  %v3238_v8 = vsel %vm1518_vm11, %v3234_v57, %v3156_v38  ;;  %v7370_v57 = vld [vmem:[#allocation53_spill] sm:$0xff] }
 0x8d1   :  { %v3229_v48 = vsel %vm104_vm1, %v5952_v60, %v3122_v49 }
 0x8d8   :  { %v3172_v12 = vpop.permute.xlu2 %3171 }
 0x8d9   :  { %v3242_v15 = vsel %vm7354_vm7, %v3238_v8, %v3172_v12  ;;  %vm3297_vm7 = vcmp.gt.f32.partialorder %v5682_v46, 0.0 }
 0x8e0   :  { %v3170_v1 = vpop.permute.xlu2 %3169 }
 0x8e8   :  { %v3138_v21 = vpop.permute.xlu0 %3137  ;;  %v3158_v17 = vpop.permute.xlu2 %3157 }
 0x8e9   :  { %v3239_v12 = vsel %vm1518_vm11, %v3235_v32, %v3158_v17  ;;  %v7372_v32 = vld [vmem:[#allocation14_spill] sm:$0xff] }
 0x8ea   :  { %v3243_v4 = vsel %vm7358_vm5, %v3239_v12, %v3174_v31  ;;  %v7373_v12 = vld [vmem:[#allocation13_spill] sm:$0xff] }
 0x8eb   :  { %v3154_v13 = vpop.permute.xlu1 %3153  ;;  %v3247_v17 = vsel %vm7359_vm14, %v3243_v4, %v3190_v29  ;;  %v7374_v4 = vld [vmem:[#allocation34_spill] sm:$0xff] }
 0x8f0   :  { %v3192_v16 = vpop.permute.xlu0 %3191  ;;  %v3206_v5 = vpop.permute.xlu2 %3205 }
 0x8f1   :  { %v3248_v41 = vsel %vm7351_vm9, %v3244_v34, %v3192_v16  ;;  %vm7360_vm9 = vmmov %vm7356_vm3 }
 0x8f2   :  { %v3252_v40 = vsel %vm7352_vm4, %v3248_v41, %v3208_v59  ;;  %v3251_v31 = vsel %vm7360_vm9, %v3247_v17, %v3206_v5  ;;  %vm7361_vm4 = vmmov %vm7353_vm0 }
 0x8f3   :  { %v3204_v62 = vpop.permute.xlu1 %3203 }
 0x8f8   :  { %v3188_v2 = vpop.permute.xlu0 %3187  ;;  %v6023_v27 = vpop.permute.xlu2 %426 }
 0x8f9   :  { %v3246_v3 = vsel %vm7355_vm13, %v3242_v15, %v3188_v2  ;;  %v3233_v2 = vsel %vm1513_vm15, %v3229_v48, %v3138_v21  ;;  %vm7363_vm15 = vmmov %vm7355_vm13  ;;  %v7371_v15 = vld [vmem:[#allocation52_spill] sm:$0xff] }
 0x8fa   :  { %v3250_v16 = vsel %vm7356_vm3, %v3246_v3, %v3204_v62  ;;  %vm7365_vm13 = vmmov %vm7361_vm4 }
 0x8fb   :  { %v3202_v21 = vpop.permute.xlu1 %3201 }
 0x900   :  { %v3186_v20 = vpop.permute.xlu0 %3185  ;;  %v6025_v10 = vpop.permute.xlu2 %432 }
 0x908   :  { %v6027_v26 = vpop.permute.xlu0 %424  ;;  %v6029_v0 = vpop.permute.xlu2 %438 }
 0x910   :  { %v6034_v25 = vpop.permute.xlu0 %430  ;;  %v6036_v9 = vpop.permute.xlu2 %444 }
 0x918   :  { %v6041_v55 = vpop.permute.xlu0 %436  ;;  %v3224_v47 = vpop.permute.xlu2 %3223 }
 0x919   :  { %v3256_v37 = vsel %vm7353_vm0, %v3252_v40, %v3224_v47  ;;  %vm7362_vm0 = vmmov %vm7358_vm5  ;;  %vm3294_vm5 = vcmp.gt.f32.partialorder %v7371_v15, 0.0 }
 0x91a   :  { %v6048_v43 = vperm.slane %v3256_v37, 0  ;;  %v7369_v37 = vld [vmem:[#allocation48_spill] sm:$0xff] }
 0x91c   :  { %v3291_v58 = vmul.f32 %v6048_v43, %v5703_v61  ;;  %v3292_v42 = vmul.f32 %v6048_v43, %v5694_v39 }
 0x91e   :  { %4337 = vmatmul.msk.f32.vlgmr.msrb.gmra.mxu3 %vm3299_vm8, %v3291_v58  ;;  %vm3296_vm8 = vcmp.gt.f32.partialorder %v5662_v19, 0.0 }
 0x920   :  { %v6059_v45 = vpop.permute.xlu0 %442  ;;  %v3220_v59 = vpop.permute.xlu2 %3219 }
 0x921   :  { %v3254_v61 = vsel %vm7357_vm12, %v3250_v16, %v3220_v59  ;;  %vm3298_vm12 = vcmp.gt.f32.partialorder %v7369_v37, 0.0 }
 0x922   :  { %v6064_v38 = vperm.slane %v3254_v61, 0 }
 0x924   :  { %v3287_v56 = vmul.f32 %v6064_v38, %v5674_v54  ;;  %v3237_v54 = vsel %vm1518_vm11, %v3233_v2, %v3154_v13  ;;  %v3288_v60 = vmul.f32 %v6064_v38, %v5668_v51  ;;  %vm7364_vm11 = vmmov %vm7356_vm3  ;;  %v7366_v51 = vld [vmem:[#allocation47_spill] sm:$0xff] }
 0x925   :  { %v3241_v34 = vsel %vm7362_vm0, %v3237_v54, %v3170_v1  ;;  %v7367_v40 = vmax.f32 %v7366_v51, 0.0  ;;  %vm3293_vm3 = vcmp.gt.f32.partialorder %v7366_v51, 0.0  ;;  %vm7392_vm0 = vcmask 1042434  }
 0x926   :  { %4333 = vmatmul.msk.f32.vlgmr.msrb.gmra.mxu1 %vm3295_vm2, %v3287_v56  ;;  %4338 = vmatmul.msk.f32.gmra.mxu3 %vm3300_vm6, %v3292_v42  ;;  %v3245_v49 = vsel %vm7363_vm15, %v3241_v34, %v3186_v20  ;;  %v7368_v20 = vld [vmem:[#allocation49_spill] sm:$0xff]  ;;  %v7375_v42 = vld [vmem:[#allocation35_spill] sm:$0xff]  ;;  %vm7376_vm2 = vcmask 64512  }
 0x927   :  { %v3249_v29 = vsel %vm7364_vm11, %v3245_v49, %v3202_v21  ;;  %vm7377_vm6 = vmmov %vm7376_vm2 }
 0x928   :  { %v3222_v6 = vpop.permute.xlu0 %3221  ;;  %vm7381_vm14 = vmmov %vm7376_vm2 }
 0x929   :  { %v3255_v39 = vsel %vm7361_vm4, %v3251_v31, %v3222_v6  ;;  %vm7382_vm9 = vmmov %vm7376_vm2  ;;  %vm7384_vm4 = vcmask 1041409  }
 0x92a   :  { %v6080_v18 = vperm.slane %v3255_v39, 0  ;;  %vm7396_vm15 = vmmov %vm7384_vm4 }
 0x92b   :  { %vm7401_vm11 = vmmov %vm7392_vm0 }
 0x92c   :  { %v3289_v41 = vmul.f32 %v6080_v18, %v5664_v52  ;;  %v3290_v22 = vmul.f32 %v6080_v18, %v7368_v20 }
 0x92e   :  { %4334 = vmatmul.msk.f32.gmra.mxu1 %vm3296_vm8, %v3288_v60  ;;  %4335 = vmatmul.msk.f32.vlgmr.msrb.gmra.mxu2 %vm3297_vm7, %v3289_v41  ;;  %vm7394_vm7 = vmmov %vm7384_vm4 }
 0x92f   :  { %vm7398_vm8 = vmmov %vm7376_vm2 }
 0x930   :  { %v3218_v5 = vpop.permute.xlu0 %3217 }
 0x931   :  { %v3253_v1 = vsel %vm7365_vm13, %v3249_v29, %v3218_v5  ;;  %v7378_v29 = vld [vmem:[#allocation19_spill] sm:$0xff]  ;;  %vm7402_vm13 = vmmov %vm7384_vm4 }
 0x932   :  { %v6092_v13 = vperm.slane %v3253_v1, 0 }
 0x934   :  { %v3285_v52 = vmul.f32 %v6092_v13, %v5686_v35  ;;  %v3261_v47 = vmul.f32 %v6092_v13, %v7367_v40  ;;  %v3286_v8 = vmul.f32 %v6092_v13, %v7370_v57  ;;  %v6108_v35 = vpop.permute.xlu1 %422  ;;  %v7383_v57 = vld [vmem:[#allocation39_spill] sm:$0xff] }
 0x936   :  { %4331 = vmatmul.msk.f32.vlgmr.msrb.gmra.mxu0 %vm3293_vm3, %v3285_v52  ;;  %3269 = vadd.xlane.f32.xlu1 %v3261_v47  ;;  %v7379_v52 = vld [vmem:[#allocation37_spill] sm:$0xff]  ;;  %vm7403_vm3 = vcmask 1043459  }
 0x937   :  { %4336 = vmatmul.msk.f32.gmra.mxu2 %vm3298_vm12, %v3290_v22  ;;  %v7380_v47 = vld [vmem:[#allocation25_spill] sm:$0xff]  ;;  %vm7404_vm12 = vmmov %vm7376_vm2 }
 0x938   :  { %v463_v20 = vrot.slane %v7380_v47, 7  ;;  %v451_v47 = vrot.slane %v5377_v23, 6  ;;  %v454_v23 = vrot.slane %v5276_v36, 5 }
 0x93c   :  { %v6110_v58 = vpop.permute.xlu1 %428 }
 0x93e   :  { %4332 = vmatmul.msk.f32.gmra.mxu0 %vm3294_vm5, %v3286_v8  ;;  %v464_v8 = vsel %vm7384_vm4, %v463_v20, %v7383_v57  ;;  %vm7405_vm5 = vmmov %vm7392_vm0 }
 0x944   :  { %v435_v14 = vpop.permute.xlu1 %434 }
 0x94c   :  { %v6112_v3 = vpop.permute.xlu1 %440 }
 0x94f   :  { %446 = vrot.lane.b32.xlu1 %v5276_v36, %s4593_s6  ;;  %v493_v36 = vrot.slane %v6059_v45, 7 }
 0x9a1   :  { %v3395_v62 = vpop.f32.mrf.mxu3 }
 0x9a2   :  { %v3407_v16 = vmul.f32 %v3395_v62, %v7372_v32  ;;  %v487_v62 = vrot.slane %v435_v14, 7  ;;  %v7391_v14 = vld [vmem:[#allocation21_spill] sm:$0xff] }
 0x9a3   :  { %v3349_v59 = vpop.f32.mrf.mxu1 }
 0x9a4   :  { %v3415_v61 = vsub.f32 %v7373_v12, %v3407_v16  ;;  %v3403_v56 = vmul.f32 %v3349_v59, %v7374_v4  ;;  %v7386_v59 = vld [vmem:[#allocation27_spill] sm:$0xff] }
 0x9a5   :  { %v465_v12 = vrot.slane %v7386_v59, 6 }
 0x9a6   :  { %v3411_v48 = vsub.f32 %v7375_v42, %v3403_v56  ;;  %4345 = vmatmul.msk.f32.vlgmr.msra.gmra.mxu3 %vm7376_vm2, %v3415_v61  ;;  %v489_v61 = vrot.slane %v6041_v55, 6  ;;  %v7387_v56 = vld [vmem:[#allocation29_spill] sm:$0xff]  ;;  %vm7407_vm2 = vmmov %vm7384_vm4 }
 0x9a7   :  { %v469_v42 = vrot.slane %v7387_v56, 7  ;;  %v7395_v55 = vld [vmem:[#allocation41_spill] sm:$0xff]  ;;  %vm7411_vm4 = vmmov %vm7392_vm0 }
 0x9a8   :  { %4341 = vmatmul.msk.f32.vlgmr.msra.gmra.mxu1 %vm7377_vm6, %v3411_v48  ;;  %v448_v48 = vrot.slane %v5389_v44, 7  ;;  %vm7408_vm6 = vmmov %vm7403_vm3 }
 0x9a9   :  { %v3270_v17 = vpop.xlane.xlu1 %3269  ;;  %v3398_v2 = vpop.f32.mrf.mxu3 }
 0x9aa   :  { %v3425_v31 = vperm.slane %v3270_v17, 0  ;;  %v3426_v6 = vperm.slane %v3270_v17, 1  ;;  %v3427_v54 = vperm.slane %v3270_v17, 2  ;;  %v3428_v39 = vperm.slane %v3270_v17, 3 }
 0x9ab   :  { %v3352_v34 = vpop.f32.mrf.mxu1  ;;  %v3429_v41 = vperm.slane %v3270_v17, 4  ;;  %v3408_v60 = vmul.f32 %v3398_v2, %v7372_v32  ;;  %v3430_v21 = vperm.slane %v3270_v17, 5  ;;  %v3431_v5 = vperm.slane %v3270_v17, 6  ;;  %v7385_v32 = vld [vmem:[#allocation32_spill] sm:$0xff] }
 0x9ac   :  { %3489 = vst [vmem:[#allocation1] ss:$9 sm:$0xff] %v3425_v31  ;;  %v3404_v49 = vmul.f32 %v3352_v34, %v7374_v4  ;;  %v3432_v40 = vperm.slane %v3270_v17, 7  ;;  %v7388_v17 = vld [vmem:[#allocation33_spill] sm:$0xff]  ;;  %v7389_v31 = vld [vmem:[#allocation12_spill] sm:$0xff]  ;;  %v457_v34 = vrot.slane %v7391_v14, 7 }
 0x9ad   :  { %3491 = vst [vmem:[#allocation1 + $0x1] ss:$9 sm:$0xff] %v3426_v6  ;;  %v3416_v1 = vsub.f32 %v7378_v29, %v3408_v60  ;;  %v7393_v60 = vld [vmem:[#allocation40_spill] sm:$0xff]  ;;  %v7397_v29 = vld [vmem:[#allocation18_spill] sm:$0xff] }
 0x9ae   :  { %3493 = vst [vmem:[#allocation1 + $0x2] ss:$9 sm:$0xff] %v3427_v54  ;;  %v3412_v51 = vsub.f32 %v7379_v52, %v3404_v49  ;;  %v7390_v54 = vld [vmem:[#allocation31_spill] sm:$0xff]  ;;  %v470_v49 = vsel %vm7394_vm7, %v469_v42, %v7393_v60  ;;  %v7415_v60 = vld [vmem:[#allocation30_spill] sm:$0xff]  ;;  %vm7417_vm7 = vmmov %vm7403_vm3 }
 0x9af   :  { %3495 = vst [vmem:[#allocation1 + $0x3] ss:$9 sm:$0xff] %v3428_v39  ;;  %4346 = vmatmul.msk.f32.gmra.mxu3 %vm7381_vm14, %v3416_v1  ;;  %v467_v39 = vrot.slane %v7390_v54, 5  ;;  %v7399_v1 = vld [vmem:[#allocation42_spill] sm:$0xff]  ;;  %vm7409_vm14 = vmmov %vm7403_vm3 }
 0x9b0   :  { %3497 = vst [vmem:[#allocation1 + $0x4] ss:$9 sm:$0xff] %v3429_v41  ;;  %4342 = vmatmul.msk.f32.gmra.mxu1 %vm7382_vm9, %v3412_v51  ;;  %v466_v41 = vsel %vm7392_vm0, %v465_v12, %v464_v8  ;;  %v471_v52 = vrot.slane %v7399_v1, 6  ;;  %v7400_v51 = vld [vmem:[#allocation24_spill] sm:$0xff]  ;;  %v475_v8 = vrot.slane %v5871_v63, 7  ;;  %vm7410_vm9 = vmmov %vm7392_vm0  ;;  %v495_v1 = vrot.slane %v6036_v9, 6 }
 0x9b1   :  { %3499 = vst [vmem:[#allocation1 + $0x5] ss:$9 sm:$0xff] %v3430_v21  ;;  %v3372_v22 = vpop.f32.mrf.mxu2  ;;  %v473_v21 = vrot.slane %v7395_v55, 5  ;;  %v468_v57 = vsel %vm7403_vm3, %v467_v39, %v466_v41  ;;  %vm7413_vm0 = vmmov %vm7407_vm2  ;;  %v477_v39 = vrot.slane %v5865_v33, 6  ;;  %v7416_v55 = vld [vmem:[#allocation20_spill] sm:$0xff] }
 0x9b2   :  { %3501 = vst [vmem:[#allocation1 + $0x6] ss:$9 sm:$0xff] %v3431_v5  ;;  %v3405_v16 = vmul.f32 %v3372_v22, %v7385_v32  ;;  %v488_v5 = vsel %vm7396_vm15, %v487_v62, %v6025_v10  ;;  %v450_v22 = vsel %vm7402_vm13, %v448_v48, %v5268_v28  ;;  %v491_v10 = vrot.slane %v6029_v0, 5  ;;  %v7412_v48 = vld [vmem:[#allocation43_spill] sm:$0xff]  ;;  %vm7418_vm15 = vmmov %vm7411_vm4 }
 0x9b3   :  { %3503 = vst [vmem:[#allocation1 + $0x7] ss:$9 sm:$0xff] %v3432_v40  ;;  %v3326_v4 = vpop.f32.mrf.mxu0  ;;  %v459_v40 = vrot.slane %v7400_v51, 6  ;;  %v490_v20 = vsel %vm7401_vm11, %v489_v61, %v488_v5  ;;  %v472_v62 = vsel %vm7405_vm5, %v471_v52, %v470_v49  ;;  %v453_v63 = vsel %vm7411_vm4, %v451_v47, %v450_v22  ;;  %vm7419_vm11 = vmmov %vm7403_vm3 }
 0x9b4   :  { %v3413_v2 = vsub.f32 %v7388_v17, %v3405_v16  ;;  %v3401_v6 = vmul.f32 %v3326_v4, %v7389_v31  ;;  %v7406_v16 = vld [vmem:[#allocation26_spill] sm:$0xff]  ;;  %v474_v12 = vsel %vm7408_vm6, %v473_v21, %v472_v62  ;;  %v492_v61 = vsel %vm7409_vm14, %v491_v10, %v490_v20  ;;  %vm7420_vm13 = vmmov %vm7403_vm3 }
 0x9b5   :  { %v458_v59 = vsel %vm7407_vm2, %v457_v34, %v7406_v16  ;;  %v507_v56 = vrot.slane %v468_v57, 4  ;;  %v476_v17 = vsel %vm7413_vm0, %v475_v8, %v7412_v48  ;;  %v514_v54 = vrot.slane %v474_v12, 4  ;;  %v7414_v34 = vld [vmem:[#allocation36_spill] sm:$0xff]  ;;  %vm7421_vm3 = vmmov %vm7413_vm0 }
 0x9b6   :  { %v3409_v44 = vsub.f32 %v7397_v29, %v3401_v6  ;;  %4343 = vmatmul.msk.f32.vlgmr.msra.gmra.mxu2 %vm7398_vm8, %v3413_v2  ;;  %v460_v4 = vsel %vm7410_vm9, %v459_v40, %v458_v59  ;;  %v479_v2 = vrot.slane %v6108_v35, 5  ;;  %v520_v14 = vrot.slane %v492_v61, 4  ;;  %vm7423_vm5 = vmmov %vm7411_vm4 }
 0x9b7   :  { %v461_v49 = vrot.slane %v7415_v60, 5  ;;  %v456_v21 = vsel %vm7417_vm7, %v454_v23, %v453_v63  ;;  %v478_v5 = vsel %vm7418_vm15, %v477_v39, %v476_v17  ;;  %v494_v33 = vsel %vm7421_vm3, %v493_v36, %v6112_v3  ;;  %vm7424_vm2 = vmmov %vm7413_vm0 }
 0x9b8   :  { %4339 = vmatmul.msk.f32.vlgmr.msra.gmra.mxu0 %vm7404_vm12, %v3409_v44  ;;  %v509_v35 = vsel %vm508_vm10, %v507_v56, %v456_v21  ;;  %vm7422_vm12 = vmmov %vm7398_vm8  ;;  %v483_v44 = vrot.slane %v6110_v58, 6  ;;  %v481_v40 = vrot.slane %v6023_v27, 7  ;;  %v485_v47 = vrot.slane %v6034_v25, 5 }
 0x9b9   :  { %v462_v45 = vsel %vm7419_vm11, %v461_v49, %v460_v4  ;;  %v513_v22 = vperm.slane %v509_v35, %v5005_v53  ;;  %v496_v3 = vsel %vm7423_vm5, %v495_v1, %v494_v33  ;;  %vm7425_vm14 = vmmov %vm7411_vm4 }
 0x9ba   :  { %v3375_v28 = vpop.f32.mrf.mxu2  ;;  %v515_v29 = vsel %vm508_vm10, %v514_v54, %v462_v45  ;;  %v482_v8 = vsel %vm7424_vm2, %v481_v40, %v6027_v26  ;;  %vm7426_vm9 = vmmov %vm7408_vm6 }
 0x9bb   :  { %v3406_v0 = vmul.f32 %v3375_v28, %v7385_v32  ;;  %v3329_v42 = vpop.f32.mrf.mxu0  ;;  %v519_v57 = vperm.slane %v515_v29, %v5005_v53  ;;  %v484_v10 = vsel %vm7425_vm14, %v483_v44, %v482_v8  ;;  %v534_v16 = vrot.slane %v513_v22, 4  ;;  %vm7454_vm11 = vmmov %vm7424_vm2 }
 0x9bc   :  { %v3402_v6 = vmul.f32 %v3329_v42, %v7389_v31  ;;  %v480_v31 = vsel %vm7420_vm13, %v479_v2, %v478_v5  ;;  %v486_v27 = vsel %vm7426_vm9, %v485_v47, %v484_v10  ;;  %vm7455_vm13 = vmmov %vm7423_vm5 }
 0x9bd   :  { %v3414_v41 = vsub.f32 %v7414_v34, %v3406_v0  ;;  %v521_v52 = vsel %vm508_vm10, %v520_v14, %v480_v31  ;;  %v532_v59 = vrot.slane %v519_v57, 4  ;;  %v535_v28 = vsel %vm508_vm10, %v519_v57, %v534_v16  ;;  %v7429_v34 = vld [vmem:[#allocation11_spill] sm:$0xff]  ;;  %v7433_v31 = vld [vmem:[#allocation17_spill] sm:$0xff]  ;;  %vm7457_vm3 = vmmov %vm7408_vm6 }
 0x9be   :  { %v3410_v32 = vsub.f32 %v7416_v55, %v3402_v6  ;;  %v525_v58 = vperm.slane %v521_v52, %v5005_v53  ;;  %v543_v0 = vperm.slane %v535_v28, %v5027_v11  ;;  %v7427_v6 = vld [vmem:[#allocation16_spill] sm:$0xff]  ;;  %vm7430_vm0 = vcmp.lt.s32.totalorder %v4760_v24, %v7429_v34  ;;  %vm7464_vm9 = vmmov %vm7423_vm5 }
 0x9bf   :  { %4344 = vmatmul.msk.f32.gmra.mxu2 %vm7398_vm8, %v3414_v41  ;;  %v533_v63 = vsel %vm508_vm10, %v532_v59, %v513_v22  ;;  %vm7428_vm4 = vcmp.lt.s32.totalorder %v4760_v24, %v7427_v6  ;;  %vm7434_vm15 = vcmp.lt.s32.totalorder %v4760_v24, %v7433_v31 }
 0x9c0   :  { %4340 = vmatmul.msk.f32.gmra.mxu0 %vm7422_vm12, %v3410_v32  ;;  %v546_v23 = vrot.slane %v525_v58, 4  ;;  %v539_v2 = vperm.slane %v533_v63, %v5027_v11  ;;  %v7431_v32 = vld [vmem:[#allocation15_spill] sm:$0xff]  ;;  %v562_v45 = vrot.slane %v543_v0, 4  ;;  %vm7458_vm12 = vmmov %vm7424_vm2 }
 0x9c1   :  { %v447_v51 = vpop.permute.xlu1 %446  ;;  %vm7432_vm7 = vcmp.lt.s32.totalorder %v4760_v24, %v7431_v32  ;;  %vm7459_vm2 = vmmov %vm7457_vm3 }
 0x9c2   :  { %v497_v20 = vrot.slane %v447_v51, 5  ;;  %v558_v49 = vrot.slane %v539_v2, 4 }
 0x9c4   :  { %v498_v9 = vsel %vm7408_vm6, %v497_v20, %v496_v3  ;;  %vm7462_vm6 = vmmov %vm7454_vm11 }
 0x9c5   :  { %v526_v62 = vrot.slane %v498_v9, 4  ;;  %vm7463_vm14 = vmmov %vm7462_vm6 }
 0x9c7   :  { %v527_v25 = vsel %vm508_vm10, %v526_v62, %v486_v27 }
 0x9c8   :  { %v531_v12 = vperm.slane %v527_v25, %v5005_v53 }
 0x9ca   :  { %v544_v61 = vrot.slane %v531_v12, 4  ;;  %v547_v26 = vsel %vm508_vm10, %v531_v12, %v546_v23  ;;  %v7438_v23 = vld [vmem:[#allocation51_spill] sm:$0xff] }
 0x9cb   :  { %v555_v4 = vperm.slane %v547_v26, %v5027_v11  ;;  %v2163_v12 = vrot.slane %v7438_v23, 4  ;;  %v7439_v26 = vld [vmem:[#allocation46_spill] sm:$0xff] }
 0x9cc   :  { %v545_v56 = vsel %vm508_vm10, %v544_v61, %v525_v58 }
 0x9cd   :  { %v560_v42 = vrot.slane %v555_v4, 4  ;;  %v551_v48 = vperm.slane %v545_v56, %v5027_v11  ;;  %v6242_v35 = vsel %vm508_vm10, %v555_v4, %v562_v45  ;;  %v2164_v28 = vadd.f32 %v2163_v12, %v7438_v23  ;;  %v4501_v45 = vld [vmem:[%s7162_s5 + $0x8] sm:$0xff] }
 0x9ce   :  { %v6248_v33 = vsel %vm7434_vm15, %v6242_v35, -1e+30  ;;  %v2156_v4 = vrot.slane %v7439_v26, 4  ;;  %v7443_v23 = vmax.f32 %v5662_v19, 0.0  ;;  %v7450_v19 = vmax.f32 %v5658_v30, 0.0 }
 0x9cf   :  { %v6208_v17 = vsel %vm508_vm10, %v560_v42, %v543_v0  ;;  %v556_v36 = vrot.slane %v551_v48, 4  ;;  %v6231_v55 = vsel %vm508_vm10, %v551_v48, %v558_v49  ;;  %v577_v29 = vsel %vm104_vm1, %v6248_v33, -inf  ;;  %v4500_v42 = vld [vmem:[%s7162_s5] sm:$0xff]  ;;  %v7440_v49 = vld [vmem:[#allocation50_spill] sm:$0xff] }
 0x9d0   :  { %v6215_v54 = vsel %vm7428_vm4, %v6208_v17, -1e+30  ;;  %v6237_v21 = vsel %vm7432_vm7, %v6231_v55, -1e+30  ;;  %v2165_v63 = vrot.slane %v2164_v28, 2  ;;  %v2157_v56 = vadd.f32 %v2156_v4, %v7439_v26  ;;  %vm7465_vm4 = vmmov %vm7462_vm6 }
 0x9d1   :  { %v574_v39 = vsel %vm104_vm1, %v6215_v54, -inf  ;;  %v6220_v14 = vsel %vm508_vm10, %v556_v36, %v539_v2  ;;  %v571_v5 = vsel %vm104_vm1, %v6237_v21, -inf  ;;  %v3264_v12 = vmul.f32 %v6064_v38, %v7443_v23  ;;  %vm7467_vm7 = vmmov %vm7459_vm2 }
 0x9d2   :  { %575 = vmax.xlane.f32.xlu1 %v574_v39  ;;  %v6226_v41 = vsel %vm7430_vm0, %v6220_v14, -1e+30  ;;  %v2166_v0 = vadd.f32 %v2165_v63, %v2164_v28  ;;  %v2158_v48 = vrot.slane %v2157_v56, 2  ;;  %v7446_v26 = vmax.f32 %v7369_v37, 0.0  ;;  %vm7466_vm0 = vmmov %vm7423_vm5 }
 0x9d3   :  { %v568_v60 = vsel %vm104_vm1, %v6226_v41, -inf  ;;  %v7451_v37 = vmax.f32 %v5690_v7, 0.0  ;;  %vm7468_vm15 = vmmov %vm7465_vm4 }
 0x9d4   :  { %569 = vmax.xlane.f32.xlu2 %v568_v60  ;;  %v2167_v2 = vrot.slane %v2166_v0, 1  ;;  %v2159_v36 = vadd.f32 %v2158_v48, %v2157_v56  ;;  %v3266_v4 = vmul.f32 %v6080_v18, %v7446_v26 }
 0x9d5   :  { %v3268_v48 = vmul.f32 %v6048_v43, %v7451_v37 }
 0x9d6   :  { %v6279_v39 = vadd.f32 %v2167_v2, %v2166_v0  ;;  %v2160_v60 = vrot.slane %v2159_v36, 1  ;;  %v3263_v0 = vmul.f32 %v6064_v38, %v7450_v19 }
 0x9dc   :  { %572 = vmax.xlane.f32.xlu2 %v571_v5  ;;  %v2170_v5 = vrot.slane %v7440_v49, 4 }
 0x9e4   :  { %578 = vmax.xlane.f32.xlu2 %v577_v29  ;;  %v6287_v29 = vadd.f32 %v2160_v60, %v2159_v36  ;;  %v7453_v60 = vmov 0.0  }
 0xa45   :  { %v6252_v44 = vpop.xlane.xlu1 %575 }
 0xa46   :  { %7435 = vst [vmem:[#allocation47_spill] sm:$0xff] %v6252_v44  ;;  %v582_v51 = vsub.f32 %v6215_v54, %v6252_v44 }
 0xa47   :  { %v6254_v1 = vpop.xlane.xlu2 %569 }
 0xa48   :  { %7436 = vst [vmem:[#allocation49_spill] sm:$0xff] %v6254_v1  ;;  %v580_v52 = vsub.f32 %v6226_v41, %v6254_v1  ;;  %v588_v47 = vmul.f32 1.442695, %v582_v51 }
 0xa4a   :  { %v584_v40 = vmul.f32 1.442695, %v580_v52  ;;  %v2171_v52 = vadd.f32 %v2170_v5, %v7440_v49 }
 0xa4c   :  { %4441 = vpow2.f32 %v584_v40  ;;  %v2172_v51 = vrot.slane %v2171_v52, 2  ;;  %v4502_v40 = vld [vmem:[%s7162_s5 + $0x18] sm:$0xff] }
 0xa4d   :  { %4443 = vpow2.f32 %v588_v47 }
 0xa4e   :  { %v2173_v47 = vadd.f32 %v2172_v51, %v2171_v52 }
 0xa4f   :  { %v6260_v20 = vpop.xlane.xlu2 %572 }
 0xa50   :  { %7437 = vst [vmem:[#allocation48_spill] sm:$0xff] %v6260_v20  ;;  %v581_v22 = vsub.f32 %v6237_v21, %v6260_v20 }
 0xa52   :  { %v4442_v3 = vpop.eup %4441  ;;  %v586_v57 = vmul.f32 1.442695, %v581_v22  ;;  %v2174_v22 = vrot.slane %v2173_v47, 1 }
 0xa53   :  { %v592_v8 = vsel %vm104_vm1, %v4442_v3, 0.0  ;;  %v4444_v9 = vpop.eup %4443 }
 0xa54   :  { %4445 = vpow2.f32 %v586_v57  ;;  %593 = vadd.xlane.f32.xlu0 %v592_v8  ;;  %v598_v25 = vsel %vm104_vm1, %v4444_v9, 0.0  ;;  %v6299_v3 = vadd.f32 %v2174_v22, %v2173_v47  ;;  %v7441_v57 = vld [vmem:[#allocation54_spill] sm:$0xff] }
 0xa55   :  { %v2149_v8 = vrot.slane %v7441_v57, 4 }
 0xa57   :  { %v6265_v58 = vpop.xlane.xlu2 %578  ;;  %v2150_v9 = vadd.f32 %v2149_v8, %v7441_v57 }
 0xa58   :  { %v583_v10 = vsub.f32 %v6248_v33, %v6265_v58 }
 0xa5a   :  { %v4446_v62 = vpop.eup %4445  ;;  %v590_v27 = vmul.f32 1.442695, %v583_v10  ;;  %v2151_v10 = vrot.slane %v2150_v9, 2 }
 0xa5b   :  { %v595_v16 = vsel %vm104_vm1, %v4446_v62, 0.0 }
 0xa5c   :  { %4447 = vpow2.f32 %v590_v27  ;;  %599 = vadd.xlane.f32.xlu0 %v598_v25  ;;  %596 = vadd.xlane.f32.xlu2 %v595_v16  ;;  %v2152_v62 = vadd.f32 %v2151_v10, %v2150_v9  ;;  %v7442_v16 = vmax.f32 %v7371_v15, 0.0  ;;  %v7448_v15 = vmax.f32 %v5676_v50, 0.0 }
 0xa5d   :  { %v7452_v50 = vmax.f32 %v5682_v46, 0.0  ;;  %v4503_v46 = vld [vmem:[%s7162_s5 + $0x10] sm:$0xff] }
 0xa5e   :  { %v2153_v27 = vrot.slane %v2152_v62, 1 }
 0xa5f   :  { %v3265_v36 = vmul.f32 %v6080_v18, %v7452_v50 }
 0xa60   :  { %v6311_v25 = vadd.f32 %v2153_v27, %v2152_v62 }
 0xa62   :  { %v4448_v59 = vpop.eup %4447 }
 0xa63   :  { %v601_v61 = vsel %vm104_vm1, %v4448_v59, 0.0  ;;  %v3262_v59 = vmul.f32 %v6092_v13, %v7442_v16  ;;  %v3267_v13 = vmul.f32 %v6048_v43, %v7448_v15 }
 0xa64   :  { %602 = vadd.xlane.f32.xlu2 %v601_v61 }
 0xa70   :  { %617 = vperm.xlu0 %4391, %v4500_v42  }
 0xa78   :  { %2232 = vrot.lane.b32.xlu0 %v6279_v39, %s4593_s6 }
 0xa7c   :  { %620 = vperm.xlu2 %4392, %v4501_v45   ;;  %v3504_v45 = vld [vmem:[#allocation1] sm:$0xff] }
 0xa80   :  { %2190 = vrot.lane.b32.xlu0 %v6287_v29, %s4590_s20 }
 0xa84   :  { %626 = vperm.xlu2 %4392, %v4502_v40  }
 0xa88   :  { %2214 = vrot.lane.b32.xlu0 %v6287_v29, %s4589_s1 }
 0xa8c   :  { %2198 = vrot.lane.b32.xlu2 %v6287_v29, %s4594_s23 }
 0xa90   :  { %2234 = vrot.lane.b32.xlu0 %v6299_v3, %s4593_s6 }
 0xa94   :  { %2200 = vrot.lane.b32.xlu2 %v6279_v39, %s4594_s23 }
 0xa98   :  { %2184 = vrot.lane.b32.xlu0 %v6279_v39, %s4595_s24 }
 0xa9c   :  { %2182 = vrot.lane.b32.xlu2 %v6287_v29, %s4595_s24 }
 0xaa4   :  { %2196 = vrot.lane.b32.xlu2 %v6311_v25, %s4594_s23 }
 0xaac   :  { %2222 = vrot.lane.b32.xlu2 %v6287_v29, %s4591_s21 }
 0xab4   :  { %2192 = vrot.lane.b32.xlu2 %v6279_v39, %s4590_s20 }
 0xac2   :  { %3271 = vadd.xlane.f32.xlu0 %v3262_v59 }
 0xac7   :  { %v6327_v28 = vpop.xlane.xlu0 %593 }
 0xac8   :  { %7445 = vst [vmem:[#allocation52_spill] sm:$0xff] %v6327_v28 }
 0xaca   :  { %3275 = vadd.xlane.f32.xlu0 %v3264_v12 }
 0xacf   :  { %v6325_v61 = vpop.xlane.xlu2 %596  ;;  %v6337_v56 = vpop.xlane.xlu0 %599 }
 0xad0   :  { %7444 = vst [vmem:[#allocation53_spill] sm:$0xff] %v6325_v61 }
 0xad1   :  { %7449 = vst [vmem:[#allocation13_spill] sm:$0xff] %v6337_v56 }
 0xad2   :  { %3279 = vadd.xlane.f32.xlu0 %v3266_v4 }
 0xad7   :  { %v6332_v63 = vpop.xlane.xlu2 %602 }
 0xad8   :  { %7447 = vst [vmem:[#allocation14_spill] sm:$0xff] %v6332_v63 }
 0xada   :  { %3281 = vadd.xlane.f32.xlu0 %v3267_v13 }
 0xadd   :  { %3273 = vadd.xlane.f32.xlu2 %v3263_v0 }
 0xadf   :  { %v6342_v42 = vpop.permute.xlu2 %620 }
 0xae2   :  { %3283 = vadd.xlane.f32.xlu0 %v3268_v48  ;;  %v618_v2 = vpop.permute.xlu0 %617 }
 0xae3   :  { %vm628_vm8 = vcmp.eq.s32.totalorder %v4760_v24, %v618_v2 }
 0xae4   :  { %v6352_v49 = vsel %vm628_vm8, 1.0, %v7453_v60  ;;  %vm7469_vm8 = vmmov %vm7465_vm4 }
 0xae5   :  { %3277 = vadd.xlane.f32.xlu2 %v3265_v36  ;;  %v640_v30 = vmul.f32 %v6352_v49, %v6220_v14 }
 0xae7   :  { %v6356_v38 = vpop.permute.xlu2 %626  ;;  %v644_v7 = vsel %vm104_vm1, %v640_v30, 0.0 }
 0xae8   :  { %645 = vadd.xlane.f32.xlu1 %v644_v7 }
 0xaea   :  { %v6364_v18 = vpop.permute.xlu0 %2232 }
 0xaef   :  { %v2199_v43 = vpop.permute.xlu2 %2198 }
 0xaf0   :  { %v2254_v51 = vrot.slane %v2199_v43, 7 }
 0xaf2   :  { %v6372_v57 = vpop.permute.xlu0 %2190 }
 0xaf7   :  { %v2201_v5 = vpop.permute.xlu2 %2200 }
 0xaf8   :  { %v2256_v14 = vrot.slane %v2201_v5, 6 }
 0xafa   :  { %v6376_v8 = vpop.permute.xlu0 %2214 }
 0xafd   :  { %3569 = vperm.xlu2 %4392, %v3504_v45  }
 0xaff   :  { %v6359_v52 = vpop.permute.xlu2 %2182 }
 0xb01   :  { %623 = vperm.xlu1 %4393, %v4503_v46  }
 0xb02   :  { %v6380_v9 = vpop.permute.xlu0 %2234 }
 0xb07   :  { %v2197_v40 = vpop.permute.xlu2 %2196 }
 0xb08   :  { %v2255_v47 = vsel %vm7454_vm11, %v2254_v51, %v2197_v40  ;;  %vm7470_vm11 = vmmov %vm7466_vm0 }
 0xb09   :  { %v6368_v22 = vsel %vm7455_vm13, %v2256_v14, %v2255_v47  ;;  %2230 = vrot.lane.b32.xlu1 %v6287_v29, %s4593_s6  ;;  %vm7471_vm13 = vmmov %vm7466_vm0 }
 0xb0a   :  { %v6382_v10 = vpop.permute.xlu0 %2184 }
 0xb0f   :  { %v6384_v13 = vpop.permute.xlu2 %2222 }
 0xb11   :  { %2202 = vrot.lane.b32.xlu1 %v6299_v3, %s4594_s23 }
 0xb17   :  { %v6386_v0 = vpop.permute.xlu2 %2192 }
 0xb19   :  { %2228 = vrot.lane.b32.xlu1 %v6311_v25, %s4593_s6 }
 0xb35   :  { %v3272_v62 = vpop.xlane.xlu0 %3271 }
 0xb36   :  { %v3433_v27 = vperm.slane %v3272_v62, 0  ;;  %v3434_v16 = vperm.slane %v3272_v62, 1  ;;  %v3435_v59 = vperm.slane %v3272_v62, 2  ;;  %v3436_v23 = vperm.slane %v3272_v62, 3 }
 0xb37   :  { %v3437_v12 = vperm.slane %v3272_v62, 4  ;;  %v3438_v26 = vperm.slane %v3272_v62, 5  ;;  %v3439_v4 = vperm.slane %v3272_v62, 6  ;;  %v3440_v15 = vperm.slane %v3272_v62, 7 }
 0xb38   :  { %3505 = vst [vmem:[#allocation1] ss:$9 sm:$0xff] %v3433_v27 }
 0xb39   :  { %3506 = vst [vmem:[#allocation1 + $0x1] ss:$9 sm:$0xff] %v3434_v16 }
 0xb3a   :  { %3507 = vst [vmem:[#allocation1 + $0x2] ss:$9 sm:$0xff] %v3435_v59 }
 0xb3b   :  { %3508 = vst [vmem:[#allocation1 + $0x3] ss:$9 sm:$0xff] %v3436_v23 }
 0xb3c   :  { %3509 = vst [vmem:[#allocation1 + $0x4] ss:$9 sm:$0xff] %v3437_v12 }
 0xb3d   :  { %3510 = vst [vmem:[#allocation1 + $0x5] ss:$9 sm:$0xff] %v3438_v26  ;;  %v3276_v45 = vpop.xlane.xlu0 %3275 }
 0xb3e   :  { %3511 = vst [vmem:[#allocation1 + $0x6] ss:$9 sm:$0xff] %v3439_v4  ;;  %v3449_v46 = vperm.slane %v3276_v45, 0  ;;  %v3450_v51 = vperm.slane %v3276_v45, 1  ;;  %v3451_v40 = vperm.slane %v3276_v45, 2  ;;  %v3452_v47 = vperm.slane %v3276_v45, 3 }
 0xb3f   :  { %3512 = vst [vmem:[#allocation1 + $0x7] ss:$9 sm:$0xff] %v3440_v15  ;;  %v3453_v62 = vperm.slane %v3276_v45, 4  ;;  %v3454_v27 = vperm.slane %v3276_v45, 5  ;;  %v3455_v16 = vperm.slane %v3276_v45, 6  ;;  %v3456_v59 = vperm.slane %v3276_v45, 7 }
 0xb46   :  { %v3513_v19 = vld [vmem:[#allocation1] sm:$0xff] }
 0xb47   :  { %3572 = vperm.xlu0 %4391, %v3513_v19  }
 0xb50   :  { %v3274_v37 = vpop.xlane.xlu2 %3273 }
 0xb51   :  { %v3441_v48 = vperm.slane %v3274_v37, 0  ;;  %v3442_v2 = vperm.slane %v3274_v37, 1  ;;  %v3443_v50 = vperm.slane %v3274_v37, 2  ;;  %v3444_v36 = vperm.slane %v3274_v37, 3 }
 0xb52   :  { %v3445_v30 = vperm.slane %v3274_v37, 4  ;;  %v3446_v7 = vperm.slane %v3274_v37, 5  ;;  %v3447_v43 = vperm.slane %v3274_v37, 6  ;;  %v3448_v5 = vperm.slane %v3274_v37, 7 }
 0xb53   :  { %3514 = vst [vmem:[#allocation1] ss:$9 sm:$0xff] %v3441_v48 }
 0xb54   :  { %3515 = vst [vmem:[#allocation1 + $0x1] ss:$9 sm:$0xff] %v3442_v2 }
 0xb55   :  { %3516 = vst [vmem:[#allocation1 + $0x2] ss:$9 sm:$0xff] %v3443_v50 }
 0xb56   :  { %3517 = vst [vmem:[#allocation1 + $0x3] ss:$9 sm:$0xff] %v3444_v36 }
 0xb57   :  { %3518 = vst [vmem:[#allocation1 + $0x4] ss:$9 sm:$0xff] %v3445_v30 }
 0xb58   :  { %3519 = vst [vmem:[#allocation1 + $0x5] ss:$9 sm:$0xff] %v3446_v7  ;;  %v3278_v12 = vpop.xlane.xlu2 %3277  ;;  %v3280_v7 = vpop.xlane.xlu0 %3279 }
 0xb59   :  { %3520 = vst [vmem:[#allocation1 + $0x6] ss:$9 sm:$0xff] %v3447_v43  ;;  %v3457_v26 = vperm.slane %v3278_v12, 0  ;;  %v3458_v15 = vperm.slane %v3278_v12, 1  ;;  %v3459_v19 = vperm.slane %v3278_v12, 2  ;;  %v3460_v37 = vperm.slane %v3278_v12, 3 }
 0xb5a   :  { %3521 = vst [vmem:[#allocation1 + $0x7] ss:$9 sm:$0xff] %v3448_v5  ;;  %v3461_v48 = vperm.slane %v3278_v12, 4  ;;  %v3462_v50 = vperm.slane %v3278_v12, 5  ;;  %v3463_v36 = vperm.slane %v3278_v12, 6  ;;  %v3464_v30 = vperm.slane %v3278_v12, 7 }
 0xb5b   :  { %v6388_v23 = vpop.xlane.xlu1 %645  ;;  %v3465_v5 = vperm.slane %v3280_v7, 0  ;;  %v3466_v45 = vperm.slane %v3280_v7, 1 }
 0xb5c   :  { %7456 = vst [vmem:[#allocation34_spill] sm:$0xff] %v6388_v23 }
 0xb61   :  { %v3522_v14 = vld [vmem:[#allocation1] sm:$0xff] }
 0xb62   :  { %3523 = vst [vmem:[#allocation1] ss:$9 sm:$0xff] %v3449_v46  ;;  %3575 = vperm.xlu1 %4393, %v3522_v14   ;;  %v3468_v14 = vperm.slane %v3280_v7, 3 }
 0xb63   :  { %3524 = vst [vmem:[#allocation1 + $0x1] ss:$9 sm:$0xff] %v3450_v51  ;;  %v3467_v51 = vperm.slane %v3280_v7, 2 }
 0xb64   :  { %3525 = vst [vmem:[#allocation1 + $0x2] ss:$9 sm:$0xff] %v3451_v40  ;;  %v3469_v40 = vperm.slane %v3280_v7, 4 }
 0xb65   :  { %3526 = vst [vmem:[#allocation1 + $0x3] ss:$9 sm:$0xff] %v3452_v47  ;;  %v3470_v47 = vperm.slane %v3280_v7, 5 }
 0xb66   :  { %3527 = vst [vmem:[#allocation1 + $0x4] ss:$9 sm:$0xff] %v3453_v62 }
 0xb67   :  { %3528 = vst [vmem:[#allocation1 + $0x5] ss:$9 sm:$0xff] %v3454_v27  ;;  %v3471_v27 = vperm.slane %v3280_v7, 6 }
 0xb68   :  { %3529 = vst [vmem:[#allocation1 + $0x6] ss:$9 sm:$0xff] %v3455_v16 }
 0xb69   :  { %3530 = vst [vmem:[#allocation1 + $0x7] ss:$9 sm:$0xff] %v3456_v59  ;;  %v3472_v59 = vperm.slane %v3280_v7, 7 }
 0xb70   :  { %v3531_v4 = vld [vmem:[#allocation1] sm:$0xff] }
 0xb71   :  { %3532 = vst [vmem:[#allocation1] ss:$9 sm:$0xff] %v3457_v26  ;;  %3578 = vperm.xlu2 %4392, %v3531_v4   ;;  %v3282_v26 = vpop.xlane.xlu0 %3281 }
 0xb72   :  { %3533 = vst [vmem:[#allocation1 + $0x1] ss:$9 sm:$0xff] %v3458_v15  ;;  %v2280_v15 = vrot.slane %v6364_v18, 6  ;;  %v3477_v18 = vperm.slane %v3282_v26, 4 }
 0xb73   :  { %3534 = vst [vmem:[#allocation1 + $0x2] ss:$9 sm:$0xff] %v3459_v19  ;;  %v6390_v2 = vpop.permute.xlu1 %623 }
 0xb74   :  { %3535 = vst [vmem:[#allocation1 + $0x3] ss:$9 sm:$0xff] %v3460_v37  ;;  %v2282_v37 = vrot.slane %v6380_v9, 5  ;;  %v3478_v9 = vperm.slane %v3282_v26, 5 }
 0xb75   :  { %3536 = vst [vmem:[#allocation1 + $0x4] ss:$9 sm:$0xff] %v3461_v48 }
 0xb76   :  { %3537 = vst [vmem:[#allocation1 + $0x5] ss:$9 sm:$0xff] %v3462_v50  ;;  %v3473_v50 = vperm.slane %v3282_v26, 0 }
 0xb77   :  { %3538 = vst [vmem:[#allocation1 + $0x6] ss:$9 sm:$0xff] %v3463_v36  ;;  %v3474_v36 = vperm.slane %v3282_v26, 1 }
 0xb78   :  { %3539 = vst [vmem:[#allocation1 + $0x7] ss:$9 sm:$0xff] %v3464_v30 }
 0xb79   :  { %2186 = vrot.lane.b32.xlu2 %v6299_v3, %s4595_s24 }
 0xb7b   :  { %v2231_v43 = vpop.permute.xlu1 %2230 }
 0xb7c   :  { %v2278_v4 = vrot.slane %v2231_v43, 7  ;;  %v3479_v43 = vperm.slane %v3282_v26, 6 }
 0xb7f   :  { %v3540_v46 = vld [vmem:[#allocation1] sm:$0xff] }
 0xb80   :  { %3541 = vst [vmem:[#allocation1] ss:$9 sm:$0xff] %v3465_v5  ;;  %3581 = vperm.xlu0 %4391, %v3540_v46   ;;  %v3475_v5 = vperm.slane %v3282_v26, 2  ;;  %v3480_v46 = vperm.slane %v3282_v26, 7 }
 0xb81   :  { %3542 = vst [vmem:[#allocation1 + $0x1] ss:$9 sm:$0xff] %v3466_v45  ;;  %2206 = vrot.lane.b32.xlu2 %v6287_v29, %s4592_s22  ;;  %v3476_v45 = vperm.slane %v3282_v26, 3 }
 0xb82   :  { %3543 = vst [vmem:[#allocation1 + $0x2] ss:$9 sm:$0xff] %v3467_v51  ;;  %v3284_v51 = vpop.xlane.xlu0 %3283 }
 0xb83   :  { %3544 = vst [vmem:[#allocation1 + $0x3] ss:$9 sm:$0xff] %v3468_v14  ;;  %v2203_v62 = vpop.permute.xlu1 %2202  ;;  %v3481_v14 = vperm.slane %v3284_v51, 0  ;;  %v3487_v26 = vperm.slane %v3284_v51, 6 }
 0xb84   :  { %3545 = vst [vmem:[#allocation1 + $0x4] ss:$9 sm:$0xff] %v3469_v40  ;;  %v2258_v16 = vrot.slane %v2203_v62, 5  ;;  %v3482_v40 = vperm.slane %v3284_v51, 1  ;;  %v3483_v62 = vperm.slane %v3284_v51, 2 }
 0xb85   :  { %3546 = vst [vmem:[#allocation1 + $0x5] ss:$9 sm:$0xff] %v3470_v47 }
 0xb86   :  { %3547 = vst [vmem:[#allocation1 + $0x6] ss:$9 sm:$0xff] %v3471_v27  ;;  %v6398_v12 = vsel %vm7457_vm3, %v2258_v16, %v6368_v22  ;;  %v3484_v27 = vperm.slane %v3284_v51, 3  ;;  %v3485_v16 = vperm.slane %v3284_v51, 4  ;;  %vm7472_vm3 = vmmov %vm7459_vm2 }
 0xb87   :  { %3548 = vst [vmem:[#allocation1 + $0x7] ss:$9 sm:$0xff] %v3472_v59  ;;  %v3486_v59 = vperm.slane %v3284_v51, 5 }
 0xb88   :  { %2224 = vrot.lane.b32.xlu0 %v6279_v39, %s4591_s21 }
 0xb89   :  { %2220 = vrot.lane.b32.xlu2 %v6311_v25, %s4591_s21 }
 0xb8b   :  { %v2229_v19 = vpop.permute.xlu1 %2228 }
 0xb8c   :  { %v2279_v48 = vsel %vm7458_vm12, %v2278_v4, %v2229_v19  ;;  %v3488_v4 = vperm.slane %v3284_v51, 7  ;;  %vm7473_vm12 = vmmov %vm7459_vm2 }
 0xb8d   :  { %v2281_v22 = vsel %vm7423_vm5, %v2280_v15, %v2279_v48  ;;  %v7460_v15 = vld [vmem:[#allocation9_spill] sm:$0xff]  ;;  %v6433_v48 = vpop.permute.xlu2 %3569  ;;  %vm7474_vm5 = vmmov %vm7465_vm4 }
 0xb8e   :  { %v3549_v30 = vld [vmem:[#allocation1] sm:$0xff]  ;;  %v6409_v7 = vsel %vm7459_vm2, %v2282_v37, %v2281_v22  ;;  %v7461_v37 = vld [vmem:[#allocation10_spill] sm:$0xff]  ;;  %vm7476_vm2 = vmmov %vm7466_vm0 }
 0xb8f   :  { %3584 = vperm.xlu1 %4393, %v3549_v30   ;;  %3550 = vst [vmem:[#allocation1] ss:$9 sm:$0xff] %v3473_v50  ;;  %v2272_v30 = vrot.slane %v6384_v13, 7 }
 0xb90   :  { %3551 = vst [vmem:[#allocation1 + $0x1] ss:$9 sm:$0xff] %v3474_v36  ;;  %2180 = vrot.lane.b32.xlu0 %v6311_v25, %s4595_s24 }
 0xb91   :  { %3552 = vst [vmem:[#allocation1 + $0x2] ss:$9 sm:$0xff] %v3475_v5  ;;  %2204 = vrot.lane.b32.xlu2 %v6311_v25, %s4592_s22 }
 0xb92   :  { %3553 = vst [vmem:[#allocation1 + $0x3] ss:$9 sm:$0xff] %v3476_v45 }
 0xb93   :  { %3554 = vst [vmem:[#allocation1 + $0x4] ss:$9 sm:$0xff] %v3477_v18 }
 0xb94   :  { %3555 = vst [vmem:[#allocation1 + $0x5] ss:$9 sm:$0xff] %v3478_v9 }
 0xb95   :  { %3556 = vst [vmem:[#allocation1 + $0x6] ss:$9 sm:$0xff] %v3479_v43 }
 0xb96   :  { %3557 = vst [vmem:[#allocation1 + $0x7] ss:$9 sm:$0xff] %v3480_v46 }
 0xb97   :  { %2216 = vrot.lane.b32.xlu1 %v6279_v39, %s4589_s1 }
 0xb98   :  { %2194 = vrot.lane.b32.xlu0 %v6299_v3, %s4590_s20 }
 0xb9d   :  { %v3558_v47 = vld [vmem:[#allocation1] sm:$0xff] }
 0xb9e   :  { %3587 = vperm.xlu2 %4392, %v3558_v47   ;;  %3559 = vst [vmem:[#allocation1] ss:$9 sm:$0xff] %v3481_v14 }
 0xb9f   :  { %2188 = vrot.lane.b32.xlu1 %v6311_v25, %s4590_s20  ;;  %3560 = vst [vmem:[#allocation1 + $0x1] ss:$9 sm:$0xff] %v3482_v40 }
 0xba0   :  { %2218 = vrot.lane.b32.xlu0 %v6299_v3, %s4589_s1  ;;  %3561 = vst [vmem:[#allocation1 + $0x2] ss:$9 sm:$0xff] %v3483_v62 }
 0xba1   :  { %3562 = vst [vmem:[#allocation1 + $0x3] ss:$9 sm:$0xff] %v3484_v27  ;;  %v2242_v27 = vrot.slane %v6359_v52, 7  ;;  %v2248_v52 = vrot.slane %v6372_v57, 7 }
 0xba2   :  { %3563 = vst [vmem:[#allocation1 + $0x4] ss:$9 sm:$0xff] %v3485_v16  ;;  %v2244_v16 = vrot.slane %v6382_v10, 6 }
 0xba3   :  { %3564 = vst [vmem:[#allocation1 + $0x5] ss:$9 sm:$0xff] %v3486_v59 }
 0xba4   :  { %3565 = vst [vmem:[#allocation1 + $0x6] ss:$9 sm:$0xff] %v3487_v26 }
 0xba5   :  { %3566 = vst [vmem:[#allocation1 + $0x7] ss:$9 sm:$0xff] %v3488_v4 }
 0xba6   :  { %4394 = vset.pattern.permute.xlu2 %v7460_v15 }
 0xba7   :  { %2212 = vrot.lane.b32.xlu1 %v6311_v25, %s4589_s1 }
 0xbac   :  { %v3567_v19 = vld [vmem:[#allocation1] sm:$0xff] }
 0xbad   :  { %3590 = vperm.xlu0 %4391, %v3567_v19   ;;  %v2298_v19 = vrot.slane %v6398_v12, 4  ;;  %v2238_v12 = vrot.slane %v6279_v39, 6 }
 0xbaf   :  { %2226 = vrot.lane.b32.xlu1 %v6299_v3, %s4591_s21 }
 0xbb5   :  { %4395 = vset.pattern.permute.xlu0 %v7461_v37 }
 0xbb7   :  { %2208 = vrot.lane.b32.xlu1 %v6279_v39, %s4592_s22  ;;  %v2266_v39 = vrot.slane %v6376_v8, 7 }
 0xbb9   :  { %v6439_v18 = vpop.permute.xlu0 %3572 }
 0xbbf   :  { %2210 = vrot.lane.b32.xlu1 %v6299_v3, %s4592_s22 }
 0xbcb   :  { %v6435_v50 = vpop.permute.xlu2 %3578 }
 0xbd3   :  { %v2187_v22 = vpop.permute.xlu2 %2186 }
 0xbd4   :  { %v3576_v14 = vpop.permute.xlu1 %3575  ;;  %v2246_v26 = vrot.slane %v2187_v22, 5  ;;  %v2250_v22 = vrot.slane %v6386_v0, 6 }
 0xbdb   :  { %v2207_v36 = vpop.permute.xlu2 %2206 }
 0xbdc   :  { %v2260_v9 = vrot.slane %v2207_v36, 7 }
 0xbe3   :  { %v2221_v5 = vpop.permute.xlu2 %2220 }
 0xbe4   :  { %v2273_v45 = vsel %vm7462_vm6, %v2272_v30, %v2221_v5  ;;  %vm7477_vm6 = vmmov %vm7472_vm3 }
 0xbeb   :  { %v2205_v43 = vpop.permute.xlu2 %2204 }
 0xbec   :  { %v6442_v46 = vsel %vm7463_vm14, %v2260_v9, %v2205_v43  ;;  %v2236_v43 = vrot.slane %v6287_v29, 7  ;;  %v2240_v29 = vrot.slane %v6299_v3, 5  ;;  %vm7478_vm14 = vcmask 130112  }
 0xbee   :  { %v2237_v10 = vsel %vm7468_vm15, %v2236_v43, %v6311_v25 }
 0xbf2   :  { %v3582_v51 = vpop.permute.xlu0 %3581 }
 0xbfa   :  { %v2225_v40 = vpop.permute.xlu0 %2224 }
 0xbfb   :  { %v2274_v47 = vrot.slane %v2225_v40, 6 }
 0xbfd   :  { %v6445_v62 = vsel %vm7464_vm9, %v2274_v47, %v2273_v45  ;;  %vm7479_vm9 = vmmov %vm7478_vm14 }
 0xc01   :  { %v3585_v13 = vpop.permute.xlu1 %3584 }
 0xc02   :  { %v2181_v59 = vpop.permute.xlu0 %2180 }
 0xc03   :  { %v2243_v4 = vsel %vm7465_vm4, %v2242_v27, %v2181_v59  ;;  %vm7480_vm4 = vmmov %vm7479_vm9 }
 0xc04   :  { %v2245_v36 = vsel %vm7466_vm0, %v2244_v16, %v2243_v4  ;;  %v2239_v16 = vsel %vm7470_vm11, %v2238_v12, %v2237_v10  ;;  %v7475_v12 = vld [vmem:[#allocation44_spill] sm:$0xff]  ;;  %vm7481_vm0 = vmmov %vm7474_vm5 }
 0xc05   :  { %v2247_v30 = vsel %vm7467_vm7, %v2246_v26, %v2245_v36  ;;  %v2241_v25 = vsel %vm7473_vm12, %v2240_v29, %v2239_v16  ;;  %v3593_v8 = vperm.slane %v6439_v18, %v7475_v12  ;;  %v3588_v29 = vpop.permute.xlu2 %3587  ;;  %vm7482_vm7 = vmmov %vm7476_vm2 }
 0xc06   :  { %v2299_v5 = vsel %vm508_vm10, %v2298_v19, %v2247_v30  ;;  %vm7483_vm15 = vmmov %vm7480_vm4 }
 0xc07   :  { %v2303_v26 = vperm.slane %v2299_v5, %v5005_v53  ;;  %v3595_v5 = vperm.slane %v3576_v14, %v4760_v24  ;;  %vm7493_vm11 = vmmov %vm7472_vm3 }
 0xc08   :  { %vm7497_vm12 = vmmov %vm7481_vm0 }
 0xc09   :  { %v2217_v9 = vpop.permute.xlu1 %2216  ;;  %v2316_v36 = vrot.slane %v2303_v26, 4 }
 0xc0a   :  { %v2195_v45 = vpop.permute.xlu0 %2194  ;;  %v2268_v43 = vrot.slane %v2217_v9, 6  ;;  %v3596_v9 = vperm.slane %v6435_v50, %v7475_v12  ;;  %v3601_v50 = vperm.slane %v3588_v29, %v4760_v24 }
 0xc0b   :  { %v2252_v40 = vrot.slane %v2195_v45, 5 }
 0xc11   :  { %v2189_v47 = vpop.permute.xlu1 %2188 }
 0xc12   :  { %v2249_v27 = vsel %vm7469_vm8, %v2248_v52, %v2189_v47  ;;  %v2219_v19 = vpop.permute.xlu0 %2218  ;;  %v3599_v47 = vperm.slane %v3585_v13, %v7475_v12  ;;  %v3597_v13 = vsel %vm7478_vm14, %v3596_v9, %v3595_v5  ;;  %vm7484_vm8 = vmmov %vm7472_vm3  ;;  %vm680_vm14 = vcmp.eq.f32.partialorder %v6226_v41, %v6254_v1 }
 0xc13   :  { %v2251_v59 = vsel %vm7471_vm13, %v2250_v22, %v2249_v27  ;;  %v2270_v45 = vrot.slane %v2219_v19, 5  ;;  %v2310_v22 = vrot.slane %v6409_v7, 4  ;;  %v3592_v7 = vperm.slane %v6433_v48, %v4760_v24  ;;  %vm7495_vm13 = vmmov %vm7476_vm2 }
 0xc14   :  { %v2253_v57 = vsel %vm7472_vm3, %v2252_v40, %v2251_v59  ;;  %v3598_v59 = vperm.slane %v3582_v51, %v4760_v24 }
 0xc15   :  { %v2292_v4 = vrot.slane %v2253_v57, 4  ;;  %v3594_v19 = vsel %vm7480_vm4, %v3593_v8, %v3592_v7  ;;  %v7491_v8 = vld [vmem:[#allocation23_spill] sm:$0xff]  ;;  %vm7502_vm4 = vcmp.lt.s32.totalorder %v4760_v24, %v7433_v31 }
 0xc16   :  { %v7492_v9 = vperm.slane %v7491_v8, 0 }
 0xc17   :  { %v2293_v0 = vsel %vm508_vm10, %v2292_v4, %v2241_v25  ;;  %v3600_v4 = vsel %vm7479_vm9, %v3599_v47, %v3598_v59  ;;  %v7489_v47 = vld [vmem:[#allocation38_spill] sm:$0xff]  ;;  %vm7501_vm9 = vcmp.lt.s32.totalorder %v4760_v24, %v7431_v32 }
 0xc18   :  { %v2297_v30 = vperm.slane %v2293_v0, %v5005_v53 }
 0xc19   :  { %v2213_v52 = vpop.permute.xlu1 %2212 }
 0xc1a   :  { %v2318_v10 = vrot.slane %v2297_v30, 4  ;;  %v2267_v3 = vsel %vm7474_vm5, %v2266_v39, %v2213_v52  ;;  %v2317_v40 = vsel %vm508_vm10, %v2316_v36, %v2297_v30  ;;  %vm7498_vm5 = vmmov %vm7476_vm2 }
 0xc1b   :  { %v2269_v27 = vsel %vm7476_vm2, %v2268_v43, %v2267_v3  ;;  %v7485_v43 = vld [vmem:[#allocation22_spill] sm:$0xff]  ;;  %vm7499_vm2 = vmmov %vm7472_vm3 }
 0xc1c   :  { %v2271_v16 = vsel %vm7477_vm6, %v2270_v45, %v2269_v27  ;;  %v2319_v14 = vsel %vm508_vm10, %v2303_v26, %v2318_v10  ;;  %v3604_v26 = vsel %vm7481_vm0, %v3597_v13, %v3594_v19  ;;  %v7486_v52 = vperm.slane %v7485_v43, 0  ;;  %v7487_v10 = vld [vmem:[#allocation28_spill] sm:$0xff] }
 0xc1d   :  { %v2311_v57 = vsel %vm508_vm10, %v2310_v22, %v2271_v16  ;;  %v3605_v0 = vsel %vm7482_vm7, %v3600_v4, %v3604_v26  ;;  %v7488_v3 = vperm.slane %v7487_v10, 0  ;;  %vm7500_vm6 = vcmp.lt.s32.totalorder %v4760_v24, %v7427_v6 }
 0xc1e   :  { %v2315_v19 = vperm.slane %v2311_v57, %v5005_v53  ;;  %v2327_v57 = vperm.slane %v2319_v14, %v5027_v11  ;;  %vm681_vm0 = vcmp.eq.f32.partialorder %v6237_v21, %v6260_v20  ;;  %vm7503_vm7 = vcmp.lt.s32.totalorder %v4760_v24, %v7429_v34 }
 0xc1f   :  { %v3591_v18 = vpop.permute.xlu0 %3590 }
 0xc20   :  { %v3602_v25 = vperm.slane %v3591_v18, %v7475_v12  ;;  %v7490_v12 = vperm.slane %v7489_v47, 0 }
 0xc21   :  { %v2227_v51 = vpop.permute.xlu1 %2226 }
 0xc22   :  { %v3603_v39 = vsel %vm7483_vm15, %v3602_v25, %v3601_v50  ;;  %v2276_v29 = vrot.slane %v2227_v51, 5  ;;  %v7494_v25 = vld [vmem:[#allocation45_spill] sm:$0xff]  ;;  %vm682_vm15 = vcmp.eq.f32.partialorder %v6215_v54, %v6252_v44 }
 0xc23   :  { %v3606_v48 = vsel %vm7484_vm8, %v3603_v39, %v3605_v0  ;;  %vm7504_vm8 = vmmov %vm7497_vm12 }
 0xc24   :  { %v3607_v36 = vrot.slane %v3606_v48, 1  ;;  %v3608_v30 = vrot.slane %v3606_v48, 2  ;;  %v3609_v45 = vrot.slane %v3606_v48, 3  ;;  %v3614_v5 = vmul.f32 %v3606_v48, %v7486_v52 }
 0xc25   :  { %v2277_v13 = vsel %vm7493_vm11, %v2276_v29, %v6445_v62  ;;  %vm7505_vm11 = vmmov %vm7504_vm8 }
 0xc26   :  { %v3615_v22 = vmul.f32 %v3607_v36, %v7488_v3  ;;  %v3616_v27 = vmul.f32 %v3608_v30, %v7490_v12  ;;  %v3617_v16 = vmul.f32 %v3609_v45, %v7492_v9  ;;  %3622 = vst [vmem:[#allocation1] ss:$9 sm:$0xff] %v3614_v5  ;;  %v2304_v0 = vrot.slane %v2277_v13, 4  ;;  %v3713_v13 = vpop.f32.mrf.mxu2 }
 0xc27   :  { %v2323_v30 = vperm.slane %v2317_v40, %v5027_v11  ;;  %v2328_v45 = vrot.slane %v2315_v19, 4  ;;  %v2346_v40 = vrot.slane %v2327_v57, 4 }
 0xc28   :  { %3624 = vst [vmem:[#allocation1 + $0x1] ss:$9 sm:$0xff] %v3615_v22 }
 0xc29   :  { %3626 = vst [vmem:[#allocation1 + $0x2] ss:$9 sm:$0xff] %v3616_v27  ;;  %v2209_v59 = vpop.permute.xlu1 %2208 }
 0xc2a   :  { %3628 = vst [vmem:[#allocation1 + $0x3] ss:$9 sm:$0xff] %v3617_v16  ;;  %v2262_v7 = vrot.slane %v2209_v59, 6 }
 0xc2c   :  { %v2263_v39 = vsel %vm7495_vm13, %v2262_v7, %v6442_v46  ;;  %v2342_v46 = vrot.slane %v2323_v30, 4  ;;  %v3684_v7 = vpop.f32.mrf.mxu1  ;;  %vm7506_vm13 = vmmov %vm7498_vm5 }
 0xc31   :  { %v2211_v4 = vpop.permute.xlu1 %2210  ;;  %v3629_v18 = vld [vmem:[#allocation1] sm:$0xff] }
 0xc32   :  { %v2264_v50 = vrot.slane %v2211_v4, 5  ;;  %v3631_v26 = vsub.f32 %v7494_v25, %v3629_v18 }
 0xc34   :  { %v2265_v48 = vsel %vm7472_vm3, %v2264_v50, %v2263_v39  ;;  %v3769_v36 = vperm.slane %v3631_v26, 1  ;;  %v3782_v12 = vperm.slane %v3631_v26, 2  ;;  %v3756_v16 = vperm.slane %v3631_v26, 0  ;;  %v3687_v18 = vpop.f32.mrf.mxu1  ;;  %vm7507_vm3 = vmmov %vm7498_vm5 }
 0xc35   :  { %v2305_v51 = vsel %vm508_vm10, %v2304_v0, %v2265_v48  ;;  %v3795_v59 = vperm.slane %v3631_v26, 3  ;;  %v3750_v50 = vmax.f32 %v3684_v7, 0.0  ;;  %v3751_v25 = vmax.f32 %v3687_v18, 0.0  ;;  %v3742_v18 = vpop.f32.mrf.mxu3 }
 0xc36   :  { %v2309_v62 = vperm.slane %v2305_v51, %v5005_v53  ;;  %3780 = vperm.xlu0 %4395, %v3769_v36   ;;  %3774 = vperm.xlu2 %4394, %v3769_v36   ;;  %v3752_v0 = vmax.f32 %v3713_v13, 0.0 }
 0xc38   :  { %v2330_v43 = vrot.slane %v2309_v62, 4  ;;  %v2329_v52 = vsel %vm508_vm10, %v2328_v45, %v2309_v62  ;;  %v3655_v45 = vpop.f32.mrf.mxu0 }
 0xc39   :  { %v2335_v5 = vperm.slane %v2329_v52, %v5027_v11 }
 0xc3a   :  { %v2331_v10 = vsel %vm508_vm10, %v2315_v19, %v2330_v43  ;;  %v3716_v19 = vpop.f32.mrf.mxu2 }
 0xc3b   :  { %v2339_v3 = vperm.slane %v2331_v10, %v5027_v11  ;;  %v6519_v22 = vsel %vm508_vm10, %v2335_v5, %v2342_v46  ;;  %v2340_v47 = vrot.slane %v2335_v5, 4  ;;  %v3753_v39 = vmax.f32 %v3716_v19, 0.0 }
 0xc3d   :  { %v2344_v27 = vrot.slane %v2339_v3, 4  ;;  %v6522_v8 = vsel %vm508_vm10, %v2339_v3, %v2346_v40  ;;  %v6525_v14 = vsel %vm508_vm10, %v2340_v47, %v2323_v30 }
 0xc3e   :  { %7496 = vst [vmem:[#allocation35_spill] sm:$0xff] %v6522_v8  ;;  %4397 = vset.pattern.permute.xlu0 %v7460_v15  ;;  %3787 = vperm.xlu2 %4394, %v3782_v12  }
 0xc3f   :  { %v6529_v9 = vsel %vm508_vm10, %v2344_v27, %v2327_v57  ;;  %v3748_v27 = vmax.f32 %v3655_v45, 0.0 }
 0xc40   :  { %v3658_v40 = vpop.f32.mrf.mxu0 }
 0xc46   :  { %4396 = vset.pattern.permute.xlu2 %v7461_v37  ;;  %3761 = vperm.xlu0 %4397, %v3756_v16  }
 0xc4e   :  { %3793 = vperm.xlu2 %4396, %v3782_v12   ;;  %4399 = vset.pattern.permute.xlu0 %v7461_v37 }
 0xc56   :  { %3767 = vperm.xlu2 %4396, %v3756_v16   ;;  %3806 = vperm.xlu0 %4399, %v3795_v59   ;;  %v3749_v16 = vmax.f32 %v3658_v40, 0.0 }
 0xc5e   :  { %4398 = vset.pattern.permute.xlu2 %v7460_v15 }
 0xc66   :  { %3800 = vperm.xlu2 %4398, %v3795_v59  }
 0xc90   :  { %v3775_v29 = vpop.permute.xlu2 %3774 }
 0xc91   :  { %v3810_v51 = vmul.f32 %v3775_v29, %v3750_v50 }
 0xc98   :  { %v3788_v4 = vpop.permute.xlu2 %3787 }
 0xc99   :  { %v3812_v37 = vmul.f32 %v3788_v4, %v3752_v0 }
 0xca8   :  { %v3781_v48 = vpop.permute.xlu0 %3780  ;;  %v3794_v36 = vpop.permute.xlu2 %3793 }
 0xca9   :  { %v3811_v26 = vmul.f32 %v3781_v48, %v3751_v25  ;;  %v3813_v30 = vmul.f32 %v3794_v36, %v3753_v39 }
 0xcab   :  { %v3823_v62 = vadd.f32 %v3811_v26, %v3810_v51  ;;  %v3830_v15 = vadd.f32 %v3813_v30, %v3812_v37  ;;  %v3745_v51 = vpop.f32.mrf.mxu3  ;;  %v3754_v30 = vmax.f32 %v3742_v18, 0.0  ;;  %v6581_v18 = vsel %vm7501_vm9, %v6519_v22, -1e+30 }
 0xcac   :  { %v3755_v45 = vmax.f32 %v3745_v51, 0.0 }
 0xcad   :  { %v3824_v57 = vrot.slane %v3823_v62, 4  ;;  %v3831_v43 = vrot.slane %v3830_v15, 4 }
 0xcaf   :  { %v3825_v52 = vadd.f32 %v3824_v57, %v3823_v62  ;;  %v3832_v5 = vadd.f32 %v3831_v43, %v3830_v15 }
 0xcb0   :  { %v3768_v12 = vpop.permute.xlu2 %3767 }
 0xcb1   :  { %v3826_v46 = vrot.slane %v3825_v52, 2  ;;  %v3833_v3 = vrot.slane %v3832_v5, 2  ;;  %v3809_v13 = vmul.f32 %v3768_v12, %v3749_v16 }
 0xcb3   :  { %v3827_v10 = vadd.f32 %v3826_v46, %v3825_v52  ;;  %v3834_v29 = vadd.f32 %v3833_v3, %v3832_v5 }
 0xcb5   :  { %v3828_v47 = vrot.slane %v3827_v10, 1  ;;  %v3835_v19 = vrot.slane %v3834_v29, 1 }
 0xcb7   :  { %v3829_v59 = vadd.f32 %v3828_v47, %v3827_v10  ;;  %v3836_v0 = vadd.f32 %v3835_v19, %v3834_v29  ;;  %v6587_v19 = vsel %vm7502_vm4, %v6522_v8, -1e+30  ;;  %vm7514_vm4 = vmmov %vm7507_vm3 }
 0xcb8   :  { %v3762_v7 = vpop.permute.xlu0 %3761  ;;  %v2361_v41 = vsel %vm104_vm1, %v6587_v19, -inf }
 0xcb9   :  { %v3808_v4 = vmul.f32 %v3762_v7, %v3748_v27  ;;  %3898 = vrot.lane.b32.xlu1 %v3829_v59, %s4593_s6  ;;  %3866 = vrot.lane.b32.xlu2 %v3829_v59, %s4594_s23  ;;  %v3904_v15 = vrot.slane %v3829_v59, 7  ;;  %v3906_v16 = vrot.slane %v3836_v0, 6 }
 0xcba   :  { %3850 = vrot.lane.b32.xlu0 %v3829_v59, %s4595_s24 }
 0xcbb   :  { %v3816_v50 = vadd.f32 %v3809_v13, %v3808_v4 }
 0xcbd   :  { %v3817_v25 = vrot.slane %v3816_v50, 4 }
 0xcbf   :  { %v3818_v39 = vadd.f32 %v3817_v25, %v3816_v50  ;;  %v684_v50 = vsel %vm680_vm14, %v4760_v24, 16 }
 0xcc0   :  { %v3801_v26 = vpop.permute.xlu2 %3800 }
 0xcc1   :  { %v3819_v48 = vrot.slane %v3818_v39, 2  ;;  %3900 = vrot.lane.b32.xlu1 %v3836_v0, %s4593_s6  ;;  %3868 = vrot.lane.b32.xlu2 %v3836_v0, %s4594_s23  ;;  %v3814_v43 = vmul.f32 %v3801_v26, %v3754_v30  ;;  %v6607_v26 = vsel %vm7503_vm7, %v6525_v14, -1e+30  ;;  %v685_v30 = vsel %vm681_vm0, %v4760_v24, 16 }
 0xcc3   :  { %v3820_v36 = vadd.f32 %v3819_v48, %v3818_v39  ;;  %v6595_v39 = vsel %vm104_vm1, %v684_v50, 2147483647 }
 0xcc4   :  { %v690_v48 = vshra.s32 %v6595_v39, 16 }
 0xcc5   :  { %v3821_v37 = vrot.slane %v3820_v36, 1 }
 0xcc7   :  { %v3822_v62 = vadd.f32 %v3821_v37, %v3820_v36  ;;  %v6598_v36 = vcvt.s32.f32 %v690_v48 }
 0xcc8   :  { %v3807_v57 = vpop.permute.xlu0 %3806 }
 0xcc9   :  { %v3815_v52 = vmul.f32 %v3807_v57, %v3755_v45  ;;  %3858 = vrot.lane.b32.xlu2 %v3829_v59, %s4590_s20  ;;  %3864 = vrot.lane.b32.xlu1 %v3822_v62, %s4594_s23  ;;  %v3905_v5 = vsel %vm7497_vm12, %v3904_v15, %v3822_v62  ;;  %v2352_v45 = vsel %vm104_vm1, %v6607_v26, -inf  ;;  %vm7508_vm12 = vmmov %vm7499_vm2 }
 0xcca   :  { %v3907_v7 = vsel %vm7498_vm5, %v3906_v16, %v3905_v5  ;;  %vm7509_vm5 = vmmov %vm7499_vm2 }
 0xccb   :  { %v3837_v46 = vadd.f32 %v3815_v52, %v3814_v43  ;;  %v686_v43 = vsel %vm682_vm15, %v4760_v24, 16  ;;  %vm7512_vm14 = vmmov %vm7509_vm5 }
 0xccc   :  { %v6622_v5 = vsel %vm104_vm1, %v686_v43, 2147483647  ;;  %vm7516_vm7 = vmmov %vm7509_vm5 }
 0xccd   :  { %v3838_v10 = vrot.slane %v3837_v46, 4  ;;  %vm7517_vm15 = vmmov %vm7507_vm3 }
 0xccf   :  { %v3839_v3 = vadd.f32 %v3838_v10, %v3837_v46  ;;  %v720_v10 = vshra.s32 %v6622_v5, 16 }
 0xcd1   :  { %v3840_v40 = vrot.slane %v3839_v3, 2  ;;  %3882 = vrot.lane.b32.xlu2 %v3829_v59, %s4589_s1  ;;  %3890 = vrot.lane.b32.xlu1 %v3829_v59, %s4591_s21 }
 0xcd3   :  { %v3841_v47 = vadd.f32 %v3840_v40, %v3839_v3 }
 0xcd5   :  { %v3842_v12 = vrot.slane %v3841_v47, 1 }
 0xcd7   :  { %v3843_v27 = vadd.f32 %v3842_v12, %v3841_v47  ;;  %v6626_v47 = vcvt.s32.f32 %v720_v10 }
 0xcd9   :  { %3884 = vrot.lane.b32.xlu1 %v3836_v0, %s4589_s1  ;;  %3902 = vrot.lane.b32.xlu2 %v3843_v27, %s4593_s6  ;;  %v3908_v29 = vrot.slane %v3843_v27, 5 }
 0xcda   :  { %3870 = vrot.lane.b32.xlu0 %v3843_v27, %s4594_s23 }
 0xcdb   :  { %v6549_v13 = vsel %vm7499_vm2, %v3908_v29, %v3907_v7  ;;  %vm7510_vm2 = vmmov %vm7504_vm8 }
 0xcdc   :  { %vm7513_vm9 = vmmov %vm7510_vm2 }
 0xcdd   :  { %vm7515_vm0 = vmmov %vm7510_vm2 }
 0xce1   :  { %3856 = vrot.lane.b32.xlu1 %v3822_v62, %s4590_s20  ;;  %3860 = vrot.lane.b32.xlu2 %v3836_v0, %s4590_s20 }
 0xce2   :  { %3896 = vrot.lane.b32.xlu0 %v3822_v62, %s4593_s6  ;;  %s4601_s6 = smov [#allocation6]  }
 0xce3   :  { %s4249_s23 = sshll.u32 %s4601_s6, 4  ;;  %s4250_s23 = int_to_ptr.vmem [resolvable:$true] %s4249_s23 }
 0xce9   :  { %3880 = vrot.lane.b32.xlu1 %v3822_v62, %s4589_s1  ;;  %3854 = vrot.lane.b32.xlu2 %v3843_v27, %s4595_s24 }
 0xcea   :  { %3852 = vrot.lane.b32.xlu0 %v3836_v0, %s4595_s24 }
 0xcf1   :  { %3894 = vrot.lane.b32.xlu1 %v3843_v27, %s4591_s21  ;;  %3874 = vrot.lane.b32.xlu2 %v3829_v59, %s4592_s22  ;;  %v6571_v59 = vsel %vm7500_vm6, %v6529_v9, -1e+30  ;;  %vm7511_vm6 = vmmov %vm7507_vm3 }
 0xcf2   :  { %3892 = vrot.lane.b32.xlu0 %v3836_v0, %s4591_s21  ;;  %v2358_v4 = vsel %vm104_vm1, %v6571_v59, -inf }
 0xcf9   :  { %3878 = vrot.lane.b32.xlu1 %v3843_v27, %s4592_s22  ;;  %3888 = vrot.lane.b32.xlu2 %v3822_v62, %s4591_s21 }
 0xcfa   :  { %3848 = vrot.lane.b32.xlu0 %v3822_v62, %s4595_s24 }
 0xd01   :  { %3872 = vrot.lane.b32.xlu2 %v3822_v62, %s4592_s22  ;;  %v6613_v62 = vsel %vm104_vm1, %v685_v30, 2147483647 }
 0xd02   :  { %3862 = vrot.lane.b32.xlu0 %v3843_v27, %s4590_s20  ;;  %v705_v57 = vshra.s32 %v6613_v62, 16 }
 0xd04   :  { %v6619_v52 = vcvt.s32.f32 %v705_v57 }
 0xd0a   :  { %3886 = vrot.lane.b32.xlu0 %v3843_v27, %s4589_s1  ;;  %s4238_s1 = sshll.u32 %s4600_s28, 4  ;;  %s4239_s1 = int_to_ptr.vmem [resolvable:$true] %s4238_s1 }
 0xd12   :  { %3876 = vrot.lane.b32.xlu0 %v3836_v0, %s4592_s22  ;;  %v2355_v0 = vsel %vm104_vm1, %v6581_v18, -inf  ;;  %s4240_s22 = sshll.u32 %s7169_s12, 4  ;;  %s4241_s22 = int_to_ptr.hbm [resolvable:$true] %s4240_s22 }
 0xd13   :  { %v3867_v25 = vpop.permute.xlu2 %3866 }
 0xd14   :  { %v3922_v48 = vrot.slane %v3867_v25, 7 }
 0xd1b   :  { %v3869_v51 = vpop.permute.xlu2 %3868 }
 0xd1c   :  { %v3924_v43 = vrot.slane %v3869_v51, 6 }
 0xd23   :  { %2359 = vmax.xlane.f32.xlu1 %v2358_v4  ;;  %v3859_v15 = vpop.permute.xlu2 %3858 }
 0xd24   :  { %v3916_v8 = vrot.slane %v3859_v15, 7 }
 0xd2a   :  { %2356 = vmax.xlane.f32.xlu2 %v2355_v0 }
 0xd2b   :  { %2362 = vmax.xlane.f32.xlu1 %v2361_v41  ;;  %v3899_v37 = vpop.permute.xlu1 %3898  ;;  %v3883_v3 = vpop.permute.xlu2 %3882 }
 0xd2c   :  { %v3851_v46 = vpop.permute.xlu0 %3850 }
 0xd2d   :  { %v3910_v30 = vrot.slane %v3851_v46, 7 }
 0xd33   :  { %693 = vmin.xlane.f32.xlu1 %v6598_v36  ;;  %v3901_v21 = vpop.permute.xlu1 %3900  ;;  %v3903_v12 = vpop.permute.xlu2 %3902 }
 0xd3b   :  { %v3865_v40 = vpop.permute.xlu1 %3864  ;;  %v3861_v29 = vpop.permute.xlu2 %3860 }
 0xd3c   :  { %2353 = vmax.xlane.f32.xlu0 %v2352_v45  ;;  %v3923_v45 = vsel %vm7504_vm8, %v3922_v48, %v3865_v40  ;;  %v3918_v51 = vrot.slane %v3861_v29, 6  ;;  %v3946_v48 = vrot.slane %v3899_v37, 7  ;;  %vm7518_vm8 = vmmov %vm7515_vm0 }
 0xd3d   :  { %v3925_v20 = vsel %vm7506_vm13, %v3924_v43, %v3923_v45  ;;  %v3948_v45 = vrot.slane %v3901_v21, 6  ;;  %vm7520_vm13 = vmmov %vm7507_vm3 }
 0xd43   :  { %v3891_v27 = vpop.permute.xlu1 %3890  ;;  %v3855_v0 = vpop.permute.xlu2 %3854 }
 0xd44   :  { %708 = vmin.xlane.f32.xlu0 %v6619_v52  ;;  %v3914_v63 = vrot.slane %v3855_v0, 5 }
 0xd4b   :  { %v3885_v7 = vpop.permute.xlu1 %3884  ;;  %v3875_v56 = vpop.permute.xlu2 %3874 }
 0xd4c   :  { %723 = vmin.xlane.f32.xlu0 %v6626_v47  ;;  %v3871_v54 = vpop.permute.xlu0 %3870  ;;  %v3936_v43 = vrot.slane %v3885_v7, 6 }
 0xd4d   :  { %v3926_v57 = vrot.slane %v3871_v54, 5 }
 0xd4f   :  { %v3927_v61 = vsel %vm7508_vm12, %v3926_v57, %v3925_v20  ;;  %v3950_v57 = vrot.slane %v3903_v12, 5  ;;  %vm7522_vm12 = vmmov %vm7515_vm0 }
 0xd50   :  { %v3966_v46 = vrot.slane %v3927_v61, 4 }
 0xd53   :  { %v3857_v41 = vpop.permute.xlu1 %3856 }
 0xd54   :  { %v3897_v16 = vpop.permute.xlu0 %3896  ;;  %v3917_v40 = vsel %vm7510_vm2, %v3916_v8, %v3857_v41 }
 0xd55   :  { %v3947_v20 = vsel %vm7513_vm9, %v3946_v48, %v3897_v16 }
 0xd56   :  { %v3949_v29 = vsel %vm7514_vm4, %v3948_v45, %v3947_v20 }
 0xd5b   :  { %v3881_v28 = vpop.permute.xlu1 %3880 }
 0xd5c   :  { %v3853_v4 = vpop.permute.xlu0 %3852 }
 0xd5d   :  { %v3912_v10 = vrot.slane %v3853_v4, 6 }
 0xd63   :  { %v3895_v61 = vpop.permute.xlu1 %3894 }
 0xd64   :  { %v3893_v50 = vpop.permute.xlu0 %3892 }
 0xd6b   :  { %v3879_v48 = vpop.permute.xlu1 %3878 }
 0xd6c   :  { %v3849_v44 = vpop.permute.xlu0 %3848 }
 0xd6d   :  { %v3911_v23 = vsel %vm7505_vm11, %v3910_v30, %v3849_v44  ;;  %v3919_v30 = vsel %vm7511_vm6, %v3918_v51, %v3917_v40  ;;  %v3940_v51 = vrot.slane %v3891_v27, 7  ;;  %vm7519_vm11 = vmmov %vm7509_vm5  ;;  %vm7525_vm6 = vcmp.lt.s32.totalorder %v4760_v24, %v7429_v34 }
 0xd6e   :  { %v3913_v1 = vsel %vm7507_vm3, %v3912_v10, %v3911_v23  ;;  %vm7521_vm3 = vmmov %vm7509_vm5 }
 0xd6f   :  { %v3915_v25 = vsel %vm7509_vm5, %v3914_v63, %v3913_v1  ;;  %v3889_v1 = vpop.permute.xlu2 %3888  ;;  %v3934_v63 = vrot.slane %v3883_v3, 7  ;;  %v3951_v3 = vsel %vm7516_vm7, %v3950_v57, %v3949_v29  ;;  %vm7523_vm5 = vmmov %vm7514_vm4 }
 0xd70   :  { %v3967_v54 = vsel %vm508_vm10, %v3966_v46, %v3915_v25  ;;  %v3942_v46 = vrot.slane %v3893_v50, 6  ;;  %v3978_v7 = vrot.slane %v3951_v3, 4  ;;  %vm7524_vm2 = vmmov %vm7521_vm3 }
 0xd71   :  { %v3971_v23 = vperm.slane %v3967_v54, %v5005_v53  ;;  %v3935_v10 = vsel %vm7515_vm0, %v3934_v63, %v3881_v28 }
 0xd73   :  { %v3984_v41 = vrot.slane %v3971_v23, 4 }
 0xd74   :  { %v3863_v4 = vpop.permute.xlu0 %3862 }
 0xd75   :  { %v3920_v44 = vrot.slane %v3863_v4, 5  ;;  %v3941_v4 = vsel %vm7518_vm8, %v3940_v51, %v3889_v1  ;;  %vm7527_vm8 = vcmp.lt.s32.totalorder %v4760_v24, %v7431_v32 }
 0xd76   :  { %v3943_v28 = vsel %vm7520_vm13, %v3942_v46, %v3941_v4 }
 0xd77   :  { %v3921_v0 = vsel %vm7512_vm14, %v3920_v44, %v3919_v30  ;;  %v3944_v44 = vrot.slane %v3895_v61, 5  ;;  %v3873_v50 = vpop.permute.xlu2 %3872  ;;  %vm7526_vm14 = vcmp.lt.s32.totalorder %v4760_v24, %v7427_v6 }
 0xd78   :  { %v3960_v15 = vrot.slane %v3921_v0, 4  ;;  %v3928_v0 = vrot.slane %v3875_v56, 7 }
 0xd79   :  { %v3945_v27 = vsel %vm7521_vm3, %v3944_v44, %v3943_v28  ;;  %vm7528_vm3 = vcmp.lt.s32.totalorder %v4760_v24, %v7433_v31 }
 0xd7a   :  { %v3961_v8 = vsel %vm508_vm10, %v3960_v15, %v6549_v13  ;;  %v3937_v13 = vsel %vm7517_vm15, %v3936_v43, %v3935_v10  ;;  %v3929_v45 = vsel %vm7522_vm12, %v3928_v0, %v3873_v50  ;;  %v3972_v61 = vrot.slane %v3945_v27, 4 }
 0xd7b   :  { %v3965_v37 = vperm.slane %v3961_v8, %v5005_v53 }
 0xd7c   :  { %v3887_v25 = vpop.permute.xlu0 %3886 }
 0xd7d   :  { %v3986_v16 = vrot.slane %v3965_v37, 4  ;;  %v3938_v40 = vrot.slane %v3887_v25, 5  ;;  %v3985_v21 = vsel %vm508_vm10, %v3984_v41, %v3965_v37 }
 0xd7e   :  { %v3991_v25 = vperm.slane %v3985_v21, %v5027_v11 }
 0xd7f   :  { %v3987_v54 = vsel %vm508_vm10, %v3971_v23, %v3986_v16  ;;  %v3939_v12 = vsel %vm7519_vm11, %v3938_v40, %v3937_v13  ;;  %v3932_v23 = vrot.slane %v3879_v48, 5  ;;  %vm683_vm11 = vcmp.eq.f32.partialorder %v6248_v33, %v6265_v58 }
 0xd80   :  { %v3979_v30 = vsel %vm508_vm10, %v3978_v7, %v3939_v12  ;;  %v6681_v21 = vperm.slane %v3987_v54, %v5027_v11 }
 0xd81   :  { %v3983_v1 = vperm.slane %v3979_v30, %v5005_v53 }
 0xd83   :  { %v3996_v41 = vrot.slane %v3983_v1, 4 }
 0xd84   :  { %v3877_v20 = vpop.permute.xlu0 %3876 }
 0xd85   :  { %v3930_v15 = vrot.slane %v3877_v20, 6 }
 0xd87   :  { %v3931_v63 = vsel %vm7523_vm5, %v3930_v15, %v3929_v45 }
 0xd88   :  { %v3933_v8 = vsel %vm7524_vm2, %v3932_v23, %v3931_v63 }
 0xd89   :  { %v3973_v29 = vsel %vm508_vm10, %v3972_v61, %v3933_v8 }
 0xd8a   :  { %v3977_v37 = vperm.slane %v3973_v29, %v5005_v53 }
 0xd8c   :  { %v3998_v56 = vrot.slane %v3977_v37, 4  ;;  %v3997_v57 = vsel %vm508_vm10, %v3996_v41, %v3977_v37 }
 0xd8d   :  { %v4003_v43 = vperm.slane %v3997_v57, %v5027_v11 }
 0xd8e   :  { %v3999_v10 = vsel %vm508_vm10, %v3983_v1, %v3998_v56 }
 0xd8f   :  { %v4008_v46 = vrot.slane %v4003_v43, 4  ;;  %v6666_v16 = vperm.slane %v3999_v10, %v5027_v11 }
 0xd91   :  { %v6669_v40 = vsel %vm508_vm10, %v4008_v46, %v3991_v25  ;;  %v4012_v51 = vrot.slane %v6666_v16, 4 }
 0xd92   :  { %v6676_v53 = vsel %vm7525_vm6, %v6669_v40, -1e+30  ;;  %vm631_vm6 = vcmp.eq.s32.totalorder %v4760_v24, %v6356_v38 }
 0xd93   :  { %v4020_v3 = vsel %vm104_vm1, %v6676_v53, -inf  ;;  %v6685_v13 = vsel %vm508_vm10, %v4012_v51, %v6681_v21  ;;  %v704_v51 = vand.u32 65535, %v6613_v62  ;;  %v719_v62 = vand.u32 65535, %v6622_v5 }
 0xd94   :  { %4021 = vmax.xlane.f32.xlu0 %v4020_v3  ;;  %v6693_v34 = vsel %vm7526_vm14, %v6685_v13, -1e+30  ;;  %v4010_v3 = vrot.slane %v3991_v25, 4  ;;  %vm629_vm14 = vcmp.eq.s32.totalorder %v4760_v24, %v6342_v42 }
 0xd95   :  { %v4026_v44 = vsel %vm104_vm1, %v6693_v34, -inf }
 0xd96   :  { %v6687_v4 = vpop.xlane.xlu1 %2359 }
 0xd97   :  { %vm2442_vm0 = vcmp.eq.f32.partialorder %v6571_v59, %v6687_v4  ;;  %v2366_v33 = vsub.f32 %v6571_v59, %v6687_v4 }
 0xd98   :  { %v2446_v8 = vsel %vm2442_vm0, %v4760_v24, 16 }
 0xd99   :  { %v6741_v37 = vsel %vm104_vm1, %v2446_v8, 2147483647 }
 0xd9c   :  { %4027 = vmax.xlane.f32.xlu0 %v4026_v44  ;;  %v6755_v44 = vsel %vm508_vm10, %v4003_v43, %v4010_v3  ;;  %v721_v43 = vcvt.s32.f32 %v719_v62 }
 0xd9d   :  { %v6697_v12 = vpop.xlane.xlu2 %2356 }
 0xd9e   :  { %v2365_v11 = vsub.f32 %v6581_v18, %v6697_v12  ;;  %vm2441_vm9 = vcmp.eq.f32.partialorder %v6581_v18, %v6697_v12  ;;  %v6703_v54 = vpop.xlane.xlu1 %2362 }
 0xd9f   :  { %v2445_v7 = vsel %vm2441_vm9, %v4760_v24, 16  ;;  %vm2443_vm4 = vcmp.eq.f32.partialorder %v6587_v19, %v6703_v54  ;;  %v2367_v31 = vsub.f32 %v6587_v19, %v6703_v54 }
 0xda0   :  { %v2370_v6 = vmul.f32 1.442695, %v2365_v11  ;;  %v6709_v28 = vsel %vm104_vm1, %v2445_v7, 2147483647  ;;  %v2447_v50 = vsel %vm2443_vm4, %v4760_v24, 16  ;;  %v706_v11 = vcvt.s32.f32 %v704_v51 }
 0xda1   :  { %v2465_v48 = vshra.s32 %v6709_v28, 16  ;;  %v6716_v18 = vsel %vm104_vm1, %v2447_v50, 2147483647 }
 0xda2   :  { %4449 = vpow2.f32 %v2370_v6  ;;  %v2495_v0 = vshra.s32 %v6716_v18, 16  ;;  %v6761_v6 = vsel %vm7527_vm8, %v6755_v44, -1e+30  ;;  %vm630_vm8 = vcmp.eq.s32.totalorder %v4760_v24, %v6390_v2 }
 0xda3   :  { %v6713_v30 = vcvt.s32.f32 %v2465_v48  ;;  %v4023_v25 = vsel %vm104_vm1, %v6761_v6, -inf }
 0xda4   :  { %v6721_v15 = vcvt.s32.f32 %v2495_v0  ;;  %v2372_v0 = vmul.f32 1.442695, %v2366_v33 }
 0xda5   :  { %2468 = vmin.xlane.f32.xlu1 %v6713_v30 }
 0xda8   :  { %v4450_v27 = vpop.eup %4449 }
 0xda9   :  { %v2379_v20 = vsel %vm104_vm1, %v4450_v27, 0.0 }
 0xdaa   :  { %2380 = vadd.xlane.f32.xlu0 %v2379_v20 }
 0xdad   :  { %2498 = vmin.xlane.f32.xlu1 %v6721_v15 }
 0xdaf   :  { %v6724_v45 = vpop.xlane.xlu0 %2353 }
 0xdb0   :  { %v2364_v23 = vsub.f32 %v6607_v26, %v6724_v45  ;;  %vm2440_vm7 = vcmp.eq.f32.partialorder %v6607_v26, %v6724_v45  ;;  %v2480_v26 = vshra.s32 %v6741_v37, 16 }
 0xdb1   :  { %v2444_v1 = vsel %vm2440_vm7, %v4760_v24, 16 }
 0xdb2   :  { %v2368_v61 = vmul.f32 1.442695, %v2364_v23  ;;  %v6734_v63 = vsel %vm104_vm1, %v2444_v1, 2147483647  ;;  %v6748_v46 = vcvt.s32.f32 %v2480_v26  ;;  %v2374_v23 = vmul.f32 1.442695, %v2367_v31 }
 0xdb3   :  { %v2450_v29 = vshra.s32 %v6734_v63, 16  ;;  %v689_v26 = vand.u32 65535, %v6595_v39  ;;  %v2400_v39 = vmul.f32 %v6352_v49, %v6525_v14  ;;  %v4068_v14 = vmul.f32 %v6352_v49, %v6669_v40 }
 0xdb4   :  { %4451 = vpow2.f32 %v2368_v61 }
 0xdb5   :  { %v6738_v41 = vcvt.s32.f32 %v2450_v29  ;;  %4453 = vpow2.f32 %v2372_v0  ;;  %v6799_v29 = vpop.xlane.xlu1 %693  ;;  %v691_v19 = vcvt.s32.f32 %v689_v26 }
 0xdb6   :  { %4455 = vpow2.f32 %v2374_v23 }
 0xdb7   :  { %2453 = vmin.xlane.f32.xlu2 %v6738_v41  ;;  %v6745_v57 = vpop.xlane.xlu0 %708 }
 0xdb8   :  { %vm710_vm15 = vcmp.eq.f32.partialorder %v6619_v52, %v6745_v57  ;;  %v4014_v52 = vrot.slane %v6681_v21, 4  ;;  %v687_v21 = vsel %vm683_vm11, %v4760_v24, 16 }
 0xdb9   :  { %v711_v7 = vsel %vm710_vm15, %v706_v11, inf }
 0xdba   :  { %v4452_v56 = vpop.eup %4451  ;;  %v6775_v32 = vsel %vm508_vm10, %v6666_v16, %v4014_v52  ;;  %v6789_v16 = vsel %vm104_vm1, %v687_v21, 2147483647  ;;  %vm695_vm10 = vcmp.eq.f32.partialorder %v6598_v36, %v6799_v29  ;;  %v2464_v36 = vand.u32 65535, %v6709_v28 }
 0xdbb   :  { %v2376_v10 = vsel %vm104_vm1, %v4452_v56, 0.0  ;;  %v6781_v5 = vsel %vm7528_vm3, %v6775_v32, -1e+30  ;;  %v735_v27 = vshra.s32 %v6789_v16, 16  ;;  %v4454_v59 = vpop.eup %4453  ;;  %v696_v56 = vsel %vm695_vm10, %v691_v19, inf }
 0xdbc   :  { %2377 = vadd.xlane.f32.xlu1 %v2376_v10  ;;  %v2382_v1 = vsel %vm104_vm1, %v4454_v59, 0.0  ;;  %v4456_v61 = vpop.eup %4455  ;;  %v4072_v28 = vsel %vm104_vm1, %v4068_v14, 0.0 }
 0xdbd   :  { %v6794_v20 = vcvt.s32.f32 %v735_v27  ;;  %v2385_v8 = vsel %vm104_vm1, %v4456_v61, 0.0  ;;  %v2479_v61 = vand.u32 65535, %v6741_v37  ;;  %v715_v37 = vcvt.f32.s32 %v6745_v57 }
 0xdbf   :  { %2483 = vmin.xlane.f32.xlu2 %v6748_v46  ;;  %v6763_v50 = vpop.xlane.xlu0 %723  ;;  %v716_v42 = vshll.u32 %v715_v37, 16 }
 0xdc0   :  { %vm725_vm13 = vcmp.eq.f32.partialorder %v6626_v47, %v6763_v50  ;;  %v4029_v47 = vsel %vm104_vm1, %v6781_v5, -inf }
 0xdc1   :  { %v726_v48 = vsel %vm725_vm13, %v721_v43, inf  ;;  %v2466_v43 = vcvt.s32.f32 %v2464_v36 }
 0xdc4   :  { %712 = vmin.xlane.f32.xlu1 %v711_v7 }
 0xdc7   :  { %4024 = vmax.xlane.f32.xlu2 %v4023_v25  ;;  %v2404_v25 = vsel %vm104_vm1, %v2400_v39, 0.0 }
 0xdcc   :  { %727 = vmin.xlane.f32.xlu1 %v726_v48 }
 0xdcf   :  { %4030 = vmax.xlane.f32.xlu2 %v4029_v47 }
 0xdd7   :  { %738 = vmin.xlane.f32.xlu2 %v6794_v20 }
 0xddf   :  { %2383 = vadd.xlane.f32.xlu2 %v2382_v1 }
 0xde7   :  { %2386 = vadd.xlane.f32.xlu2 %v2385_v8 }
 0xdef   :  { %697 = vmin.xlane.f32.xlu2 %v696_v56  ;;  %v6860_v56 = vsel %vm629_vm14, 1.0, %v7453_v60 }
 0xdf0   :  { %v641_v36 = vmul.f32 %v6860_v56, %v6231_v55 }
 0xe07   :  { %v6804_v10 = vpop.xlane.xlu0 %4021 }
 0xe08   :  { %vm4108_vm12 = vcmp.eq.f32.partialorder %v6676_v53, %v6804_v10  ;;  %v4032_v62 = vsub.f32 %v6676_v53, %v6804_v10 }
 0xe09   :  { %v4112_v51 = vsel %vm4108_vm12, %v4760_v24, 16  ;;  %vm7530_vm12 = vcmask 7168  }
 0xe0a   :  { %v6810_v3 = vsel %vm104_vm1, %v4112_v51, 2147483647  ;;  %v4036_v48 = vmul.f32 1.442695, %v4032_v62 }
 0xe0b   :  { %v4118_v11 = vshra.s32 %v6810_v3, 16 }
 0xe0c   :  { %4457 = vpow2.f32 %v4036_v48 }
 0xe0d   :  { %v6813_v7 = vcvt.s32.f32 %v4118_v11 }
 0xe0f   :  { %4121 = vmin.xlane.f32.xlu1 %v6813_v7  ;;  %v6826_v21 = vpop.xlane.xlu0 %4027 }
 0xe10   :  { %v4034_v53 = vsub.f32 %v6693_v34, %v6826_v21  ;;  %vm4110_vm0 = vcmp.eq.f32.partialorder %v6693_v34, %v6826_v21 }
 0xe12   :  { %v4040_v47 = vmul.f32 1.442695, %v4034_v53  ;;  %v4458_v0 = vpop.eup %4457 }
 0xe13   :  { %v4044_v27 = vsel %vm104_vm1, %v4458_v0, 0.0 }
 0xe14   :  { %4459 = vpow2.f32 %v4040_v47 }
 0xe17   :  { %2405 = vadd.xlane.f32.xlu1 %v2404_v25 }
 0xe18   :  { %v6822_v52 = vpop.xlane.xlu1 %2468 }
 0xe19   :  { %vm2470_vm5 = vcmp.eq.f32.partialorder %v6713_v30, %v6822_v52  ;;  %v2449_v30 = vand.u32 65535, %v6734_v63  ;;  %v6846_v63 = vsel %vm631_vm6, 1.0, %v7453_v60 }
 0xe1a   :  { %v2471_v33 = vsel %vm2470_vm5, %v2466_v43, inf  ;;  %v4460_v40 = vpop.eup %4459  ;;  %v643_v38 = vmul.f32 %v6846_v63, %v6242_v35  ;;  %v4114_v43 = vsel %vm4110_vm0, %v4760_v24, 16  ;;  %vm7531_vm5 = vmmov %vm7530_vm12 }
 0xe1b   :  { %2472 = vmin.xlane.f32.xlu2 %v2471_v33  ;;  %v2451_v49 = vcvt.s32.f32 %v2449_v30  ;;  %v4050_v1 = vsel %vm104_vm1, %v4460_v40, 0.0  ;;  %v6888_v53 = vsel %vm104_vm1, %v4114_v43, 2147483647  ;;  %vm7532_vm6 = vmmov %vm7531_vm5 }
 0xe1c   :  { %v653_v51 = vsel %vm104_vm1, %v643_v38, 0.0  ;;  %v4148_v47 = vshra.s32 %v6888_v53, 16  ;;  %v6916_v38 = vsel %vm630_vm8, 1.0, %v7453_v60  ;;  %vm7537_vm8 = vmmov %vm7531_vm5 }
 0xe1d   :  { %v642_v2 = vmul.f32 %v6916_v38, %v6208_v17 }
 0xe1e   :  { %v6901_v30 = vcvt.s32.f32 %v4148_v47 }
 0xe1f   :  { %4073 = vadd.xlane.f32.xlu1 %v4072_v28 }
 0xe20   :  { %v6835_v31 = vpop.xlane.xlu1 %2498 }
 0xe21   :  { %vm2500_vm11 = vcmp.eq.f32.partialorder %v6721_v15, %v6835_v31 }
 0xe27   :  { %4045 = vadd.xlane.f32.xlu1 %v4044_v27 }
 0xe2a   :  { %v6837_v23 = vpop.xlane.xlu2 %2453 }
 0xe2b   :  { %vm2455_vm2 = vcmp.eq.f32.partialorder %v6738_v41, %v6837_v23  ;;  %v2481_v41 = vcvt.s32.f32 %v2479_v61 }
 0xe2c   :  { %v2456_v59 = vsel %vm2455_vm2, %v2451_v49, inf  ;;  %v734_v49 = vand.u32 65535, %v6789_v16 }
 0xe2d   :  { %2457 = vmin.xlane.f32.xlu0 %v2456_v59  ;;  %v2401_v59 = vmul.f32 %v6860_v56, %v6519_v22 }
 0xe2e   :  { %v736_v40 = vcvt.s32.f32 %v734_v49 }
 0xe2f   :  { %v6848_v8 = vpop.xlane.xlu1 %2377  ;;  %4051 = vadd.xlane.f32.xlu1 %v4050_v1  ;;  %v2407_v16 = vsel %vm104_vm1, %v2401_v59, 0.0 }
 0xe32   :  { %v6852_v26 = vpop.xlane.xlu2 %2483 }
 0xe33   :  { %vm2485_vm9 = vcmp.eq.f32.partialorder %v6748_v46, %v6852_v26  ;;  %v647_v46 = vsel %vm104_vm1, %v641_v36, 0.0 }
 0xe34   :  { %v2486_v19 = vsel %vm2485_vm9, %v2481_v41, inf  ;;  %v2494_v41 = vand.u32 65535, %v6716_v18 }
 0xe35   :  { %2487 = vmin.xlane.f32.xlu0 %v2486_v19  ;;  %v2402_v19 = vmul.f32 %v6916_v38, %v6529_v9 }
 0xe37   :  { %v713_v11 = vpop.xlane.xlu1 %712  ;;  %654 = vadd.xlane.f32.xlu1 %v653_v51  ;;  %v2410_v15 = vsel %vm104_vm1, %v2402_v19, 0.0 }
 0xe38   :  { %v714_v39 = vcvt.f32.s32 %v713_v11 }
 0xe3a   :  { %v6865_v35 = vadd.s32 %v716_v42, %v714_v39  ;;  %v6867_v62 = vpop.xlane.xlu2 %4024 }
 0xe3b   :  { %vm4109_vm4 = vcmp.eq.f32.partialorder %v6761_v6, %v6867_v62  ;;  %v4033_v61 = vsub.f32 %v6761_v6, %v6867_v62  ;;  %v650_v6 = vsel %vm104_vm1, %v642_v2, 0.0  ;;  %v2460_v2 = vcvt.f32.s32 %v6837_v23 }
 0xe3c   :  { %v4113_v57 = vsel %vm4109_vm4, %v4760_v24, 16  ;;  %v2490_v23 = vcvt.f32.s32 %v6852_v26  ;;  %v6984_v26 = vld [vmem:[%s7167_s10] ss:$0 sm:$0xff] }
 0xe3d   :  { %648 = vadd.xlane.f32.xlu0 %v647_v46  ;;  %v6874_v25 = vsel %vm104_vm1, %v4113_v57, 2147483647  ;;  %v4038_v22 = vmul.f32 1.442695, %v4033_v61  ;;  %v7529_v57 = vld [vmem:[#allocation35_spill] sm:$0xff]  ;;  %v2475_v61 = vcvt.f32.s32 %v6822_v52 }
 0xe3e   :  { %v4133_v55 = vshra.s32 %v6874_v25, 16  ;;  %v2403_v46 = vmul.f32 %v6846_v63, %v7529_v57 }
 0xe3f   :  { %4461 = vpow2.f32 %v4038_v22 }
 0xe40   :  { %v6884_v33 = vcvt.s32.f32 %v4133_v55  ;;  %v6937_v55 = vpop.xlane.xlu1 %727  ;;  %v2413_v43 = vsel %vm104_vm1, %v2403_v46, 0.0  ;;  %v2491_v46 = vshll.u32 %v2490_v23, 16 }
 0xe42   :  { %v6880_v48 = vpop.xlane.xlu2 %4030 }
 0xe43   :  { %vm4111_vm7 = vcmp.eq.f32.partialorder %v6781_v5, %v6880_v48  ;;  %v4035_v18 = vsub.f32 %v6781_v5, %v6880_v48  ;;  %v4069_v5 = vmul.f32 %v6860_v56, %v6755_v44 }
 0xe44   :  { %v4115_v14 = vsel %vm4111_vm7, %v4760_v24, 16 }
 0xe45   :  { %4136 = vmin.xlane.f32.xlu0 %v6884_v33  ;;  %v6892_v34 = vsel %vm104_vm1, %v4115_v14, 2147483647  ;;  %v4042_v51 = vmul.f32 1.442695, %v4035_v18  ;;  %v4462_v11 = vpop.eup %4461  ;;  %v4075_v36 = vsel %vm104_vm1, %v4069_v5, 0.0  ;;  %v4117_v14 = vand.u32 65535, %v6810_v3  ;;  %v6952_v3 = vpop.xlane.xlu0 %2380 }
 0xe46   :  { %v4163_v28 = vshra.s32 %v6892_v34, 16  ;;  %v4047_v17 = vsel %vm104_vm1, %v4462_v11, 0.0 }
 0xe47   :  { %4463 = vpow2.f32 %v4042_v51  ;;  %v4119_v44 = vcvt.s32.f32 %v4117_v14 }
 0xe48   :  { %v6896_v0 = vcvt.s32.f32 %v4163_v28 }
 0xe4a   :  { %4166 = vmin.xlane.f32.xlu2 %v6896_v0  ;;  %v6899_v27 = vpop.xlane.xlu2 %738 }
 0xe4b   :  { %vm740_vm15 = vcmp.eq.f32.partialorder %v6794_v20, %v6899_v27  ;;  %v2496_v20 = vcvt.s32.f32 %v2494_v41 }
 0xe4c   :  { %v741_v1 = vsel %vm740_vm15, %v736_v40, inf }
 0xe4d   :  { %4151 = vmin.xlane.f32.xlu0 %v6901_v30  ;;  %v2501_v37 = vsel %vm2500_vm11, %v2496_v20, inf  ;;  %v4464_v42 = vpop.eup %4463  ;;  %vm7540_vm11 = vmmov %vm7531_vm5 }
 0xe4e   :  { %v4053_v39 = vsel %vm104_vm1, %v4464_v42, 0.0 }
 0xe52   :  { %742 = vmin.xlane.f32.xlu2 %v741_v1  ;;  %v6933_v9 = vpop.xlane.xlu2 %2383 }
 0xe55   :  { %2408 = vadd.xlane.f32.xlu0 %v2407_v16  ;;  %v2476_v16 = vshll.u32 %v2475_v61, 16  ;;  %v6992_v61 = vld [vmem:[%s7162_s5 + $0x10] sm:$0xff] }
 0xe5a   :  { %2502 = vmin.xlane.f32.xlu2 %v2501_v37  ;;  %v6941_v28 = vpop.xlane.xlu2 %2386 }
 0xe5d   :  { %651 = vadd.xlane.f32.xlu0 %v650_v6  ;;  %v2461_v6 = vshll.u32 %v2460_v2, 16 }
 0xe62   :  { %2411 = vadd.xlane.f32.xlu2 %v2410_v15  ;;  %v698_v40 = vpop.xlane.xlu2 %697 }
 0xe65   :  { %4048 = vadd.xlane.f32.xlu0 %v4047_v17  ;;  %v6969_v17 = vld [vmem:[%s7167_s10 + $0x1] ss:$0 sm:$0xff] }
 0xe6d   :  { %4054 = vadd.xlane.f32.xlu0 %v4053_v39  ;;  %v6975_v39 = vld [vmem:[%s7162_s5] sm:$0xff] }
 0xe75   :  { %4076 = vadd.xlane.f32.xlu0 %v4075_v36 }
 0xe7d   :  { %2414 = vadd.xlane.f32.xlu0 %v2413_v43 }
 0xe82   :  { %v6943_v47 = vpop.xlane.xlu1 %4121 }
 0xe83   :  { %vm4123_vm13 = vcmp.eq.f32.partialorder %v6813_v7, %v6943_v47  ;;  %v6958_v7 = vld [vmem:[%s7162_s5 + $0x8] sm:$0xff] }
 0xe84   :  { %v4124_v56 = vsel %vm4123_vm13, %v4119_v44, inf  ;;  %vm749_vm4 = vcmp.eq.s32.totalorder %v6865_v35, %v6958_v7 }
 0xe85   :  { %4125 = vmin.xlane.f32.xlu2 %v4124_v56  ;;  %v4286_v35 = vsel %vm749_vm4, 1.0, %v7453_v60 }
 0xe8a   :  { %v6947_v49 = vpop.xlane.xlu1 %2405 }
 0xe8e   :  { %v2473_v1 = vpop.xlane.xlu2 %2472 }
 0xe8f   :  { %v2474_v41 = vcvt.f32.s32 %v2473_v1 }
 0xe91   :  { %v2477_v20 = vadd.s32 %v2476_v16, %v2474_v41  ;;  %v6999_v16 = vld [vmem:[%s7167_s10 + $0x2] ss:$0 sm:$0xff] }
 0xe92   :  { %v6949_v59 = vpop.xlane.xlu1 %4073 }
 0xe93   :  { %vm2509_vm3 = vcmp.eq.s32.totalorder %v2477_v20, %v6958_v7 }
 0xe94   :  { %v4319_v19 = vsel %vm2509_vm3, 1.0, %v7453_v60  ;;  %vm7542_vm3 = vmmov %vm7531_vm5 }
 0xe95   :  { %v2521_v42 = vmul.f32 %v6969_v17, %v4319_v19 }
 0xe97   :  { %v2525_v43 = vsel %vm7530_vm12, %v2521_v42, 0.0 }
 0xe9a   :  { %v4046_v22 = vpop.xlane.xlu1 %4045 }
 0xe9b   :  { %4465 = vlog2.f32 %v4046_v22 }
 0xea0   :  { %v2458_v37 = vpop.xlane.xlu0 %2457 }
 0xea1   :  { %v4466_v18 = vpop.eup %4465  ;;  %v2459_v52 = vcvt.f32.s32 %v2458_v37  ;;  %v700_v37 = vcvt.f32.s32 %v6799_v29  ;;  %v7534_v29 = vld [vmem:[#allocation53_spill] sm:$0xff] }
 0xea2   :  { %v4057_v51 = vmul.f32 0.6931472, %v4466_v18 }
 0xea3   :  { %v2462_v11 = vadd.s32 %v2461_v6, %v2459_v52  ;;  %v699_v6 = vcvt.f32.s32 %v698_v40  ;;  %v4132_v52 = vand.u32 65535, %v6874_v25  ;;  %v701_v19 = vshll.u32 %v700_v37, 16 }
 0xea4   :  { %v6963_v15 = vadd.f32 %v4057_v51, %v6804_v10  ;;  %v730_v51 = vcvt.f32.s32 %v6763_v50  ;;  %v729_v40 = vcvt.f32.s32 %v6937_v55  ;;  %v4147_v50 = vand.u32 65535, %v6888_v53  ;;  %v7536_v53 = vld [vmem:[#allocation14_spill] sm:$0xff] }
 0xea5   :  { %vm2508_vm10 = vcmp.eq.s32.totalorder %v2462_v11, %v6975_v39  ;;  %v702_v11 = vadd.s32 %v701_v19, %v699_v6  ;;  %v4134_v42 = vcvt.s32.f32 %v4132_v52  ;;  %v761_v19 = vmul.f32 %v6969_v17, %v4286_v35 }
 0xea6   :  { %v4084_v10 = vsub.f32 %v6963_v15, %v6949_v59  ;;  %v4318_v5 = vsel %vm2508_vm10, 1.0, %v7453_v60  ;;  %v731_v25 = vshll.u32 %v730_v51, 16 }
 0xea7   :  { %v2520_v36 = vmul.f32 %v6984_v26, %v4318_v5  ;;  %v7533_v5 = vld [vmem:[#allocation52_spill] sm:$0xff]  ;;  %vm748_vm9 = vcmp.eq.s32.totalorder %v702_v11, %v6975_v39 }
 0xea8   :  { %v2488_v57 = vpop.xlane.xlu0 %2487  ;;  %4467 = vlog2.f32 %v7533_v5  ;;  %v4285_v55 = vsel %vm748_vm9, 1.0, %v7453_v60 }
 0xea9   :  { %v2524_v14 = vsel %vm7531_vm5, %v2520_v36, 0.0  ;;  %v2489_v44 = vcvt.f32.s32 %v2488_v57  ;;  %v4162_v36 = vand.u32 65535, %v6892_v34  ;;  %4469 = vlog2.f32 %v7534_v29 }
 0xeaa   :  { %v2526_v56 = vadd.f32 %v2525_v43, %v2524_v14  ;;  %v7535_v14 = vld [vmem:[#allocation13_spill] sm:$0xff]  ;;  %v4071_v29 = vmul.f32 %v6846_v63, %v6775_v32  ;;  %v2505_v32 = vcvt.f32.s32 %v6835_v31 }
 0xeab   :  { %v2492_v1 = vadd.s32 %v2491_v46, %v2489_v44  ;;  %v4164_v43 = vcvt.s32.f32 %v4162_v36  ;;  %4471 = vlog2.f32 %v7535_v14  ;;  %v765_v14 = vsel %vm7540_vm11, %v761_v19, 0.0 }
 0xeac   :  { %4473 = vlog2.f32 %v6952_v3  ;;  %v760_v3 = vmul.f32 %v6984_v26, %v4285_v55 }
 0xead   :  { %vm2510_vm2 = vcmp.eq.s32.totalorder %v2492_v1, %v6992_v61  ;;  %4475 = vlog2.f32 %v7536_v53 }
 0xeae   :  { %v4320_v41 = vsel %vm2510_vm2, 1.0, %v7453_v60  ;;  %v4468_v34 = vpop.eup %4467  ;;  %4477 = vlog2.f32 %v6848_v8  ;;  %v4070_v8 = vmul.f32 %v6916_v38, %v6685_v13  ;;  %v764_v5 = vsel %vm7537_vm8, %v760_v3, 0.0  ;;  %v7539_v13 = vld [vmem:[#allocation48_spill] sm:$0xff] }
 0xeaf   :  { %v2522_v22 = vmul.f32 %v6999_v16, %v4320_v41  ;;  %v4149_v41 = vcvt.s32.f32 %v4147_v50  ;;  %v605_v37 = vmul.f32 0.6931472, %v4468_v34  ;;  %4479 = vlog2.f32 %v6933_v9  ;;  %v7059_v9 = vld [vmem:[%s7162_s5 + $0x18] sm:$0xff] }
 0xeb0   :  { %v7002_v20 = vpop.xlane.xlu0 %648  ;;  %v4078_v50 = vsel %vm104_vm1, %v4070_v8, 0.0 }
 0xeb1   :  { %v2527_v2 = vsel %vm7532_vm6, %v2522_v22, 0.0  ;;  %v7039_v22 = vpop.xlane.xlu1 %4051 }
 0xeb2   :  { %v7006_v18 = vadd.f32 %v2527_v2, %v2526_v56  ;;  %v4470_v56 = vpop.eup %4469 }
 0xeb3   :  { %v607_v6 = vmul.f32 0.6931472, %v4470_v56  ;;  %v4472_v52 = vpop.eup %4471  ;;  %v766_v56 = vadd.f32 %v765_v14, %v764_v5 }
 0xeb4   :  { %v4474_v51 = vpop.eup %4473  ;;  %v609_v35 = vmul.f32 0.6931472, %v4472_v52 }
 0xeb5   :  { %v613_v38 = vadd.f32 %v607_v6, %v7539_v13 }
 0xeb7   :  { %v657_v63 = vsub.f32 %v613_v38, %v7002_v20  ;;  %v7068_v20 = vld [vmem:[%s7167_s10 + $0x3] ss:$0 sm:$0xff] }
 0xeb8   :  { %v7010_v23 = vpop.xlane.xlu0 %4136 }
 0xeb9   :  { %vm4138_vm14 = vcmp.eq.f32.partialorder %v6884_v33, %v7010_v23  ;;  %v732_v33 = vadd.s32 %v731_v25, %v729_v40  ;;  %v655_v31 = vpop.xlane.xlu1 %654 }
 0xeba   :  { %v4139_v57 = vsel %vm4138_vm14, %v4134_v42, inf  ;;  %v4476_v42 = vpop.eup %4475 }
 0xebb   :  { %4140 = vmin.xlane.f32.xlu1 %v4139_v57  ;;  %vm750_vm15 = vcmp.eq.s32.totalorder %v732_v33, %v6992_v61  ;;  %v4478_v40 = vpop.eup %4477  ;;  %v7538_v57 = vld [vmem:[#allocation49_spill] sm:$0xff] }
 0xebc   :  { %v612_v25 = vadd.f32 %v605_v37, %v7538_v57  ;;  %v2389_v53 = vmul.f32 0.6931472, %v4478_v40  ;;  %v4480_v19 = vpop.eup %4479 }
 0xebd   :  { %v7020_v46 = vpop.xlane.xlu2 %4166  ;;  %v2393_v38 = vmul.f32 0.6931472, %v4480_v19 }
 0xebe   :  { %vm4168_vm0 = vcmp.eq.f32.partialorder %v6896_v0, %v7020_v46  ;;  %v745_v0 = vcvt.f32.s32 %v6899_v27 }
 0xebf   :  { %v4169_v44 = vsel %vm4168_vm0, %v4164_v43, inf  ;;  %v2391_v43 = vmul.f32 0.6931472, %v4474_v51  ;;  %v2506_v51 = vshll.u32 %v2505_v32, 16 }
 0xec0   :  { %4170 = vmin.xlane.f32.xlu2 %v4169_v44  ;;  %v7030_v1 = vpop.xlane.xlu0 %4151  ;;  %v746_v27 = vshll.u32 %v745_v0, 16  ;;  %v611_v44 = vmul.f32 0.6931472, %v4476_v42  ;;  %v7541_v0 = vld [vmem:[#allocation34_spill] sm:$0xff] }
 0xec1   :  { %vm4153_vm7 = vcmp.eq.f32.partialorder %v6901_v30, %v7030_v1  ;;  %v4287_v30 = vsel %vm750_vm15, 1.0, %v7453_v60  ;;  %v656_v3 = vsub.f32 %v612_v25, %v7541_v0  ;;  %v2397_v6 = vadd.f32 %v2391_v43, %v6697_v12  ;;  %v7544_v12 = vld [vmem:[#allocation47_spill] sm:$0xff] }
 0xec2   :  { %v4154_v2 = vsel %vm4153_vm7, %v4149_v41, inf  ;;  %v762_v33 = vmul.f32 %v6999_v16, %v4287_v30  ;;  %v4081_v41 = vsel %vm104_vm1, %v4071_v29, 0.0  ;;  %v615_v52 = vadd.f32 %v611_v44, %v6265_v58  ;;  %vm7543_vm1 = vmmov %vm7542_vm3 }
 0xec3   :  { %4155 = vmin.xlane.f32.xlu1 %v4154_v2  ;;  %v661_v30 = vmul.f32 %v6969_v17, %v657_v63  ;;  %v660_v40 = vmul.f32 %v6984_v26, %v656_v3  ;;  %v614_v25 = vadd.f32 %v609_v35, %v7544_v12  ;;  %vm7545_vm10 = vmmov %vm7543_vm1 }
 0xec4   :  { %v767_v8 = vsel %vm7542_vm3, %v762_v33, 0.0  ;;  %v659_v57 = vsub.f32 %v615_v52, %v655_v31  ;;  %vm7546_vm5 = vmmov %vm7543_vm1 }
 0xec5   :  { %v743_v11 = vpop.xlane.xlu2 %742  ;;  %v768_v42 = vadd.f32 %v767_v8, %v766_v56  ;;  %v665_v14 = vsel %vm7545_vm10, %v661_v30, 0.0  ;;  %vm7547_vm2 = vmmov %vm7543_vm1 }
 0xec6   :  { %v744_v36 = vcvt.f32.s32 %v743_v11  ;;  %vm7548_vm6 = vmmov %vm7543_vm1 }
 0xec7   :  { %vm7549_vm14 = vmmov %vm7543_vm1 }
 0xec8   :  { %v747_v34 = vadd.s32 %v746_v27, %v744_v36  ;;  %4079 = vadd.xlane.f32.xlu2 %v4078_v50  ;;  %v2409_v55 = vpop.xlane.xlu0 %2408  ;;  %v2396_v27 = vadd.f32 %v2389_v53, %v6724_v45  ;;  %v2398_v53 = vadd.f32 %v2393_v38, %v6687_v4  ;;  %vm7550_vm9 = vmmov %vm7543_vm1 }
 0xec9   :  { %v2417_v5 = vsub.f32 %v2397_v6, %v2409_v55  ;;  %v663_v55 = vmul.f32 %v7068_v20, %v659_v57  ;;  %vm7551_vm4 = vmmov %vm7543_vm1 }
 0xeca   :  { %vm751_vm13 = vcmp.eq.s32.totalorder %v747_v34, %v7059_v9  ;;  %v2416_v50 = vsub.f32 %v2396_v27, %v6947_v49  ;;  %v664_v34 = vsel %vm7546_vm5, %v660_v40, 0.0  ;;  %vm7552_vm0 = vmmov %vm7543_vm1  ;;  %v4088_v40 = vmul.f32 %v6984_v26, %v4084_v10 }
 0xecb   :  { %v4288_v2 = vsel %vm751_vm13, 1.0, %v7453_v60  ;;  %4082 = vadd.xlane.f32.xlu1 %v4081_v41  ;;  %v2421_v45 = vmul.f32 %v6969_v17, %v2417_v5  ;;  %v666_v63 = vadd.f32 %v665_v14, %v664_v34  ;;  %vm7553_vm7 = vmmov %vm7552_vm0  ;;  %v4128_v10 = vcvt.f32.s32 %v6943_v47 }
 0xecc   :  { %v763_v37 = vmul.f32 %v7068_v20, %v4288_v2  ;;  %v2420_v49 = vmul.f32 %v6984_v26, %v2416_v50  ;;  %vm7554_vm15 = vmmov %vm7552_vm0  ;;  %v4158_v47 = vcvt.f32.s32 %v7030_v1 }
 0xecd   :  { %v2503_v11 = vpop.xlane.xlu2 %2502  ;;  %v2425_v0 = vsel %vm7548_vm6, %v2421_v45, 0.0  ;;  %vm7555_vm8 = vmmov %vm7552_vm0  ;;  %v4129_v45 = vshll.u32 %v4128_v10, 16 }
 0xece   :  { %v2504_v36 = vcvt.f32.s32 %v2503_v11  ;;  %v769_v29 = vsel %vm7543_vm1, %v763_v37, 0.0  ;;  %v669_v37 = vsel %vm7550_vm9, %v663_v55, 0.0  ;;  %v2424_v8 = vsel %vm7551_vm4, %v2420_v49, 0.0  ;;  %vm7556_vm3 = vmmov %vm7552_vm0 }
 0xecf   :  { %v770_v13 = vadd.f32 %v769_v29, %v768_v42  ;;  %v2426_v4 = vadd.f32 %v2425_v0, %v2424_v8  ;;  %v4143_v55 = vcvt.f32.s32 %v7010_v23  ;;  %v4173_v49 = vcvt.f32.s32 %v7020_v46  ;;  %vm7557_vm1 = vmmov %vm7552_vm0 }
 0xed0   :  { %v2507_v58 = vadd.s32 %v2506_v51, %v2504_v36  ;;  %v652_v43 = vpop.xlane.xlu0 %651  ;;  %vm7558_vm5 = vmmov %vm7552_vm0  ;;  %vm2540_vm9 = vcmp.eq.s32.totalorder %v4760_v24, 1  ;;  %vm780_vm4 = vcmp.eq.s32.totalorder %v4760_v24, 0 }
 0xed1   :  { %v658_v33 = vsub.f32 %v614_v25, %v652_v43  ;;  %771 = vadd.xlane.f32.xlu2 %v770_v13  ;;  %v4092_v13 = vsel %vm7553_vm7, %v4088_v40, 0.0  ;;  %vm7560_vm6 = vmmov %vm7552_vm0  ;;  %vm7562_vm7 = vcmask 16384  }
 0xed2   :  { %vm2511_vm12 = vcmp.eq.s32.totalorder %v2507_v58, %v7059_v9 }
 0xed3   :  { %v4321_v44 = vsel %vm2511_vm12, 1.0, %v7453_v60  ;;  %v662_v32 = vmul.f32 %v6999_v16, %v658_v33 }
 0xed4   :  { %v2523_v56 = vmul.f32 %v7068_v20, %v4321_v44  ;;  %v4144_v44 = vshll.u32 %v4143_v55, 16 }
 0xed5   :  { %v667_v41 = vsel %vm7547_vm2, %v662_v32, 0.0  ;;  %v2412_v35 = vpop.xlane.xlu2 %2411  ;;  %vm7559_vm2 = vmmov %vm7552_vm0 }
 0xed6   :  { %v668_v3 = vadd.f32 %v667_v41, %v666_v63  ;;  %v2418_v2 = vsub.f32 %v2398_v53, %v2412_v35  ;;  %v2529_v31 = vsel %vm7549_vm14, %v2523_v56, 0.0  ;;  %vm7561_vm14 = vmmov %vm7552_vm0 }
 0xed7   :  { %v2530_v6 = vadd.f32 %v2529_v31, %v7006_v18 }
 0xed8   :  { %v2422_v19 = vmul.f32 %v6999_v16, %v2418_v2  ;;  %v4049_v51 = vpop.xlane.xlu0 %4048  ;;  %v670_v52 = vadd.f32 %v669_v37, %v668_v3  ;;  %v4159_v37 = vshll.u32 %v4158_v47, 16 }
 0xed9   :  { %4481 = vlog2.f32 %v4049_v51 }
 0xeda   :  { %v2427_v30 = vsel %vm7552_vm0, %v2422_v19, 0.0  ;;  %671 = vadd.xlane.f32.xlu0 %v670_v52  ;;  %4483 = vlog2.f32 %v6941_v28  ;;  %vm4208_vm0 = vcmp.eq.s32.totalorder %v4760_v24, 2 }
 0xedb   :  { %v2428_v11 = vadd.f32 %v2427_v30, %v2426_v4  ;;  %4485 = vlog2.f32 %v7039_v22  ;;  %v4174_v22 = vshll.u32 %v4173_v49, 16 }
 0xedf   :  { %v4482_v42 = vpop.eup %4481 }
 0xee0   :  { %v4055_v27 = vpop.xlane.xlu0 %4054  ;;  %v4059_v5 = vmul.f32 0.6931472, %v4482_v42  ;;  %v4484_v36 = vpop.eup %4483 }
 0xee1   :  { %v2395_v12 = vmul.f32 0.6931472, %v4484_v36  ;;  %4487 = vlog2.f32 %v4055_v27  ;;  %v4486_v53 = vpop.eup %4485 }
 0xee2   :  { %2531 = vadd.xlane.f32.xlu0 %v2530_v6  ;;  %v4065_v18 = vadd.f32 %v4059_v5, %v6867_v62  ;;  %v4061_v46 = vmul.f32 0.6931472, %v4486_v53 }
 0xee3   :  { %v2399_v50 = vadd.f32 %v2395_v12, %v6703_v54 }
 0xee4   :  { %v4066_v52 = vadd.f32 %v4061_v46, %v6826_v21 }
 0xee7   :  { %v4488_v3 = vpop.eup %4487 }
 0xee8   :  { %v4077_v29 = vpop.xlane.xlu0 %4076 }
 0xee9   :  { %v4085_v57 = vsub.f32 %v4065_v18, %v4077_v29 }
 0xeeb   :  { %v4089_v25 = vmul.f32 %v6969_v17, %v4085_v57 }
 0xeed   :  { %v4093_v38 = vsel %vm7554_vm15, %v4089_v25, 0.0  ;;  %vm7563_vm15 = vmmov %vm7562_vm7 }
 0xeee   :  { %v4094_v28 = vadd.f32 %v4093_v38, %v4092_v13 }
 0xef0   :  { %v2415_v58 = vpop.xlane.xlu0 %2414 }
 0xef1   :  { %v2419_v62 = vsub.f32 %v2399_v50, %v2415_v58 }
 0xef3   :  { %v2423_v43 = vmul.f32 %v7068_v20, %v2419_v62 }
 0xef5   :  { %v2429_v14 = vsel %vm7555_vm8, %v2423_v43, 0.0 }
 0xef6   :  { %v2430_v59 = vadd.f32 %v2429_v14, %v2428_v11 }
 0xef8   :  { %2431 = vadd.xlane.f32.xlu1 %v2430_v59  ;;  %v4126_v15 = vpop.xlane.xlu2 %4125 }
 0xef9   :  { %v4127_v33 = vcvt.f32.s32 %v4126_v15 }
 0xefb   :  { %v4130_v34 = vadd.s32 %v4129_v45, %v4127_v33 }
 0xefd   :  { %vm4176_vm11 = vcmp.eq.s32.totalorder %v4130_v34, %v6975_v39 }
 0xefe   :  { %v4347_v63 = vsel %vm4176_vm11, 1.0, %v7453_v60 }
 0xeff   :  { %v4188_v41 = vmul.f32 %v6984_v26, %v4347_v63  ;;  %v4063_v26 = vmul.f32 0.6931472, %v4488_v3 }
 0xf01   :  { %v4192_v6 = vsel %vm7556_vm3, %v4188_v41, 0.0  ;;  %v4067_v27 = vadd.f32 %v4063_v26, %v6880_v48 }
 0xf2e   :  { %v4141_v54 = vpop.xlane.xlu1 %4140 }
 0xf2f   :  { %v4142_v32 = vcvt.f32.s32 %v4141_v54 }
 0xf31   :  { %v4145_v56 = vadd.s32 %v4144_v44, %v4142_v32 }
 0xf33   :  { %vm4177_vm13 = vcmp.eq.s32.totalorder %v4145_v56, %v6958_v7  ;;  %v4171_v23 = vpop.xlane.xlu2 %4170 }
 0xf34   :  { %v4348_v39 = vsel %vm4177_vm13, 1.0, %v7453_v60  ;;  %v4172_v35 = vcvt.f32.s32 %v4171_v23 }
 0xf35   :  { %v4189_v0 = vmul.f32 %v6969_v17, %v4348_v39 }
 0xf36   :  { %v4175_v2 = vadd.s32 %v4174_v22, %v4172_v35  ;;  %v4156_v31 = vpop.xlane.xlu1 %4155 }
 0xf37   :  { %v4193_v1 = vsel %vm7557_vm1, %v4189_v0, 0.0  ;;  %v4157_v8 = vcvt.f32.s32 %v4156_v31 }
 0xf38   :  { %vm4179_vm10 = vcmp.eq.s32.totalorder %v4175_v2, %v7059_v9  ;;  %v4194_v7 = vadd.f32 %v4193_v1, %v4192_v6 }
 0xf39   :  { %v4160_v19 = vadd.s32 %v4159_v37, %v4157_v8  ;;  %v4350_v51 = vsel %vm4179_vm10, 1.0, %v7453_v60 }
 0xf3a   :  { %v4191_v11 = vmul.f32 %v7068_v20, %v4350_v51  ;;  %v4322_v51 = vsel %vm2540_vm9, 1.0, %v7453_v60 }
 0xf3b   :  { %vm4178_vm12 = vcmp.eq.s32.totalorder %v4160_v19, %v6992_v61  ;;  %v4080_v17 = vpop.xlane.xlu2 %4079 }
 0xf3c   :  { %v4349_v4 = vsel %vm4178_vm12, 1.0, %v7453_v60  ;;  %v4086_v30 = vsub.f32 %v4066_v52, %v4080_v17  ;;  %v4197_v57 = vsel %vm7560_vm6, %v4191_v11, 0.0 }
 0xf3d   :  { %v4190_v42 = vmul.f32 %v6999_v16, %v4349_v4  ;;  %v4289_v4 = vsel %vm780_vm4, 1.0, %v7453_v60 }
 0xf3e   :  { %v4090_v9 = vmul.f32 %v6999_v16, %v4086_v30  ;;  %v4083_v5 = vpop.xlane.xlu1 %4082 }
 0xf3f   :  { %v4087_v18 = vsub.f32 %v4067_v27, %v4083_v5  ;;  %v4195_v36 = vsel %vm7558_vm5, %v4190_v42, 0.0 }
 0xf40   :  { %v4095_v21 = vsel %vm7559_vm2, %v4090_v9, 0.0  ;;  %v4196_v29 = vadd.f32 %v4195_v36, %v4194_v7  ;;  %v4351_v9 = vsel %vm4208_vm0, 1.0, %v7453_v60 }
 0xf41   :  { %v4096_v61 = vadd.f32 %v4095_v21, %v4094_v28  ;;  %v4091_v40 = vmul.f32 %v7068_v20, %v4087_v18 }
 0xf42   :  { %v4198_v12 = vadd.f32 %v4197_v57, %v4196_v29 }
 0xf43   :  { %v4097_v25 = vsel %vm7561_vm14, %v4091_v40, 0.0 }
 0xf44   :  { %v772_v13 = vpop.xlane.xlu2 %771  ;;  %4199 = vadd.xlane.f32.xlu1 %v4198_v12  ;;  %v4098_v48 = vadd.f32 %v4097_v25, %v4096_v61 }
 0xf45   :  { %v773_v38 = vrot.slane %v772_v13, 4 }
 0xf46   :  { %4099 = vadd.xlane.f32.xlu2 %v4098_v48 }
 0xf47   :  { %v774_v16 = vadd.f32 %v773_v38, %v772_v13 }
 0xf49   :  { %v775_v50 = vrot.slane %v774_v16, 2 }
 0xf4b   :  { %v776_v14 = vadd.f32 %v775_v50, %v774_v16 }
 0xf4d   :  { %v672_v58 = vpop.xlane.xlu0 %671  ;;  %v777_v15 = vrot.slane %v776_v14, 1 }
 0xf4e   :  { %v673_v62 = vrot.slane %v672_v58, 4 }
 0xf4f   :  { %v778_v33 = vadd.f32 %v777_v15, %v776_v14 }
 0xf50   :  { %v674_v43 = vadd.f32 %v673_v62, %v672_v58 }
 0xf52   :  { %v675_v59 = vrot.slane %v674_v43, 2 }
 0xf54   :  { %v676_v28 = vadd.f32 %v675_v59, %v674_v43 }
 0xf55   :  { %v2532_v45 = vpop.xlane.xlu0 %2531 }
 0xf56   :  { %v677_v20 = vrot.slane %v676_v28, 1  ;;  %v2533_v34 = vrot.slane %v2532_v45, 4 }
 0xf58   :  { %v678_v10 = vadd.f32 %v677_v20, %v676_v28  ;;  %v2534_v55 = vadd.f32 %v2533_v34, %v2532_v45 }
 0xf5a   :  { %4354 = vpush %v678_v10  ;;  %v2535_v54 = vrot.slane %v2534_v55, 2 }
 0xf5b   :  { %4356 = vpush %v778_v33 }
 0xf5c   :  { %v2536_v63 = vadd.f32 %v2535_v54, %v2534_v55 }
 0xf5e   :  { %v2537_v47 = vrot.slane %v2536_v63, 1 }
 0xf60   :  { %v2538_v22 = vadd.f32 %v2537_v47, %v2536_v63 }
 0xf6b   :  { %v2432_v44 = vpop.xlane.xlu1 %2431 }
 0xf6c   :  { %v2433_v32 = vrot.slane %v2432_v44, 4 }
 0xf6e   :  { %v2434_v49 = vadd.f32 %v2433_v32, %v2432_v44 }
 0xf70   :  { %v2435_v56 = vrot.slane %v2434_v49, 2 }
 0xf72   :  { %v2436_v53 = vadd.f32 %v2435_v56, %v2434_v49 }
 0xf74   :  { %v2437_v41 = vrot.slane %v2436_v53, 1 }
 0xf76   :  { %v2438_v23 = vadd.f32 %v2437_v41, %v2436_v53 }
 0xf78   :  { %4358 = vpush %v2438_v23 }
 0xf79   :  { %4360 = vpush %v2538_v22 }
 0xf8b   :  { %s4355_s5 = spop %4354 }
 0xf8c   :  { %s4357_s10 = spop %4356  ;;  %v783_v30 = vstv %s4355_s5 }
 0xf8d   :  { %v786_v11 = vstv %s4357_s10  ;;  %v784_v5 = vmul.f32 %v4289_v4, %v783_v30 }
 0xf8e   :  { %v787_v18 = vmul.f32 %v4289_v4, %v786_v11 }
 0xfa9   :  { %s4359_s3 = spop %4358 }
 0xfaa   :  { %s4361_s2 = spop %4360  ;;  %v2543_v52 = vstv %s4359_s3 }
 0xfab   :  { %v2546_v17 = vstv %s4361_s2  ;;  %v2544_v42 = vmul.f32 %v4322_v51, %v2543_v52 }
 0xfac   :  { %v2547_v27 = vmul.f32 %v4322_v51, %v2546_v17 }
 0xfad   :  { %v2545_v24 = vadd.f32 %v2544_v42, %v784_v5 }
 0xfae   :  { %v2548_v60 = vadd.f32 %v2547_v27, %v787_v18 }
 0xfb7   :  { %v4200_v39 = vpop.xlane.xlu1 %4199 }
 0xfb8   :  { %v4201_v35 = vrot.slane %v4200_v39, 4 }
 0xfb9   :  { %v4100_v0 = vpop.xlane.xlu2 %4099 }
 0xfba   :  { %v4202_v3 = vadd.f32 %v4201_v35, %v4200_v39  ;;  %v4101_v46 = vrot.slane %v4100_v0, 4 }
 0xfbc   :  { %v4203_v2 = vrot.slane %v4202_v3, 2  ;;  %v4102_v31 = vadd.f32 %v4101_v46, %v4100_v0 }
 0xfbe   :  { %v4204_v37 = vadd.f32 %v4203_v2, %v4202_v3  ;;  %v4103_v6 = vrot.slane %v4102_v31, 2 }
 0xfc0   :  { %v4104_v1 = vadd.f32 %v4103_v6, %v4102_v31  ;;  %v4205_v8 = vrot.slane %v4204_v37, 1 }
 0xfc2   :  { %v4105_v7 = vrot.slane %v4104_v1, 1  ;;  %v4206_v19 = vadd.f32 %v4205_v8, %v4204_v37 }
 0xfc4   :  { %v4106_v26 = vadd.f32 %v4105_v7, %v4104_v1 }
 0xfc6   :  { %4362 = vpush %v4106_v26 }
 0xfc7   :  { %4364 = vpush %v4206_v19 }
 0xff7   :  { %s4363_s7 = spop %4362 }
 0xff8   :  { %v4211_v36 = vstv %s4363_s7  ;;  %s4365_s25 = spop %4364 }
 0xff9   :  { %v4212_v21 = vmul.f32 %v4351_v9, %v4211_v36  ;;  %v4214_v29 = vstv %s4365_s25 }
 0xffa   :  { %v4215_v61 = vmul.f32 %v4351_v9, %v4214_v29 }
 0xffb   :  { %v4213_v40 = vadd.f32 %v4212_v21, %v2545_v24 }
 0xffc   :  { %v4216_v57 = vadd.f32 %v4215_v61, %v2548_v60 }
 0xffd   :  { %4218 = vst.msk [vmem:[#allocation2] sm:$0x1] %vm7562_vm7, %v4213_v40 }
 0xffe   :  { %4219 = vst.msk [vmem:[#allocation4] sm:$0x1] %vm7563_vm15, %v4216_v57  ;;  %4232 = dma.vmem_to_hbm [thread:$0]  %s4228_s19, 16, %s4230_s27, [#allocation3]  }
 0xfff   :  { %4243 = dma.vmem_to_hbm [thread:$0]  %s4239_s1, 16, %s4241_s22, [#allocation5]  }
0x1000   :  { %4254 = dma.vmem_to_hbm [thread:$0]  %s4250_s23, 16, %s4252_s30, [#allocation5]  }
0x1001   :  { %4584 = dma.done.wait [#allocation3], 16  }
0x1002   :  { %4585 = vsyncadd [#allocation3], 4294967280 }
0x1003   :  { %4586 = dma.done.wait [#allocation5], 32  }
0x1004   :  { %4587 = vsyncadd [#allocation5], 4294967264 }
0x1005   :  { %4267 = vsyncpa [#allocation3], 1 }
0x1006   :  { %4268 = vsyncpa [#allocation5], 1 }

</bundles_post_ra>
